<compile_context>
chip_gen: v7x
topology: tpu7x:2x2x1
jax: 0.10.0
libtpu: 0.0.40
codegen_flags: <defaults>
</compile_context>

<pallas_src>
from functools import partial

import jax
import jax.numpy as jnp
import numpy as np
from jax import lax
from jax.experimental import pallas as pl
from jax.experimental.pallas import tpu as pltpu


def _same_pad(k: int):
    left = (k - 1) // 2
    return left, (k - 1) - left


@partial(jax.jit, static_argnames=("use_residual", "compute_dtype"))
def inception_block_forward(x_ncl, w_bneck, w_convs, w_res, bn_scale, bn_shift,
                            use_residual=True, compute_dtype=None):
    """Fused InceptionBlock.forward.

    x_ncl:    (N, Cin, L)   channels-first, like PyTorch.
    w_bneck:  (Cb, Cin, 1)  PyTorch Conv1d weight layout, or None (no bottleneck).
    w_convs:  list of 3 weights (Cout_i, Cin_i, K_i), PyTorch layout.
    w_res:    (Cout, Cin, 1) (only used when use_residual).
    bn_scale/bn_shift: (Cout,) eval-mode BN affine of the residual branch.
    compute_dtype: matmul operand dtype (e.g. jnp.bfloat16); accumulation is f32.
    Returns (N, Cout, L) in x's dtype.
    """
    N, Cin, L = x_ncl.shape
    out_dtype = x_ncl.dtype
    cdt = compute_dtype if compute_dtype is not None else x_ncl.dtype

    use_bneck = w_bneck is not None
    has_1x1 = use_bneck or use_residual
    Ks = [int(w.shape[2]) for w in w_convs]
    Cs = [int(w.shape[1]) for w in w_convs]
    Cos = [int(w.shape[0]) for w in w_convs]
    Cout = Cos[-1]
    Cb = int(w_bneck.shape[0]) if use_bneck else 0

    # ---- batch -> lane folding: make the lane (last) dim a multiple of 128 ----------------
    B_TILE = 1
    if L % 128 != 0:
        for bt in range(2, N + 1):
            if N % bt == 0 and (bt * L) % 128 == 0 and bt * L <= 8 * 128:
                B_TILE = bt
                break
    NB = N // B_TILE
    lanes = B_TILE * L

    # (N, Cin, L) -> (NB, Cin, B_TILE*L), samples laid out contiguously along lanes
    x_t = x_ncl.astype(cdt).reshape(NB, B_TILE, Cin, L)
    x_t = jnp.transpose(x_t, (0, 2, 1, 3)).reshape(NB, Cin, lanes)

    # within-sample lane position: used to mask conv taps at per-sample boundaries
    lpos = jnp.tile(jnp.arange(L, dtype=jnp.int32), B_TILE).reshape(1, lanes)

    inputs = [x_t, lpos]
    in_specs = [pl.BlockSpec((1, Cin, lanes), lambda g: (g, 0, 0)),
                pl.BlockSpec((1, lanes), lambda g: (0, 0))]

    # ---- bottleneck + residual 1x1 convs fused into one stacked matmul --------------------
    rows = []
    if use_bneck:
        rows.append(w_bneck[:, :, 0])                        # (Cb, Cin)
    if use_residual:
        rows.append(w_res[:, :, 0] * bn_scale[:, None])      # fold BN scale into weights
    if has_1x1:
        w1x1 = (jnp.concatenate(rows, axis=0) if len(rows) > 1 else rows[0]).astype(cdt)
        inputs.append(w1x1)
        in_specs.append(pl.BlockSpec(w1x1.shape, lambda g: (0, 0)))
    if use_residual:
        sh = bn_shift.reshape(Cout, 1).astype(jnp.float32)   # BN shift as (Cout, 1) bias
        inputs.append(sh)
        in_specs.append(pl.BlockSpec((Cout, 1), lambda g: (0, 0)))

    # ---- per-tap conv weights: (K, Cout_i, Cin_i) so each tap is a clean 2D slice ---------
    for w in w_convs:
        wt = jnp.transpose(w, (2, 0, 1)).astype(cdt)         # (K, Co, C)
        inputs.append(wt)
        in_specs.append(pl.BlockSpec(wt.shape, lambda g: (0, 0, 0)))

    # ---- advisory cost estimate ------------------------------------------------------------
    flops = 0
    if use_bneck:
        flops += 2 * Cb * Cin * L * N
    if use_residual:
        flops += 2 * Cout * Cin * L * N
    for K, C, Co in zip(Ks, Cs, Cos):
        flops += 2 * Co * C * K * L * N
    w_bytes = sum(int(np.prod(a.shape)) * a.dtype.itemsize for a in inputs[2:])
    bytes_accessed = (N * Cin * L + N * Cout * L) * jnp.dtype(out_dtype).itemsize + w_bytes

    # ------------------------------------- fused kernel -------------------------------------
    def kernel(*refs):
        it = iter(refs)
        x_ref = next(it)
        lpos_ref = next(it)
        w1_ref = next(it) if has_1x1 else None
        sh_ref = next(it) if use_residual else None
        wt_refs = [next(it) for _ in range(3)]
        o_ref = next(it)

        x = x_ref[0]                  # (Cin, lanes), compute dtype
        lpos = lpos_ref[...]          # (1, lanes), int32

        # bottleneck + (BN-scaled) residual 1x1 convs: ONE MXU matmul, rows split afterwards
        if has_1x1:
            br = jnp.dot(w1_ref[...], x, preferred_element_type=jnp.float32)
        h = br[:Cb] if use_bneck else x.astype(jnp.float32)           # (Cb|Cin, lanes), f32
        r = None
        if use_residual:
            r = jnp.maximum(br[Cb:] + sh_ref[...], 0.0)               # (Cout, lanes), f32

        # three same-padded convs by per-tap accumulation (no im2col scratch, no col stores)
        for i in range(3):
            K, C, Co = Ks[i], Cs[i], Cos[i]
            padl, _ = _same_pad(K)
            hw = h.astype(cdt)
            wt_ref = wt_refs[i]
            acc = None
            for k in range(K):
                s = k - padl                                          # input offset of this tap
                if s >= L or s <= -L:                                 # can never contribute
                    continue
                p = jnp.dot(wt_ref[k], hw,
                            preferred_element_type=jnp.float32)       # (Co, lanes), f32
                if s > 0:      # pull from the right, zero-fill the tail
                    p = jnp.concatenate(
                        [p[:, s:], jnp.zeros((Co, s), jnp.float32)], axis=1)
                    if B_TILE > 1:                                    # mask cross-sample leak
                        p = p * (lpos < (L - s)).astype(jnp.float32)
                elif s < 0:    # pull from the left, zero-fill the head
                    p = jnp.concatenate(
                        [jnp.zeros((Co, -s), jnp.float32), p[:, :lanes + s]], axis=1)
                    if B_TILE > 1:
                        p = p * (lpos >= (-s)).astype(jnp.float32)
                acc = p if acc is None else acc + p
            h = acc                                                   # (Co, lanes), f32

        if r is not None:
            h = h + r
        o_ref[0] = h.astype(o_ref.dtype)

    out = pl.pallas_call(
        kernel,
        out_shape=jax.ShapeDtypeStruct((NB, Cout, lanes), out_dtype),
        grid_spec=pltpu.PrefetchScalarGridSpec(
            num_scalar_prefetch=0,
            grid=(NB,),
            in_specs=in_specs,
            out_specs=pl.BlockSpec((1, Cout, lanes), lambda g: (g, 0, 0))),
        compiler_params=pltpu.CompilerParams(
            dimension_semantics=("parallel",),
            vmem_limit_bytes=32 * 1024 * 1024),   # explicit budget; safe on v5e/v6e/v7x
        cost_estimate=pl.CostEstimate(flops=flops, transcendentals=0,
                                      bytes_accessed=bytes_accessed),
    )(*inputs)

    # un-fold lanes back to (N, Cout, L)
    out = out.reshape(NB, Cout, B_TILE, L)
    out = jnp.transpose(out, (0, 2, 1, 3)).reshape(N, Cout, L)
    return out


# ----------------------- pure-JAX reference (correctness check) -----------------------
def _ref_conv1d_same(x_ncl, w_oik):
    K = w_oik.shape[2]
    padl, padr = _same_pad(K)
    return lax.conv_general_dilated(x_ncl, w_oik, window_strides=(1,),
                                    padding=[(padl, padr)],
                                    dimension_numbers=('NCW', 'OIW', 'NCW'))


def _ref_forward(x_ncl, w_bneck, w_convs, w_res, bn_scale, bn_shift):
    h = _ref_conv1d_same(x_ncl, w_bneck) if w_bneck is not None else x_ncl
    for w in w_convs:
        h = _ref_conv1d_same(h, w)
    r = _ref_conv1d_same(x_ncl, w_res)
    r = jnp.maximum(r * bn_scale[None, :, None] + bn_shift[None, :, None], 0.0)
    return h + r


if __name__ == "__main__":
    N, Cin, L = 2, 4, 64
    Cout, Cb, Ksz = 8, 32, 41                     # out_channels, bottleneck_channels, kernel_size
    eps = 1e-5

    key = jax.random.PRNGKey(0)
    keys = jax.random.split(key, 10)

    def make_w(k, out_c, in_c, ks):
        return jax.random.normal(k, (out_c, in_c, ks), jnp.float32) * 0.1   # PyTorch layout

    kernel_sizes = [Ksz // (2 ** i) for i in range(3)]                      # [41, 20, 10]

    w_bneck = make_w(keys[0], Cb, Cin, 1)
    w_convs = [make_w(keys[1], Cout, Cb, kernel_sizes[0]),
               make_w(keys[2], Cout, Cout, kernel_sizes[1]),
               make_w(keys[3], Cout, Cout, kernel_sizes[2])]
    w_res = make_w(keys[4], Cout, Cin, 1)

    gamma = 1.0 + 0.1 * jax.random.normal(keys[5], (Cout,), jnp.float32)
    beta = 0.1 * jax.random.normal(keys[6], (Cout,), jnp.float32)
    r_mean = 0.1 * jax.random.normal(keys[7], (Cout,), jnp.float32)
    r_var = 1.0 + 0.1 * jnp.abs(jax.random.normal(keys[8], (Cout,), jnp.float32))
    bn_scale = gamma / jnp.sqrt(r_var + eps)
    bn_shift = beta - r_mean * bn_scale

    x_ncl = jax.random.normal(keys[9], (N, Cin, L), jnp.float32)

    ref = _ref_forward(x_ncl, w_bneck, w_convs, w_res, bn_scale, bn_shift)

    # f32 path
    out = inception_block_forward(x_ncl, w_bneck, w_convs, w_res, bn_scale, bn_shift,
                                  use_residual=True)
    out = jax.block_until_ready(out)
    np.testing.assert_allclose(np.asarray(out), np.asarray(ref), rtol=2e-3, atol=2e-3)

    # bf16 operand path (f32 accumulation) — intentionally loose tolerance (bf16 recasts
    # of the intermediate activations between convs compound error vs. the f32 reference).
    out_bf16 = inception_block_forward(x_ncl, w_bneck, w_convs, w_res, bn_scale, bn_shift,
                                       use_residual=True, compute_dtype=jnp.bfloat16)
    out_bf16 = jax.block_until_ready(out_bf16)
    np.testing.assert_allclose(np.asarray(out_bf16, dtype=np.float32), np.asarray(ref),
                               rtol=1e-1, atol=1e-1)

    print("KERNEL_OK")
</pallas_src>

<mosaic_0001>
module attributes {stable_mosaic.version = 11 : i64} {
  func.func @kernel(%arg0: i32, %arg1: memref<1x4x128xf32, #tpu.memory_space<vmem>>, %arg2: memref<1x128xi32, #tpu.memory_space<vmem>>, %arg3: memref<40x4xf32, #tpu.memory_space<vmem>>, %arg4: memref<8x1xf32, #tpu.memory_space<vmem>>, %arg5: memref<41x8x32xf32, #tpu.memory_space<vmem>>, %arg6: memref<20x8x8xf32, #tpu.memory_space<vmem>>, %arg7: memref<10x8x8xf32, #tpu.memory_space<vmem>>, %arg8: memref<1x8x128xf32, #tpu.memory_space<vmem>>) attributes {dimension_semantics = [#tpu.dimension_semantics<parallel>], iteration_bounds = array<i64: 1>, scalar_prefetch = 0 : i64, scratch_operands = 0 : i64, tpu.core_type = #tpu.core_type<tc>, window_params = [{transform_indices = @transform_0, window_bounds = array<i64: 1, 4, 128>}, {pipeline_mode = #tpu.pipeline_mode<synchronous>, transform_indices = @transform_1, window_bounds = array<i64: 1, 128>}, {pipeline_mode = #tpu.pipeline_mode<synchronous>, transform_indices = @transform_2, window_bounds = array<i64: 40, 4>}, {pipeline_mode = #tpu.pipeline_mode<synchronous>, transform_indices = @transform_3, window_bounds = array<i64: 8, 1>}, {pipeline_mode = #tpu.pipeline_mode<synchronous>, transform_indices = @transform_4, window_bounds = array<i64: 41, 8, 32>}, {pipeline_mode = #tpu.pipeline_mode<synchronous>, transform_indices = @transform_5, window_bounds = array<i64: 20, 8, 8>}, {pipeline_mode = #tpu.pipeline_mode<synchronous>, transform_indices = @transform_6, window_bounds = array<i64: 10, 8, 8>}, {transform_indices = @transform_7, window_bounds = array<i64: 1, 8, 128>}]} {
    %c0 = arith.constant 0 : index
    %c0_0 = arith.constant 0 : index
    %c0_1 = arith.constant 0 : index
    %0 = vector.load %arg1[%c0, %c0_0, %c0_1] : memref<1x4x128xf32, #tpu.memory_space<vmem>>, vector<1x4x128xf32>
    %1 = vector.shape_cast %0 : vector<1x4x128xf32> to vector<4x128xf32>
    %c0_2 = arith.constant 0 : index
    %c0_3 = arith.constant 0 : index
    %2 = vector.load %arg2[%c0_2, %c0_3] : memref<1x128xi32, #tpu.memory_space<vmem>>, vector<1x128xi32>
    %c0_4 = arith.constant 0 : index
    %c0_5 = arith.constant 0 : index
    %3 = vector.load %arg3[%c0_4, %c0_5] : memref<40x4xf32, #tpu.memory_space<vmem>>, vector<40x4xf32>
    %cst = arith.constant dense<0.000000e+00> : vector<40x128xf32>
    %4 = tpu.matmul %3, %1, %cst {dimension_numbers = #tpu.dot_dimension_numbers<[1], [0], [0], [1], [0, 0, 1, 1], [], []>} : vector<40x4xf32>, vector<4x128xf32>, vector<40x128xf32> -> vector<40x128xf32>
    %5 = vector.extract_strided_slice %4 {offsets = [0, 0], sizes = [32, 128], strides = [1, 1]} : vector<40x128xf32> to vector<32x128xf32>
    %6 = vector.extract_strided_slice %4 {offsets = [32, 0], sizes = [8, 128], strides = [1, 1]} : vector<40x128xf32> to vector<8x128xf32>
    %c0_6 = arith.constant 0 : index
    %c0_7 = arith.constant 0 : index
    %7 = vector.load %arg4[%c0_6, %c0_7] : memref<8x1xf32, #tpu.memory_space<vmem>>, vector<8x1xf32>
    %8 = vector.broadcast %7 : vector<8x1xf32> to vector<8x128xf32>
    %9 = arith.addf %6, %8 : vector<8x128xf32>
    %cst_8 = arith.constant 0.000000e+00 : f32
    %10 = vector.broadcast %cst_8 : f32 to vector<8x128xf32>
    %11 = arith.maximumf %9, %10 : vector<8x128xf32>
    %c0_9 = arith.constant 0 : index
    %c0_10 = arith.constant 0 : index
    %c0_11 = arith.constant 0 : index
    %12 = vector.load %arg5[%c0_9, %c0_10, %c0_11] : memref<41x8x32xf32, #tpu.memory_space<vmem>>, vector<1x8x32xf32>
    %13 = vector.shape_cast %12 : vector<1x8x32xf32> to vector<8x32xf32>
    %cst_12 = arith.constant dense<0.000000e+00> : vector<8x128xf32>
    %14 = tpu.matmul %13, %5, %cst_12 {dimension_numbers = #tpu.dot_dimension_numbers<[1], [0], [0], [1], [0, 0, 1, 1], [], []>} : vector<8x32xf32>, vector<32x128xf32>, vector<8x128xf32> -> vector<8x128xf32>
    %cst_13 = arith.constant 0.000000e+00 : f32
    %15 = vector.broadcast %cst_13 : f32 to vector<8x20xf32>
    %16 = vector.extract_strided_slice %14 {offsets = [0, 0], sizes = [8, 108], strides = [1, 1]} : vector<8x128xf32> to vector<8x108xf32>
    %17 = tpu.concatenate %15, %16 in 1 : vector<8x20xf32>, vector<8x108xf32> -> vector<8x128xf32>
    %c20_i32 = arith.constant 20 : i32
    %18 = vector.broadcast %c20_i32 : i32 to vector<1x128xi32>
    %19 = arith.cmpi sge, %2, %18 : vector<1x128xi32>
    %20 = arith.extui %19 : vector<1x128xi1> to vector<1x128xi32>
    %21 = arith.sitofp %20 : vector<1x128xi32> to vector<1x128xf32>
    %22 = vector.broadcast %21 : vector<1x128xf32> to vector<8x128xf32>
    %23 = arith.mulf %17, %22 : vector<8x128xf32>
    %c1 = arith.constant 1 : index
    %c0_14 = arith.constant 0 : index
    %c0_15 = arith.constant 0 : index
    %24 = vector.load %arg5[%c1, %c0_14, %c0_15] : memref<41x8x32xf32, #tpu.memory_space<vmem>>, vector<1x8x32xf32>
    %25 = vector.shape_cast %24 : vector<1x8x32xf32> to vector<8x32xf32>
    %cst_16 = arith.constant dense<0.000000e+00> : vector<8x128xf32>
    %26 = tpu.matmul %25, %5, %cst_16 {dimension_numbers = #tpu.dot_dimension_numbers<[1], [0], [0], [1], [0, 0, 1, 1], [], []>} : vector<8x32xf32>, vector<32x128xf32>, vector<8x128xf32> -> vector<8x128xf32>
    %cst_17 = arith.constant 0.000000e+00 : f32
    %27 = vector.broadcast %cst_17 : f32 to vector<8x19xf32>
    %28 = vector.extract_strided_slice %26 {offsets = [0, 0], sizes = [8, 109], strides = [1, 1]} : vector<8x128xf32> to vector<8x109xf32>
    %29 = tpu.concatenate %27, %28 in 1 : vector<8x19xf32>, vector<8x109xf32> -> vector<8x128xf32>
    %c19_i32 = arith.constant 19 : i32
    %30 = vector.broadcast %c19_i32 : i32 to vector<1x128xi32>
    %31 = arith.cmpi sge, %2, %30 : vector<1x128xi32>
    %32 = arith.extui %31 : vector<1x128xi1> to vector<1x128xi32>
    %33 = arith.sitofp %32 : vector<1x128xi32> to vector<1x128xf32>
    %34 = vector.broadcast %33 : vector<1x128xf32> to vector<8x128xf32>
    %35 = arith.mulf %29, %34 : vector<8x128xf32>
    %36 = arith.addf %23, %35 : vector<8x128xf32>
    %c2 = arith.constant 2 : index
    %c0_18 = arith.constant 0 : index
    %c0_19 = arith.constant 0 : index
    %37 = vector.load %arg5[%c2, %c0_18, %c0_19] : memref<41x8x32xf32, #tpu.memory_space<vmem>>, vector<1x8x32xf32>
    %38 = vector.shape_cast %37 : vector<1x8x32xf32> to vector<8x32xf32>
    %cst_20 = arith.constant dense<0.000000e+00> : vector<8x128xf32>
    %39 = tpu.matmul %38, %5, %cst_20 {dimension_numbers = #tpu.dot_dimension_numbers<[1], [0], [0], [1], [0, 0, 1, 1], [], []>} : vector<8x32xf32>, vector<32x128xf32>, vector<8x128xf32> -> vector<8x128xf32>
    %cst_21 = arith.constant 0.000000e+00 : f32
    %40 = vector.broadcast %cst_21 : f32 to vector<8x18xf32>
    %41 = vector.extract_strided_slice %39 {offsets = [0, 0], sizes = [8, 110], strides = [1, 1]} : vector<8x128xf32> to vector<8x110xf32>
    %42 = tpu.concatenate %40, %41 in 1 : vector<8x18xf32>, vector<8x110xf32> -> vector<8x128xf32>
    %c18_i32 = arith.constant 18 : i32
    %43 = vector.broadcast %c18_i32 : i32 to vector<1x128xi32>
    %44 = arith.cmpi sge, %2, %43 : vector<1x128xi32>
    %45 = arith.extui %44 : vector<1x128xi1> to vector<1x128xi32>
    %46 = arith.sitofp %45 : vector<1x128xi32> to vector<1x128xf32>
    %47 = vector.broadcast %46 : vector<1x128xf32> to vector<8x128xf32>
    %48 = arith.mulf %42, %47 : vector<8x128xf32>
    %49 = arith.addf %36, %48 : vector<8x128xf32>
    %c3 = arith.constant 3 : index
    %c0_22 = arith.constant 0 : index
    %c0_23 = arith.constant 0 : index
    %50 = vector.load %arg5[%c3, %c0_22, %c0_23] : memref<41x8x32xf32, #tpu.memory_space<vmem>>, vector<1x8x32xf32>
    %51 = vector.shape_cast %50 : vector<1x8x32xf32> to vector<8x32xf32>
    %cst_24 = arith.constant dense<0.000000e+00> : vector<8x128xf32>
    %52 = tpu.matmul %51, %5, %cst_24 {dimension_numbers = #tpu.dot_dimension_numbers<[1], [0], [0], [1], [0, 0, 1, 1], [], []>} : vector<8x32xf32>, vector<32x128xf32>, vector<8x128xf32> -> vector<8x128xf32>
    %cst_25 = arith.constant 0.000000e+00 : f32
    %53 = vector.broadcast %cst_25 : f32 to vector<8x17xf32>
    %54 = vector.extract_strided_slice %52 {offsets = [0, 0], sizes = [8, 111], strides = [1, 1]} : vector<8x128xf32> to vector<8x111xf32>
    %55 = tpu.concatenate %53, %54 in 1 : vector<8x17xf32>, vector<8x111xf32> -> vector<8x128xf32>
    %c17_i32 = arith.constant 17 : i32
    %56 = vector.broadcast %c17_i32 : i32 to vector<1x128xi32>
    %57 = arith.cmpi sge, %2, %56 : vector<1x128xi32>
    %58 = arith.extui %57 : vector<1x128xi1> to vector<1x128xi32>
    %59 = arith.sitofp %58 : vector<1x128xi32> to vector<1x128xf32>
    %60 = vector.broadcast %59 : vector<1x128xf32> to vector<8x128xf32>
    %61 = arith.mulf %55, %60 : vector<8x128xf32>
    %62 = arith.addf %49, %61 : vector<8x128xf32>
    %c4 = arith.constant 4 : index
    %c0_26 = arith.constant 0 : index
    %c0_27 = arith.constant 0 : index
    %63 = vector.load %arg5[%c4, %c0_26, %c0_27] : memref<41x8x32xf32, #tpu.memory_space<vmem>>, vector<1x8x32xf32>
    %64 = vector.shape_cast %63 : vector<1x8x32xf32> to vector<8x32xf32>
    %cst_28 = arith.constant dense<0.000000e+00> : vector<8x128xf32>
    %65 = tpu.matmul %64, %5, %cst_28 {dimension_numbers = #tpu.dot_dimension_numbers<[1], [0], [0], [1], [0, 0, 1, 1], [], []>} : vector<8x32xf32>, vector<32x128xf32>, vector<8x128xf32> -> vector<8x128xf32>
    %cst_29 = arith.constant 0.000000e+00 : f32
    %66 = vector.broadcast %cst_29 : f32 to vector<8x16xf32>
    %67 = vector.extract_strided_slice %65 {offsets = [0, 0], sizes = [8, 112], strides = [1, 1]} : vector<8x128xf32> to vector<8x112xf32>
    %68 = tpu.concatenate %66, %67 in 1 : vector<8x16xf32>, vector<8x112xf32> -> vector<8x128xf32>
    %c16_i32 = arith.constant 16 : i32
    %69 = vector.broadcast %c16_i32 : i32 to vector<1x128xi32>
    %70 = arith.cmpi sge, %2, %69 : vector<1x128xi32>
    %71 = arith.extui %70 : vector<1x128xi1> to vector<1x128xi32>
    %72 = arith.sitofp %71 : vector<1x128xi32> to vector<1x128xf32>
    %73 = vector.broadcast %72 : vector<1x128xf32> to vector<8x128xf32>
    %74 = arith.mulf %68, %73 : vector<8x128xf32>
    %75 = arith.addf %62, %74 : vector<8x128xf32>
    %c5 = arith.constant 5 : index
    %c0_30 = arith.constant 0 : index
    %c0_31 = arith.constant 0 : index
    %76 = vector.load %arg5[%c5, %c0_30, %c0_31] : memref<41x8x32xf32, #tpu.memory_space<vmem>>, vector<1x8x32xf32>
    %77 = vector.shape_cast %76 : vector<1x8x32xf32> to vector<8x32xf32>
    %cst_32 = arith.constant dense<0.000000e+00> : vector<8x128xf32>
    %78 = tpu.matmul %77, %5, %cst_32 {dimension_numbers = #tpu.dot_dimension_numbers<[1], [0], [0], [1], [0, 0, 1, 1], [], []>} : vector<8x32xf32>, vector<32x128xf32>, vector<8x128xf32> -> vector<8x128xf32>
    %cst_33 = arith.constant 0.000000e+00 : f32
    %79 = vector.broadcast %cst_33 : f32 to vector<8x15xf32>
    %80 = vector.extract_strided_slice %78 {offsets = [0, 0], sizes = [8, 113], strides = [1, 1]} : vector<8x128xf32> to vector<8x113xf32>
    %81 = tpu.concatenate %79, %80 in 1 : vector<8x15xf32>, vector<8x113xf32> -> vector<8x128xf32>
    %c15_i32 = arith.constant 15 : i32
    %82 = vector.broadcast %c15_i32 : i32 to vector<1x128xi32>
    %83 = arith.cmpi sge, %2, %82 : vector<1x128xi32>
    %84 = arith.extui %83 : vector<1x128xi1> to vector<1x128xi32>
    %85 = arith.sitofp %84 : vector<1x128xi32> to vector<1x128xf32>
    %86 = vector.broadcast %85 : vector<1x128xf32> to vector<8x128xf32>
    %87 = arith.mulf %81, %86 : vector<8x128xf32>
    %88 = arith.addf %75, %87 : vector<8x128xf32>
    %c6 = arith.constant 6 : index
    %c0_34 = arith.constant 0 : index
    %c0_35 = arith.constant 0 : index
    %89 = vector.load %arg5[%c6, %c0_34, %c0_35] : memref<41x8x32xf32, #tpu.memory_space<vmem>>, vector<1x8x32xf32>
    %90 = vector.shape_cast %89 : vector<1x8x32xf32> to vector<8x32xf32>
    %cst_36 = arith.constant dense<0.000000e+00> : vector<8x128xf32>
    %91 = tpu.matmul %90, %5, %cst_36 {dimension_numbers = #tpu.dot_dimension_numbers<[1], [0], [0], [1], [0, 0, 1, 1], [], []>} : vector<8x32xf32>, vector<32x128xf32>, vector<8x128xf32> -> vector<8x128xf32>
    %cst_37 = arith.constant 0.000000e+00 : f32
    %92 = vector.broadcast %cst_37 : f32 to vector<8x14xf32>
    %93 = vector.extract_strided_slice %91 {offsets = [0, 0], sizes = [8, 114], strides = [1, 1]} : vector<8x128xf32> to vector<8x114xf32>
    %94 = tpu.concatenate %92, %93 in 1 : vector<8x14xf32>, vector<8x114xf32> -> vector<8x128xf32>
    %c14_i32 = arith.constant 14 : i32
    %95 = vector.broadcast %c14_i32 : i32 to vector<1x128xi32>
    %96 = arith.cmpi sge, %2, %95 : vector<1x128xi32>
    %97 = arith.extui %96 : vector<1x128xi1> to vector<1x128xi32>
    %98 = arith.sitofp %97 : vector<1x128xi32> to vector<1x128xf32>
    %99 = vector.broadcast %98 : vector<1x128xf32> to vector<8x128xf32>
    %100 = arith.mulf %94, %99 : vector<8x128xf32>
    %101 = arith.addf %88, %100 : vector<8x128xf32>
    %c7 = arith.constant 7 : index
    %c0_38 = arith.constant 0 : index
    %c0_39 = arith.constant 0 : index
    %102 = vector.load %arg5[%c7, %c0_38, %c0_39] : memref<41x8x32xf32, #tpu.memory_space<vmem>>, vector<1x8x32xf32>
    %103 = vector.shape_cast %102 : vector<1x8x32xf32> to vector<8x32xf32>
    %cst_40 = arith.constant dense<0.000000e+00> : vector<8x128xf32>
    %104 = tpu.matmul %103, %5, %cst_40 {dimension_numbers = #tpu.dot_dimension_numbers<[1], [0], [0], [1], [0, 0, 1, 1], [], []>} : vector<8x32xf32>, vector<32x128xf32>, vector<8x128xf32> -> vector<8x128xf32>
    %cst_41 = arith.constant 0.000000e+00 : f32
    %105 = vector.broadcast %cst_41 : f32 to vector<8x13xf32>
    %106 = vector.extract_strided_slice %104 {offsets = [0, 0], sizes = [8, 115], strides = [1, 1]} : vector<8x128xf32> to vector<8x115xf32>
    %107 = tpu.concatenate %105, %106 in 1 : vector<8x13xf32>, vector<8x115xf32> -> vector<8x128xf32>
    %c13_i32 = arith.constant 13 : i32
    %108 = vector.broadcast %c13_i32 : i32 to vector<1x128xi32>
    %109 = arith.cmpi sge, %2, %108 : vector<1x128xi32>
    %110 = arith.extui %109 : vector<1x128xi1> to vector<1x128xi32>
    %111 = arith.sitofp %110 : vector<1x128xi32> to vector<1x128xf32>
    %112 = vector.broadcast %111 : vector<1x128xf32> to vector<8x128xf32>
    %113 = arith.mulf %107, %112 : vector<8x128xf32>
    %114 = arith.addf %101, %113 : vector<8x128xf32>
    %c8 = arith.constant 8 : index
    %c0_42 = arith.constant 0 : index
    %c0_43 = arith.constant 0 : index
    %115 = vector.load %arg5[%c8, %c0_42, %c0_43] : memref<41x8x32xf32, #tpu.memory_space<vmem>>, vector<1x8x32xf32>
    %116 = vector.shape_cast %115 : vector<1x8x32xf32> to vector<8x32xf32>
    %cst_44 = arith.constant dense<0.000000e+00> : vector<8x128xf32>
    %117 = tpu.matmul %116, %5, %cst_44 {dimension_numbers = #tpu.dot_dimension_numbers<[1], [0], [0], [1], [0, 0, 1, 1], [], []>} : vector<8x32xf32>, vector<32x128xf32>, vector<8x128xf32> -> vector<8x128xf32>
    %cst_45 = arith.constant 0.000000e+00 : f32
    %118 = vector.broadcast %cst_45 : f32 to vector<8x12xf32>
    %119 = vector.extract_strided_slice %117 {offsets = [0, 0], sizes = [8, 116], strides = [1, 1]} : vector<8x128xf32> to vector<8x116xf32>
    %120 = tpu.concatenate %118, %119 in 1 : vector<8x12xf32>, vector<8x116xf32> -> vector<8x128xf32>
    %c12_i32 = arith.constant 12 : i32
    %121 = vector.broadcast %c12_i32 : i32 to vector<1x128xi32>
    %122 = arith.cmpi sge, %2, %121 : vector<1x128xi32>
    %123 = arith.extui %122 : vector<1x128xi1> to vector<1x128xi32>
    %124 = arith.sitofp %123 : vector<1x128xi32> to vector<1x128xf32>
    %125 = vector.broadcast %124 : vector<1x128xf32> to vector<8x128xf32>
    %126 = arith.mulf %120, %125 : vector<8x128xf32>
    %127 = arith.addf %114, %126 : vector<8x128xf32>
    %c9 = arith.constant 9 : index
    %c0_46 = arith.constant 0 : index
    %c0_47 = arith.constant 0 : index
    %128 = vector.load %arg5[%c9, %c0_46, %c0_47] : memref<41x8x32xf32, #tpu.memory_space<vmem>>, vector<1x8x32xf32>
    %129 = vector.shape_cast %128 : vector<1x8x32xf32> to vector<8x32xf32>
    %cst_48 = arith.constant dense<0.000000e+00> : vector<8x128xf32>
    %130 = tpu.matmul %129, %5, %cst_48 {dimension_numbers = #tpu.dot_dimension_numbers<[1], [0], [0], [1], [0, 0, 1, 1], [], []>} : vector<8x32xf32>, vector<32x128xf32>, vector<8x128xf32> -> vector<8x128xf32>
    %cst_49 = arith.constant 0.000000e+00 : f32
    %131 = vector.broadcast %cst_49 : f32 to vector<8x11xf32>
    %132 = vector.extract_strided_slice %130 {offsets = [0, 0], sizes = [8, 117], strides = [1, 1]} : vector<8x128xf32> to vector<8x117xf32>
    %133 = tpu.concatenate %131, %132 in 1 : vector<8x11xf32>, vector<8x117xf32> -> vector<8x128xf32>
    %c11_i32 = arith.constant 11 : i32
    %134 = vector.broadcast %c11_i32 : i32 to vector<1x128xi32>
    %135 = arith.cmpi sge, %2, %134 : vector<1x128xi32>
    %136 = arith.extui %135 : vector<1x128xi1> to vector<1x128xi32>
    %137 = arith.sitofp %136 : vector<1x128xi32> to vector<1x128xf32>
    %138 = vector.broadcast %137 : vector<1x128xf32> to vector<8x128xf32>
    %139 = arith.mulf %133, %138 : vector<8x128xf32>
    %140 = arith.addf %127, %139 : vector<8x128xf32>
    %c10 = arith.constant 10 : index
    %c0_50 = arith.constant 0 : index
    %c0_51 = arith.constant 0 : index
    %141 = vector.load %arg5[%c10, %c0_50, %c0_51] : memref<41x8x32xf32, #tpu.memory_space<vmem>>, vector<1x8x32xf32>
    %142 = vector.shape_cast %141 : vector<1x8x32xf32> to vector<8x32xf32>
    %cst_52 = arith.constant dense<0.000000e+00> : vector<8x128xf32>
    %143 = tpu.matmul %142, %5, %cst_52 {dimension_numbers = #tpu.dot_dimension_numbers<[1], [0], [0], [1], [0, 0, 1, 1], [], []>} : vector<8x32xf32>, vector<32x128xf32>, vector<8x128xf32> -> vector<8x128xf32>
    %cst_53 = arith.constant 0.000000e+00 : f32
    %144 = vector.broadcast %cst_53 : f32 to vector<8x10xf32>
    %145 = vector.extract_strided_slice %143 {offsets = [0, 0], sizes = [8, 118], strides = [1, 1]} : vector<8x128xf32> to vector<8x118xf32>
    %146 = tpu.concatenate %144, %145 in 1 : vector<8x10xf32>, vector<8x118xf32> -> vector<8x128xf32>
    %c10_i32 = arith.constant 10 : i32
    %147 = vector.broadcast %c10_i32 : i32 to vector<1x128xi32>
    %148 = arith.cmpi sge, %2, %147 : vector<1x128xi32>
    %149 = arith.extui %148 : vector<1x128xi1> to vector<1x128xi32>
    %150 = arith.sitofp %149 : vector<1x128xi32> to vector<1x128xf32>
    %151 = vector.broadcast %150 : vector<1x128xf32> to vector<8x128xf32>
    %152 = arith.mulf %146, %151 : vector<8x128xf32>
    %153 = arith.addf %140, %152 : vector<8x128xf32>
    %c11 = arith.constant 11 : index
    %c0_54 = arith.constant 0 : index
    %c0_55 = arith.constant 0 : index
    %154 = vector.load %arg5[%c11, %c0_54, %c0_55] : memref<41x8x32xf32, #tpu.memory_space<vmem>>, vector<1x8x32xf32>
    %155 = vector.shape_cast %154 : vector<1x8x32xf32> to vector<8x32xf32>
    %cst_56 = arith.constant dense<0.000000e+00> : vector<8x128xf32>
    %156 = tpu.matmul %155, %5, %cst_56 {dimension_numbers = #tpu.dot_dimension_numbers<[1], [0], [0], [1], [0, 0, 1, 1], [], []>} : vector<8x32xf32>, vector<32x128xf32>, vector<8x128xf32> -> vector<8x128xf32>
    %cst_57 = arith.constant 0.000000e+00 : f32
    %157 = vector.broadcast %cst_57 : f32 to vector<8x9xf32>
    %158 = vector.extract_strided_slice %156 {offsets = [0, 0], sizes = [8, 119], strides = [1, 1]} : vector<8x128xf32> to vector<8x119xf32>
    %159 = tpu.concatenate %157, %158 in 1 : vector<8x9xf32>, vector<8x119xf32> -> vector<8x128xf32>
    %c9_i32 = arith.constant 9 : i32
    %160 = vector.broadcast %c9_i32 : i32 to vector<1x128xi32>
    %161 = arith.cmpi sge, %2, %160 : vector<1x128xi32>
    %162 = arith.extui %161 : vector<1x128xi1> to vector<1x128xi32>
    %163 = arith.sitofp %162 : vector<1x128xi32> to vector<1x128xf32>
    %164 = vector.broadcast %163 : vector<1x128xf32> to vector<8x128xf32>
    %165 = arith.mulf %159, %164 : vector<8x128xf32>
    %166 = arith.addf %153, %165 : vector<8x128xf32>
    %c12 = arith.constant 12 : index
    %c0_58 = arith.constant 0 : index
    %c0_59 = arith.constant 0 : index
    %167 = vector.load %arg5[%c12, %c0_58, %c0_59] : memref<41x8x32xf32, #tpu.memory_space<vmem>>, vector<1x8x32xf32>
    %168 = vector.shape_cast %167 : vector<1x8x32xf32> to vector<8x32xf32>
    %cst_60 = arith.constant dense<0.000000e+00> : vector<8x128xf32>
    %169 = tpu.matmul %168, %5, %cst_60 {dimension_numbers = #tpu.dot_dimension_numbers<[1], [0], [0], [1], [0, 0, 1, 1], [], []>} : vector<8x32xf32>, vector<32x128xf32>, vector<8x128xf32> -> vector<8x128xf32>
    %cst_61 = arith.constant 0.000000e+00 : f32
    %170 = vector.broadcast %cst_61 : f32 to vector<8x8xf32>
    %171 = vector.extract_strided_slice %169 {offsets = [0, 0], sizes = [8, 120], strides = [1, 1]} : vector<8x128xf32> to vector<8x120xf32>
    %172 = tpu.concatenate %170, %171 in 1 : vector<8x8xf32>, vector<8x120xf32> -> vector<8x128xf32>
    %c8_i32 = arith.constant 8 : i32
    %173 = vector.broadcast %c8_i32 : i32 to vector<1x128xi32>
    %174 = arith.cmpi sge, %2, %173 : vector<1x128xi32>
    %175 = arith.extui %174 : vector<1x128xi1> to vector<1x128xi32>
    %176 = arith.sitofp %175 : vector<1x128xi32> to vector<1x128xf32>
    %177 = vector.broadcast %176 : vector<1x128xf32> to vector<8x128xf32>
    %178 = arith.mulf %172, %177 : vector<8x128xf32>
    %179 = arith.addf %166, %178 : vector<8x128xf32>
    %c13 = arith.constant 13 : index
    %c0_62 = arith.constant 0 : index
    %c0_63 = arith.constant 0 : index
    %180 = vector.load %arg5[%c13, %c0_62, %c0_63] : memref<41x8x32xf32, #tpu.memory_space<vmem>>, vector<1x8x32xf32>
    %181 = vector.shape_cast %180 : vector<1x8x32xf32> to vector<8x32xf32>
    %cst_64 = arith.constant dense<0.000000e+00> : vector<8x128xf32>
    %182 = tpu.matmul %181, %5, %cst_64 {dimension_numbers = #tpu.dot_dimension_numbers<[1], [0], [0], [1], [0, 0, 1, 1], [], []>} : vector<8x32xf32>, vector<32x128xf32>, vector<8x128xf32> -> vector<8x128xf32>
    %cst_65 = arith.constant 0.000000e+00 : f32
    %183 = vector.broadcast %cst_65 : f32 to vector<8x7xf32>
    %184 = vector.extract_strided_slice %182 {offsets = [0, 0], sizes = [8, 121], strides = [1, 1]} : vector<8x128xf32> to vector<8x121xf32>
    %185 = tpu.concatenate %183, %184 in 1 : vector<8x7xf32>, vector<8x121xf32> -> vector<8x128xf32>
    %c7_i32 = arith.constant 7 : i32
    %186 = vector.broadcast %c7_i32 : i32 to vector<1x128xi32>
    %187 = arith.cmpi sge, %2, %186 : vector<1x128xi32>
    %188 = arith.extui %187 : vector<1x128xi1> to vector<1x128xi32>
    %189 = arith.sitofp %188 : vector<1x128xi32> to vector<1x128xf32>
    %190 = vector.broadcast %189 : vector<1x128xf32> to vector<8x128xf32>
    %191 = arith.mulf %185, %190 : vector<8x128xf32>
    %192 = arith.addf %179, %191 : vector<8x128xf32>
    %c14 = arith.constant 14 : index
    %c0_66 = arith.constant 0 : index
    %c0_67 = arith.constant 0 : index
    %193 = vector.load %arg5[%c14, %c0_66, %c0_67] : memref<41x8x32xf32, #tpu.memory_space<vmem>>, vector<1x8x32xf32>
    %194 = vector.shape_cast %193 : vector<1x8x32xf32> to vector<8x32xf32>
    %cst_68 = arith.constant dense<0.000000e+00> : vector<8x128xf32>
    %195 = tpu.matmul %194, %5, %cst_68 {dimension_numbers = #tpu.dot_dimension_numbers<[1], [0], [0], [1], [0, 0, 1, 1], [], []>} : vector<8x32xf32>, vector<32x128xf32>, vector<8x128xf32> -> vector<8x128xf32>
    %cst_69 = arith.constant 0.000000e+00 : f32
    %196 = vector.broadcast %cst_69 : f32 to vector<8x6xf32>
    %197 = vector.extract_strided_slice %195 {offsets = [0, 0], sizes = [8, 122], strides = [1, 1]} : vector<8x128xf32> to vector<8x122xf32>
    %198 = tpu.concatenate %196, %197 in 1 : vector<8x6xf32>, vector<8x122xf32> -> vector<8x128xf32>
    %c6_i32 = arith.constant 6 : i32
    %199 = vector.broadcast %c6_i32 : i32 to vector<1x128xi32>
    %200 = arith.cmpi sge, %2, %199 : vector<1x128xi32>
    %201 = arith.extui %200 : vector<1x128xi1> to vector<1x128xi32>
    %202 = arith.sitofp %201 : vector<1x128xi32> to vector<1x128xf32>
    %203 = vector.broadcast %202 : vector<1x128xf32> to vector<8x128xf32>
    %204 = arith.mulf %198, %203 : vector<8x128xf32>
    %205 = arith.addf %192, %204 : vector<8x128xf32>
    %c15 = arith.constant 15 : index
    %c0_70 = arith.constant 0 : index
    %c0_71 = arith.constant 0 : index
    %206 = vector.load %arg5[%c15, %c0_70, %c0_71] : memref<41x8x32xf32, #tpu.memory_space<vmem>>, vector<1x8x32xf32>
    %207 = vector.shape_cast %206 : vector<1x8x32xf32> to vector<8x32xf32>
    %cst_72 = arith.constant dense<0.000000e+00> : vector<8x128xf32>
    %208 = tpu.matmul %207, %5, %cst_72 {dimension_numbers = #tpu.dot_dimension_numbers<[1], [0], [0], [1], [0, 0, 1, 1], [], []>} : vector<8x32xf32>, vector<32x128xf32>, vector<8x128xf32> -> vector<8x128xf32>
    %cst_73 = arith.constant 0.000000e+00 : f32
    %209 = vector.broadcast %cst_73 : f32 to vector<8x5xf32>
    %210 = vector.extract_strided_slice %208 {offsets = [0, 0], sizes = [8, 123], strides = [1, 1]} : vector<8x128xf32> to vector<8x123xf32>
    %211 = tpu.concatenate %209, %210 in 1 : vector<8x5xf32>, vector<8x123xf32> -> vector<8x128xf32>
    %c5_i32 = arith.constant 5 : i32
    %212 = vector.broadcast %c5_i32 : i32 to vector<1x128xi32>
    %213 = arith.cmpi sge, %2, %212 : vector<1x128xi32>
    %214 = arith.extui %213 : vector<1x128xi1> to vector<1x128xi32>
    %215 = arith.sitofp %214 : vector<1x128xi32> to vector<1x128xf32>
    %216 = vector.broadcast %215 : vector<1x128xf32> to vector<8x128xf32>
    %217 = arith.mulf %211, %216 : vector<8x128xf32>
    %218 = arith.addf %205, %217 : vector<8x128xf32>
    %c16 = arith.constant 16 : index
    %c0_74 = arith.constant 0 : index
    %c0_75 = arith.constant 0 : index
    %219 = vector.load %arg5[%c16, %c0_74, %c0_75] : memref<41x8x32xf32, #tpu.memory_space<vmem>>, vector<1x8x32xf32>
    %220 = vector.shape_cast %219 : vector<1x8x32xf32> to vector<8x32xf32>
    %cst_76 = arith.constant dense<0.000000e+00> : vector<8x128xf32>
    %221 = tpu.matmul %220, %5, %cst_76 {dimension_numbers = #tpu.dot_dimension_numbers<[1], [0], [0], [1], [0, 0, 1, 1], [], []>} : vector<8x32xf32>, vector<32x128xf32>, vector<8x128xf32> -> vector<8x128xf32>
    %cst_77 = arith.constant 0.000000e+00 : f32
    %222 = vector.broadcast %cst_77 : f32 to vector<8x4xf32>
    %223 = vector.extract_strided_slice %221 {offsets = [0, 0], sizes = [8, 124], strides = [1, 1]} : vector<8x128xf32> to vector<8x124xf32>
    %224 = tpu.concatenate %222, %223 in 1 : vector<8x4xf32>, vector<8x124xf32> -> vector<8x128xf32>
    %c4_i32 = arith.constant 4 : i32
    %225 = vector.broadcast %c4_i32 : i32 to vector<1x128xi32>
    %226 = arith.cmpi sge, %2, %225 : vector<1x128xi32>
    %227 = arith.extui %226 : vector<1x128xi1> to vector<1x128xi32>
    %228 = arith.sitofp %227 : vector<1x128xi32> to vector<1x128xf32>
    %229 = vector.broadcast %228 : vector<1x128xf32> to vector<8x128xf32>
    %230 = arith.mulf %224, %229 : vector<8x128xf32>
    %231 = arith.addf %218, %230 : vector<8x128xf32>
    %c17 = arith.constant 17 : index
    %c0_78 = arith.constant 0 : index
    %c0_79 = arith.constant 0 : index
    %232 = vector.load %arg5[%c17, %c0_78, %c0_79] : memref<41x8x32xf32, #tpu.memory_space<vmem>>, vector<1x8x32xf32>
    %233 = vector.shape_cast %232 : vector<1x8x32xf32> to vector<8x32xf32>
    %cst_80 = arith.constant dense<0.000000e+00> : vector<8x128xf32>
    %234 = tpu.matmul %233, %5, %cst_80 {dimension_numbers = #tpu.dot_dimension_numbers<[1], [0], [0], [1], [0, 0, 1, 1], [], []>} : vector<8x32xf32>, vector<32x128xf32>, vector<8x128xf32> -> vector<8x128xf32>
    %cst_81 = arith.constant 0.000000e+00 : f32
    %235 = vector.broadcast %cst_81 : f32 to vector<8x3xf32>
    %236 = vector.extract_strided_slice %234 {offsets = [0, 0], sizes = [8, 125], strides = [1, 1]} : vector<8x128xf32> to vector<8x125xf32>
    %237 = tpu.concatenate %235, %236 in 1 : vector<8x3xf32>, vector<8x125xf32> -> vector<8x128xf32>
    %c3_i32 = arith.constant 3 : i32
    %238 = vector.broadcast %c3_i32 : i32 to vector<1x128xi32>
    %239 = arith.cmpi sge, %2, %238 : vector<1x128xi32>
    %240 = arith.extui %239 : vector<1x128xi1> to vector<1x128xi32>
    %241 = arith.sitofp %240 : vector<1x128xi32> to vector<1x128xf32>
    %242 = vector.broadcast %241 : vector<1x128xf32> to vector<8x128xf32>
    %243 = arith.mulf %237, %242 : vector<8x128xf32>
    %244 = arith.addf %231, %243 : vector<8x128xf32>
    %c18 = arith.constant 18 : index
    %c0_82 = arith.constant 0 : index
    %c0_83 = arith.constant 0 : index
    %245 = vector.load %arg5[%c18, %c0_82, %c0_83] : memref<41x8x32xf32, #tpu.memory_space<vmem>>, vector<1x8x32xf32>
    %246 = vector.shape_cast %245 : vector<1x8x32xf32> to vector<8x32xf32>
    %cst_84 = arith.constant dense<0.000000e+00> : vector<8x128xf32>
    %247 = tpu.matmul %246, %5, %cst_84 {dimension_numbers = #tpu.dot_dimension_numbers<[1], [0], [0], [1], [0, 0, 1, 1], [], []>} : vector<8x32xf32>, vector<32x128xf32>, vector<8x128xf32> -> vector<8x128xf32>
    %cst_85 = arith.constant 0.000000e+00 : f32
    %248 = vector.broadcast %cst_85 : f32 to vector<8x2xf32>
    %249 = vector.extract_strided_slice %247 {offsets = [0, 0], sizes = [8, 126], strides = [1, 1]} : vector<8x128xf32> to vector<8x126xf32>
    %250 = tpu.concatenate %248, %249 in 1 : vector<8x2xf32>, vector<8x126xf32> -> vector<8x128xf32>
    %c2_i32 = arith.constant 2 : i32
    %251 = vector.broadcast %c2_i32 : i32 to vector<1x128xi32>
    %252 = arith.cmpi sge, %2, %251 : vector<1x128xi32>
    %253 = arith.extui %252 : vector<1x128xi1> to vector<1x128xi32>
    %254 = arith.sitofp %253 : vector<1x128xi32> to vector<1x128xf32>
    %255 = vector.broadcast %254 : vector<1x128xf32> to vector<8x128xf32>
    %256 = arith.mulf %250, %255 : vector<8x128xf32>
    %257 = arith.addf %244, %256 : vector<8x128xf32>
    %c19 = arith.constant 19 : index
    %c0_86 = arith.constant 0 : index
    %c0_87 = arith.constant 0 : index
    %258 = vector.load %arg5[%c19, %c0_86, %c0_87] : memref<41x8x32xf32, #tpu.memory_space<vmem>>, vector<1x8x32xf32>
    %259 = vector.shape_cast %258 : vector<1x8x32xf32> to vector<8x32xf32>
    %cst_88 = arith.constant dense<0.000000e+00> : vector<8x128xf32>
    %260 = tpu.matmul %259, %5, %cst_88 {dimension_numbers = #tpu.dot_dimension_numbers<[1], [0], [0], [1], [0, 0, 1, 1], [], []>} : vector<8x32xf32>, vector<32x128xf32>, vector<8x128xf32> -> vector<8x128xf32>
    %cst_89 = arith.constant 0.000000e+00 : f32
    %261 = vector.broadcast %cst_89 : f32 to vector<8x1xf32>
    %262 = vector.extract_strided_slice %260 {offsets = [0, 0], sizes = [8, 127], strides = [1, 1]} : vector<8x128xf32> to vector<8x127xf32>
    %263 = tpu.concatenate %261, %262 in 1 : vector<8x1xf32>, vector<8x127xf32> -> vector<8x128xf32>
    %c1_i32 = arith.constant 1 : i32
    %264 = vector.broadcast %c1_i32 : i32 to vector<1x128xi32>
    %265 = arith.cmpi sge, %2, %264 : vector<1x128xi32>
    %266 = arith.extui %265 : vector<1x128xi1> to vector<1x128xi32>
    %267 = arith.sitofp %266 : vector<1x128xi32> to vector<1x128xf32>
    %268 = vector.broadcast %267 : vector<1x128xf32> to vector<8x128xf32>
    %269 = arith.mulf %263, %268 : vector<8x128xf32>
    %270 = arith.addf %257, %269 : vector<8x128xf32>
    %c20 = arith.constant 20 : index
    %c0_90 = arith.constant 0 : index
    %c0_91 = arith.constant 0 : index
    %271 = vector.load %arg5[%c20, %c0_90, %c0_91] : memref<41x8x32xf32, #tpu.memory_space<vmem>>, vector<1x8x32xf32>
    %272 = vector.shape_cast %271 : vector<1x8x32xf32> to vector<8x32xf32>
    %cst_92 = arith.constant dense<0.000000e+00> : vector<8x128xf32>
    %273 = tpu.matmul %272, %5, %cst_92 {dimension_numbers = #tpu.dot_dimension_numbers<[1], [0], [0], [1], [0, 0, 1, 1], [], []>} : vector<8x32xf32>, vector<32x128xf32>, vector<8x128xf32> -> vector<8x128xf32>
    %274 = arith.addf %270, %273 : vector<8x128xf32>
    %c21 = arith.constant 21 : index
    %c0_93 = arith.constant 0 : index
    %c0_94 = arith.constant 0 : index
    %275 = vector.load %arg5[%c21, %c0_93, %c0_94] : memref<41x8x32xf32, #tpu.memory_space<vmem>>, vector<1x8x32xf32>
    %276 = vector.shape_cast %275 : vector<1x8x32xf32> to vector<8x32xf32>
    %cst_95 = arith.constant dense<0.000000e+00> : vector<8x128xf32>
    %277 = tpu.matmul %276, %5, %cst_95 {dimension_numbers = #tpu.dot_dimension_numbers<[1], [0], [0], [1], [0, 0, 1, 1], [], []>} : vector<8x32xf32>, vector<32x128xf32>, vector<8x128xf32> -> vector<8x128xf32>
    %278 = vector.extract_strided_slice %277 {offsets = [0, 1], sizes = [8, 127], strides = [1, 1]} : vector<8x128xf32> to vector<8x127xf32>
    %cst_96 = arith.constant 0.000000e+00 : f32
    %279 = vector.broadcast %cst_96 : f32 to vector<8x1xf32>
    %280 = tpu.concatenate %278, %279 in 1 : vector<8x127xf32>, vector<8x1xf32> -> vector<8x128xf32>
    %c63_i32 = arith.constant 63 : i32
    %281 = vector.broadcast %c63_i32 : i32 to vector<1x128xi32>
    %282 = arith.cmpi slt, %2, %281 : vector<1x128xi32>
    %283 = arith.extui %282 : vector<1x128xi1> to vector<1x128xi32>
    %284 = arith.sitofp %283 : vector<1x128xi32> to vector<1x128xf32>
    %285 = vector.broadcast %284 : vector<1x128xf32> to vector<8x128xf32>
    %286 = arith.mulf %280, %285 : vector<8x128xf32>
    %287 = arith.addf %274, %286 : vector<8x128xf32>
    %c22 = arith.constant 22 : index
    %c0_97 = arith.constant 0 : index
    %c0_98 = arith.constant 0 : index
    %288 = vector.load %arg5[%c22, %c0_97, %c0_98] : memref<41x8x32xf32, #tpu.memory_space<vmem>>, vector<1x8x32xf32>
    %289 = vector.shape_cast %288 : vector<1x8x32xf32> to vector<8x32xf32>
    %cst_99 = arith.constant dense<0.000000e+00> : vector<8x128xf32>
    %290 = tpu.matmul %289, %5, %cst_99 {dimension_numbers = #tpu.dot_dimension_numbers<[1], [0], [0], [1], [0, 0, 1, 1], [], []>} : vector<8x32xf32>, vector<32x128xf32>, vector<8x128xf32> -> vector<8x128xf32>
    %291 = vector.extract_strided_slice %290 {offsets = [0, 2], sizes = [8, 126], strides = [1, 1]} : vector<8x128xf32> to vector<8x126xf32>
    %cst_100 = arith.constant 0.000000e+00 : f32
    %292 = vector.broadcast %cst_100 : f32 to vector<8x2xf32>
    %293 = tpu.concatenate %291, %292 in 1 : vector<8x126xf32>, vector<8x2xf32> -> vector<8x128xf32>
    %c62_i32 = arith.constant 62 : i32
    %294 = vector.broadcast %c62_i32 : i32 to vector<1x128xi32>
    %295 = arith.cmpi slt, %2, %294 : vector<1x128xi32>
    %296 = arith.extui %295 : vector<1x128xi1> to vector<1x128xi32>
    %297 = arith.sitofp %296 : vector<1x128xi32> to vector<1x128xf32>
    %298 = vector.broadcast %297 : vector<1x128xf32> to vector<8x128xf32>
    %299 = arith.mulf %293, %298 : vector<8x128xf32>
    %300 = arith.addf %287, %299 : vector<8x128xf32>
    %c23 = arith.constant 23 : index
    %c0_101 = arith.constant 0 : index
    %c0_102 = arith.constant 0 : index
    %301 = vector.load %arg5[%c23, %c0_101, %c0_102] : memref<41x8x32xf32, #tpu.memory_space<vmem>>, vector<1x8x32xf32>
    %302 = vector.shape_cast %301 : vector<1x8x32xf32> to vector<8x32xf32>
    %cst_103 = arith.constant dense<0.000000e+00> : vector<8x128xf32>
    %303 = tpu.matmul %302, %5, %cst_103 {dimension_numbers = #tpu.dot_dimension_numbers<[1], [0], [0], [1], [0, 0, 1, 1], [], []>} : vector<8x32xf32>, vector<32x128xf32>, vector<8x128xf32> -> vector<8x128xf32>
    %304 = vector.extract_strided_slice %303 {offsets = [0, 3], sizes = [8, 125], strides = [1, 1]} : vector<8x128xf32> to vector<8x125xf32>
    %cst_104 = arith.constant 0.000000e+00 : f32
    %305 = vector.broadcast %cst_104 : f32 to vector<8x3xf32>
    %306 = tpu.concatenate %304, %305 in 1 : vector<8x125xf32>, vector<8x3xf32> -> vector<8x128xf32>
    %c61_i32 = arith.constant 61 : i32
    %307 = vector.broadcast %c61_i32 : i32 to vector<1x128xi32>
    %308 = arith.cmpi slt, %2, %307 : vector<1x128xi32>
    %309 = arith.extui %308 : vector<1x128xi1> to vector<1x128xi32>
    %310 = arith.sitofp %309 : vector<1x128xi32> to vector<1x128xf32>
    %311 = vector.broadcast %310 : vector<1x128xf32> to vector<8x128xf32>
    %312 = arith.mulf %306, %311 : vector<8x128xf32>
    %313 = arith.addf %300, %312 : vector<8x128xf32>
    %c24 = arith.constant 24 : index
    %c0_105 = arith.constant 0 : index
    %c0_106 = arith.constant 0 : index
    %314 = vector.load %arg5[%c24, %c0_105, %c0_106] : memref<41x8x32xf32, #tpu.memory_space<vmem>>, vector<1x8x32xf32>
    %315 = vector.shape_cast %314 : vector<1x8x32xf32> to vector<8x32xf32>
    %cst_107 = arith.constant dense<0.000000e+00> : vector<8x128xf32>
    %316 = tpu.matmul %315, %5, %cst_107 {dimension_numbers = #tpu.dot_dimension_numbers<[1], [0], [0], [1], [0, 0, 1, 1], [], []>} : vector<8x32xf32>, vector<32x128xf32>, vector<8x128xf32> -> vector<8x128xf32>
    %317 = vector.extract_strided_slice %316 {offsets = [0, 4], sizes = [8, 124], strides = [1, 1]} : vector<8x128xf32> to vector<8x124xf32>
    %cst_108 = arith.constant 0.000000e+00 : f32
    %318 = vector.broadcast %cst_108 : f32 to vector<8x4xf32>
    %319 = tpu.concatenate %317, %318 in 1 : vector<8x124xf32>, vector<8x4xf32> -> vector<8x128xf32>
    %c60_i32 = arith.constant 60 : i32
    %320 = vector.broadcast %c60_i32 : i32 to vector<1x128xi32>
    %321 = arith.cmpi slt, %2, %320 : vector<1x128xi32>
    %322 = arith.extui %321 : vector<1x128xi1> to vector<1x128xi32>
    %323 = arith.sitofp %322 : vector<1x128xi32> to vector<1x128xf32>
    %324 = vector.broadcast %323 : vector<1x128xf32> to vector<8x128xf32>
    %325 = arith.mulf %319, %324 : vector<8x128xf32>
    %326 = arith.addf %313, %325 : vector<8x128xf32>
    %c25 = arith.constant 25 : index
    %c0_109 = arith.constant 0 : index
    %c0_110 = arith.constant 0 : index
    %327 = vector.load %arg5[%c25, %c0_109, %c0_110] : memref<41x8x32xf32, #tpu.memory_space<vmem>>, vector<1x8x32xf32>
    %328 = vector.shape_cast %327 : vector<1x8x32xf32> to vector<8x32xf32>
    %cst_111 = arith.constant dense<0.000000e+00> : vector<8x128xf32>
    %329 = tpu.matmul %328, %5, %cst_111 {dimension_numbers = #tpu.dot_dimension_numbers<[1], [0], [0], [1], [0, 0, 1, 1], [], []>} : vector<8x32xf32>, vector<32x128xf32>, vector<8x128xf32> -> vector<8x128xf32>
    %330 = vector.extract_strided_slice %329 {offsets = [0, 5], sizes = [8, 123], strides = [1, 1]} : vector<8x128xf32> to vector<8x123xf32>
    %cst_112 = arith.constant 0.000000e+00 : f32
    %331 = vector.broadcast %cst_112 : f32 to vector<8x5xf32>
    %332 = tpu.concatenate %330, %331 in 1 : vector<8x123xf32>, vector<8x5xf32> -> vector<8x128xf32>
    %c59_i32 = arith.constant 59 : i32
    %333 = vector.broadcast %c59_i32 : i32 to vector<1x128xi32>
    %334 = arith.cmpi slt, %2, %333 : vector<1x128xi32>
    %335 = arith.extui %334 : vector<1x128xi1> to vector<1x128xi32>
    %336 = arith.sitofp %335 : vector<1x128xi32> to vector<1x128xf32>
    %337 = vector.broadcast %336 : vector<1x128xf32> to vector<8x128xf32>
    %338 = arith.mulf %332, %337 : vector<8x128xf32>
    %339 = arith.addf %326, %338 : vector<8x128xf32>
    %c26 = arith.constant 26 : index
    %c0_113 = arith.constant 0 : index
    %c0_114 = arith.constant 0 : index
    %340 = vector.load %arg5[%c26, %c0_113, %c0_114] : memref<41x8x32xf32, #tpu.memory_space<vmem>>, vector<1x8x32xf32>
    %341 = vector.shape_cast %340 : vector<1x8x32xf32> to vector<8x32xf32>
    %cst_115 = arith.constant dense<0.000000e+00> : vector<8x128xf32>
    %342 = tpu.matmul %341, %5, %cst_115 {dimension_numbers = #tpu.dot_dimension_numbers<[1], [0], [0], [1], [0, 0, 1, 1], [], []>} : vector<8x32xf32>, vector<32x128xf32>, vector<8x128xf32> -> vector<8x128xf32>
    %343 = vector.extract_strided_slice %342 {offsets = [0, 6], sizes = [8, 122], strides = [1, 1]} : vector<8x128xf32> to vector<8x122xf32>
    %cst_116 = arith.constant 0.000000e+00 : f32
    %344 = vector.broadcast %cst_116 : f32 to vector<8x6xf32>
    %345 = tpu.concatenate %343, %344 in 1 : vector<8x122xf32>, vector<8x6xf32> -> vector<8x128xf32>
    %c58_i32 = arith.constant 58 : i32
    %346 = vector.broadcast %c58_i32 : i32 to vector<1x128xi32>
    %347 = arith.cmpi slt, %2, %346 : vector<1x128xi32>
    %348 = arith.extui %347 : vector<1x128xi1> to vector<1x128xi32>
    %349 = arith.sitofp %348 : vector<1x128xi32> to vector<1x128xf32>
    %350 = vector.broadcast %349 : vector<1x128xf32> to vector<8x128xf32>
    %351 = arith.mulf %345, %350 : vector<8x128xf32>
    %352 = arith.addf %339, %351 : vector<8x128xf32>
    %c27 = arith.constant 27 : index
    %c0_117 = arith.constant 0 : index
    %c0_118 = arith.constant 0 : index
    %353 = vector.load %arg5[%c27, %c0_117, %c0_118] : memref<41x8x32xf32, #tpu.memory_space<vmem>>, vector<1x8x32xf32>
    %354 = vector.shape_cast %353 : vector<1x8x32xf32> to vector<8x32xf32>
    %cst_119 = arith.constant dense<0.000000e+00> : vector<8x128xf32>
    %355 = tpu.matmul %354, %5, %cst_119 {dimension_numbers = #tpu.dot_dimension_numbers<[1], [0], [0], [1], [0, 0, 1, 1], [], []>} : vector<8x32xf32>, vector<32x128xf32>, vector<8x128xf32> -> vector<8x128xf32>
    %356 = vector.extract_strided_slice %355 {offsets = [0, 7], sizes = [8, 121], strides = [1, 1]} : vector<8x128xf32> to vector<8x121xf32>
    %cst_120 = arith.constant 0.000000e+00 : f32
    %357 = vector.broadcast %cst_120 : f32 to vector<8x7xf32>
    %358 = tpu.concatenate %356, %357 in 1 : vector<8x121xf32>, vector<8x7xf32> -> vector<8x128xf32>
    %c57_i32 = arith.constant 57 : i32
    %359 = vector.broadcast %c57_i32 : i32 to vector<1x128xi32>
    %360 = arith.cmpi slt, %2, %359 : vector<1x128xi32>
    %361 = arith.extui %360 : vector<1x128xi1> to vector<1x128xi32>
    %362 = arith.sitofp %361 : vector<1x128xi32> to vector<1x128xf32>
    %363 = vector.broadcast %362 : vector<1x128xf32> to vector<8x128xf32>
    %364 = arith.mulf %358, %363 : vector<8x128xf32>
    %365 = arith.addf %352, %364 : vector<8x128xf32>
    %c28 = arith.constant 28 : index
    %c0_121 = arith.constant 0 : index
    %c0_122 = arith.constant 0 : index
    %366 = vector.load %arg5[%c28, %c0_121, %c0_122] : memref<41x8x32xf32, #tpu.memory_space<vmem>>, vector<1x8x32xf32>
    %367 = vector.shape_cast %366 : vector<1x8x32xf32> to vector<8x32xf32>
    %cst_123 = arith.constant dense<0.000000e+00> : vector<8x128xf32>
    %368 = tpu.matmul %367, %5, %cst_123 {dimension_numbers = #tpu.dot_dimension_numbers<[1], [0], [0], [1], [0, 0, 1, 1], [], []>} : vector<8x32xf32>, vector<32x128xf32>, vector<8x128xf32> -> vector<8x128xf32>
    %369 = vector.extract_strided_slice %368 {offsets = [0, 8], sizes = [8, 120], strides = [1, 1]} : vector<8x128xf32> to vector<8x120xf32>
    %cst_124 = arith.constant 0.000000e+00 : f32
    %370 = vector.broadcast %cst_124 : f32 to vector<8x8xf32>
    %371 = tpu.concatenate %369, %370 in 1 : vector<8x120xf32>, vector<8x8xf32> -> vector<8x128xf32>
    %c56_i32 = arith.constant 56 : i32
    %372 = vector.broadcast %c56_i32 : i32 to vector<1x128xi32>
    %373 = arith.cmpi slt, %2, %372 : vector<1x128xi32>
    %374 = arith.extui %373 : vector<1x128xi1> to vector<1x128xi32>
    %375 = arith.sitofp %374 : vector<1x128xi32> to vector<1x128xf32>
    %376 = vector.broadcast %375 : vector<1x128xf32> to vector<8x128xf32>
    %377 = arith.mulf %371, %376 : vector<8x128xf32>
    %378 = arith.addf %365, %377 : vector<8x128xf32>
    %c29 = arith.constant 29 : index
    %c0_125 = arith.constant 0 : index
    %c0_126 = arith.constant 0 : index
    %379 = vector.load %arg5[%c29, %c0_125, %c0_126] : memref<41x8x32xf32, #tpu.memory_space<vmem>>, vector<1x8x32xf32>
    %380 = vector.shape_cast %379 : vector<1x8x32xf32> to vector<8x32xf32>
    %cst_127 = arith.constant dense<0.000000e+00> : vector<8x128xf32>
    %381 = tpu.matmul %380, %5, %cst_127 {dimension_numbers = #tpu.dot_dimension_numbers<[1], [0], [0], [1], [0, 0, 1, 1], [], []>} : vector<8x32xf32>, vector<32x128xf32>, vector<8x128xf32> -> vector<8x128xf32>
    %382 = vector.extract_strided_slice %381 {offsets = [0, 9], sizes = [8, 119], strides = [1, 1]} : vector<8x128xf32> to vector<8x119xf32>
    %cst_128 = arith.constant 0.000000e+00 : f32
    %383 = vector.broadcast %cst_128 : f32 to vector<8x9xf32>
    %384 = tpu.concatenate %382, %383 in 1 : vector<8x119xf32>, vector<8x9xf32> -> vector<8x128xf32>
    %c55_i32 = arith.constant 55 : i32
    %385 = vector.broadcast %c55_i32 : i32 to vector<1x128xi32>
    %386 = arith.cmpi slt, %2, %385 : vector<1x128xi32>
    %387 = arith.extui %386 : vector<1x128xi1> to vector<1x128xi32>
    %388 = arith.sitofp %387 : vector<1x128xi32> to vector<1x128xf32>
    %389 = vector.broadcast %388 : vector<1x128xf32> to vector<8x128xf32>
    %390 = arith.mulf %384, %389 : vector<8x128xf32>
    %391 = arith.addf %378, %390 : vector<8x128xf32>
    %c30 = arith.constant 30 : index
    %c0_129 = arith.constant 0 : index
    %c0_130 = arith.constant 0 : index
    %392 = vector.load %arg5[%c30, %c0_129, %c0_130] : memref<41x8x32xf32, #tpu.memory_space<vmem>>, vector<1x8x32xf32>
    %393 = vector.shape_cast %392 : vector<1x8x32xf32> to vector<8x32xf32>
    %cst_131 = arith.constant dense<0.000000e+00> : vector<8x128xf32>
    %394 = tpu.matmul %393, %5, %cst_131 {dimension_numbers = #tpu.dot_dimension_numbers<[1], [0], [0], [1], [0, 0, 1, 1], [], []>} : vector<8x32xf32>, vector<32x128xf32>, vector<8x128xf32> -> vector<8x128xf32>
    %395 = vector.extract_strided_slice %394 {offsets = [0, 10], sizes = [8, 118], strides = [1, 1]} : vector<8x128xf32> to vector<8x118xf32>
    %cst_132 = arith.constant 0.000000e+00 : f32
    %396 = vector.broadcast %cst_132 : f32 to vector<8x10xf32>
    %397 = tpu.concatenate %395, %396 in 1 : vector<8x118xf32>, vector<8x10xf32> -> vector<8x128xf32>
    %c54_i32 = arith.constant 54 : i32
    %398 = vector.broadcast %c54_i32 : i32 to vector<1x128xi32>
    %399 = arith.cmpi slt, %2, %398 : vector<1x128xi32>
    %400 = arith.extui %399 : vector<1x128xi1> to vector<1x128xi32>
    %401 = arith.sitofp %400 : vector<1x128xi32> to vector<1x128xf32>
    %402 = vector.broadcast %401 : vector<1x128xf32> to vector<8x128xf32>
    %403 = arith.mulf %397, %402 : vector<8x128xf32>
    %404 = arith.addf %391, %403 : vector<8x128xf32>
    %c31 = arith.constant 31 : index
    %c0_133 = arith.constant 0 : index
    %c0_134 = arith.constant 0 : index
    %405 = vector.load %arg5[%c31, %c0_133, %c0_134] : memref<41x8x32xf32, #tpu.memory_space<vmem>>, vector<1x8x32xf32>
    %406 = vector.shape_cast %405 : vector<1x8x32xf32> to vector<8x32xf32>
    %cst_135 = arith.constant dense<0.000000e+00> : vector<8x128xf32>
    %407 = tpu.matmul %406, %5, %cst_135 {dimension_numbers = #tpu.dot_dimension_numbers<[1], [0], [0], [1], [0, 0, 1, 1], [], []>} : vector<8x32xf32>, vector<32x128xf32>, vector<8x128xf32> -> vector<8x128xf32>
    %408 = vector.extract_strided_slice %407 {offsets = [0, 11], sizes = [8, 117], strides = [1, 1]} : vector<8x128xf32> to vector<8x117xf32>
    %cst_136 = arith.constant 0.000000e+00 : f32
    %409 = vector.broadcast %cst_136 : f32 to vector<8x11xf32>
    %410 = tpu.concatenate %408, %409 in 1 : vector<8x117xf32>, vector<8x11xf32> -> vector<8x128xf32>
    %c53_i32 = arith.constant 53 : i32
    %411 = vector.broadcast %c53_i32 : i32 to vector<1x128xi32>
    %412 = arith.cmpi slt, %2, %411 : vector<1x128xi32>
    %413 = arith.extui %412 : vector<1x128xi1> to vector<1x128xi32>
    %414 = arith.sitofp %413 : vector<1x128xi32> to vector<1x128xf32>
    %415 = vector.broadcast %414 : vector<1x128xf32> to vector<8x128xf32>
    %416 = arith.mulf %410, %415 : vector<8x128xf32>
    %417 = arith.addf %404, %416 : vector<8x128xf32>
    %c32 = arith.constant 32 : index
    %c0_137 = arith.constant 0 : index
    %c0_138 = arith.constant 0 : index
    %418 = vector.load %arg5[%c32, %c0_137, %c0_138] : memref<41x8x32xf32, #tpu.memory_space<vmem>>, vector<1x8x32xf32>
    %419 = vector.shape_cast %418 : vector<1x8x32xf32> to vector<8x32xf32>
    %cst_139 = arith.constant dense<0.000000e+00> : vector<8x128xf32>
    %420 = tpu.matmul %419, %5, %cst_139 {dimension_numbers = #tpu.dot_dimension_numbers<[1], [0], [0], [1], [0, 0, 1, 1], [], []>} : vector<8x32xf32>, vector<32x128xf32>, vector<8x128xf32> -> vector<8x128xf32>
    %421 = vector.extract_strided_slice %420 {offsets = [0, 12], sizes = [8, 116], strides = [1, 1]} : vector<8x128xf32> to vector<8x116xf32>
    %cst_140 = arith.constant 0.000000e+00 : f32
    %422 = vector.broadcast %cst_140 : f32 to vector<8x12xf32>
    %423 = tpu.concatenate %421, %422 in 1 : vector<8x116xf32>, vector<8x12xf32> -> vector<8x128xf32>
    %c52_i32 = arith.constant 52 : i32
    %424 = vector.broadcast %c52_i32 : i32 to vector<1x128xi32>
    %425 = arith.cmpi slt, %2, %424 : vector<1x128xi32>
    %426 = arith.extui %425 : vector<1x128xi1> to vector<1x128xi32>
    %427 = arith.sitofp %426 : vector<1x128xi32> to vector<1x128xf32>
    %428 = vector.broadcast %427 : vector<1x128xf32> to vector<8x128xf32>
    %429 = arith.mulf %423, %428 : vector<8x128xf32>
    %430 = arith.addf %417, %429 : vector<8x128xf32>
    %c33 = arith.constant 33 : index
    %c0_141 = arith.constant 0 : index
    %c0_142 = arith.constant 0 : index
    %431 = vector.load %arg5[%c33, %c0_141, %c0_142] : memref<41x8x32xf32, #tpu.memory_space<vmem>>, vector<1x8x32xf32>
    %432 = vector.shape_cast %431 : vector<1x8x32xf32> to vector<8x32xf32>
    %cst_143 = arith.constant dense<0.000000e+00> : vector<8x128xf32>
    %433 = tpu.matmul %432, %5, %cst_143 {dimension_numbers = #tpu.dot_dimension_numbers<[1], [0], [0], [1], [0, 0, 1, 1], [], []>} : vector<8x32xf32>, vector<32x128xf32>, vector<8x128xf32> -> vector<8x128xf32>
    %434 = vector.extract_strided_slice %433 {offsets = [0, 13], sizes = [8, 115], strides = [1, 1]} : vector<8x128xf32> to vector<8x115xf32>
    %cst_144 = arith.constant 0.000000e+00 : f32
    %435 = vector.broadcast %cst_144 : f32 to vector<8x13xf32>
    %436 = tpu.concatenate %434, %435 in 1 : vector<8x115xf32>, vector<8x13xf32> -> vector<8x128xf32>
    %c51_i32 = arith.constant 51 : i32
    %437 = vector.broadcast %c51_i32 : i32 to vector<1x128xi32>
    %438 = arith.cmpi slt, %2, %437 : vector<1x128xi32>
    %439 = arith.extui %438 : vector<1x128xi1> to vector<1x128xi32>
    %440 = arith.sitofp %439 : vector<1x128xi32> to vector<1x128xf32>
    %441 = vector.broadcast %440 : vector<1x128xf32> to vector<8x128xf32>
    %442 = arith.mulf %436, %441 : vector<8x128xf32>
    %443 = arith.addf %430, %442 : vector<8x128xf32>
    %c34 = arith.constant 34 : index
    %c0_145 = arith.constant 0 : index
    %c0_146 = arith.constant 0 : index
    %444 = vector.load %arg5[%c34, %c0_145, %c0_146] : memref<41x8x32xf32, #tpu.memory_space<vmem>>, vector<1x8x32xf32>
    %445 = vector.shape_cast %444 : vector<1x8x32xf32> to vector<8x32xf32>
    %cst_147 = arith.constant dense<0.000000e+00> : vector<8x128xf32>
    %446 = tpu.matmul %445, %5, %cst_147 {dimension_numbers = #tpu.dot_dimension_numbers<[1], [0], [0], [1], [0, 0, 1, 1], [], []>} : vector<8x32xf32>, vector<32x128xf32>, vector<8x128xf32> -> vector<8x128xf32>
    %447 = vector.extract_strided_slice %446 {offsets = [0, 14], sizes = [8, 114], strides = [1, 1]} : vector<8x128xf32> to vector<8x114xf32>
    %cst_148 = arith.constant 0.000000e+00 : f32
    %448 = vector.broadcast %cst_148 : f32 to vector<8x14xf32>
    %449 = tpu.concatenate %447, %448 in 1 : vector<8x114xf32>, vector<8x14xf32> -> vector<8x128xf32>
    %c50_i32 = arith.constant 50 : i32
    %450 = vector.broadcast %c50_i32 : i32 to vector<1x128xi32>
    %451 = arith.cmpi slt, %2, %450 : vector<1x128xi32>
    %452 = arith.extui %451 : vector<1x128xi1> to vector<1x128xi32>
    %453 = arith.sitofp %452 : vector<1x128xi32> to vector<1x128xf32>
    %454 = vector.broadcast %453 : vector<1x128xf32> to vector<8x128xf32>
    %455 = arith.mulf %449, %454 : vector<8x128xf32>
    %456 = arith.addf %443, %455 : vector<8x128xf32>
    %c35 = arith.constant 35 : index
    %c0_149 = arith.constant 0 : index
    %c0_150 = arith.constant 0 : index
    %457 = vector.load %arg5[%c35, %c0_149, %c0_150] : memref<41x8x32xf32, #tpu.memory_space<vmem>>, vector<1x8x32xf32>
    %458 = vector.shape_cast %457 : vector<1x8x32xf32> to vector<8x32xf32>
    %cst_151 = arith.constant dense<0.000000e+00> : vector<8x128xf32>
    %459 = tpu.matmul %458, %5, %cst_151 {dimension_numbers = #tpu.dot_dimension_numbers<[1], [0], [0], [1], [0, 0, 1, 1], [], []>} : vector<8x32xf32>, vector<32x128xf32>, vector<8x128xf32> -> vector<8x128xf32>
    %460 = vector.extract_strided_slice %459 {offsets = [0, 15], sizes = [8, 113], strides = [1, 1]} : vector<8x128xf32> to vector<8x113xf32>
    %cst_152 = arith.constant 0.000000e+00 : f32
    %461 = vector.broadcast %cst_152 : f32 to vector<8x15xf32>
    %462 = tpu.concatenate %460, %461 in 1 : vector<8x113xf32>, vector<8x15xf32> -> vector<8x128xf32>
    %c49_i32 = arith.constant 49 : i32
    %463 = vector.broadcast %c49_i32 : i32 to vector<1x128xi32>
    %464 = arith.cmpi slt, %2, %463 : vector<1x128xi32>
    %465 = arith.extui %464 : vector<1x128xi1> to vector<1x128xi32>
    %466 = arith.sitofp %465 : vector<1x128xi32> to vector<1x128xf32>
    %467 = vector.broadcast %466 : vector<1x128xf32> to vector<8x128xf32>
    %468 = arith.mulf %462, %467 : vector<8x128xf32>
    %469 = arith.addf %456, %468 : vector<8x128xf32>
    %c36 = arith.constant 36 : index
    %c0_153 = arith.constant 0 : index
    %c0_154 = arith.constant 0 : index
    %470 = vector.load %arg5[%c36, %c0_153, %c0_154] : memref<41x8x32xf32, #tpu.memory_space<vmem>>, vector<1x8x32xf32>
    %471 = vector.shape_cast %470 : vector<1x8x32xf32> to vector<8x32xf32>
    %cst_155 = arith.constant dense<0.000000e+00> : vector<8x128xf32>
    %472 = tpu.matmul %471, %5, %cst_155 {dimension_numbers = #tpu.dot_dimension_numbers<[1], [0], [0], [1], [0, 0, 1, 1], [], []>} : vector<8x32xf32>, vector<32x128xf32>, vector<8x128xf32> -> vector<8x128xf32>
    %473 = vector.extract_strided_slice %472 {offsets = [0, 16], sizes = [8, 112], strides = [1, 1]} : vector<8x128xf32> to vector<8x112xf32>
    %cst_156 = arith.constant 0.000000e+00 : f32
    %474 = vector.broadcast %cst_156 : f32 to vector<8x16xf32>
    %475 = tpu.concatenate %473, %474 in 1 : vector<8x112xf32>, vector<8x16xf32> -> vector<8x128xf32>
    %c48_i32 = arith.constant 48 : i32
    %476 = vector.broadcast %c48_i32 : i32 to vector<1x128xi32>
    %477 = arith.cmpi slt, %2, %476 : vector<1x128xi32>
    %478 = arith.extui %477 : vector<1x128xi1> to vector<1x128xi32>
    %479 = arith.sitofp %478 : vector<1x128xi32> to vector<1x128xf32>
    %480 = vector.broadcast %479 : vector<1x128xf32> to vector<8x128xf32>
    %481 = arith.mulf %475, %480 : vector<8x128xf32>
    %482 = arith.addf %469, %481 : vector<8x128xf32>
    %c37 = arith.constant 37 : index
    %c0_157 = arith.constant 0 : index
    %c0_158 = arith.constant 0 : index
    %483 = vector.load %arg5[%c37, %c0_157, %c0_158] : memref<41x8x32xf32, #tpu.memory_space<vmem>>, vector<1x8x32xf32>
    %484 = vector.shape_cast %483 : vector<1x8x32xf32> to vector<8x32xf32>
    %cst_159 = arith.constant dense<0.000000e+00> : vector<8x128xf32>
    %485 = tpu.matmul %484, %5, %cst_159 {dimension_numbers = #tpu.dot_dimension_numbers<[1], [0], [0], [1], [0, 0, 1, 1], [], []>} : vector<8x32xf32>, vector<32x128xf32>, vector<8x128xf32> -> vector<8x128xf32>
    %486 = vector.extract_strided_slice %485 {offsets = [0, 17], sizes = [8, 111], strides = [1, 1]} : vector<8x128xf32> to vector<8x111xf32>
    %cst_160 = arith.constant 0.000000e+00 : f32
    %487 = vector.broadcast %cst_160 : f32 to vector<8x17xf32>
    %488 = tpu.concatenate %486, %487 in 1 : vector<8x111xf32>, vector<8x17xf32> -> vector<8x128xf32>
    %c47_i32 = arith.constant 47 : i32
    %489 = vector.broadcast %c47_i32 : i32 to vector<1x128xi32>
    %490 = arith.cmpi slt, %2, %489 : vector<1x128xi32>
    %491 = arith.extui %490 : vector<1x128xi1> to vector<1x128xi32>
    %492 = arith.sitofp %491 : vector<1x128xi32> to vector<1x128xf32>
    %493 = vector.broadcast %492 : vector<1x128xf32> to vector<8x128xf32>
    %494 = arith.mulf %488, %493 : vector<8x128xf32>
    %495 = arith.addf %482, %494 : vector<8x128xf32>
    %c38 = arith.constant 38 : index
    %c0_161 = arith.constant 0 : index
    %c0_162 = arith.constant 0 : index
    %496 = vector.load %arg5[%c38, %c0_161, %c0_162] : memref<41x8x32xf32, #tpu.memory_space<vmem>>, vector<1x8x32xf32>
    %497 = vector.shape_cast %496 : vector<1x8x32xf32> to vector<8x32xf32>
    %cst_163 = arith.constant dense<0.000000e+00> : vector<8x128xf32>
    %498 = tpu.matmul %497, %5, %cst_163 {dimension_numbers = #tpu.dot_dimension_numbers<[1], [0], [0], [1], [0, 0, 1, 1], [], []>} : vector<8x32xf32>, vector<32x128xf32>, vector<8x128xf32> -> vector<8x128xf32>
    %499 = vector.extract_strided_slice %498 {offsets = [0, 18], sizes = [8, 110], strides = [1, 1]} : vector<8x128xf32> to vector<8x110xf32>
    %cst_164 = arith.constant 0.000000e+00 : f32
    %500 = vector.broadcast %cst_164 : f32 to vector<8x18xf32>
    %501 = tpu.concatenate %499, %500 in 1 : vector<8x110xf32>, vector<8x18xf32> -> vector<8x128xf32>
    %c46_i32 = arith.constant 46 : i32
    %502 = vector.broadcast %c46_i32 : i32 to vector<1x128xi32>
    %503 = arith.cmpi slt, %2, %502 : vector<1x128xi32>
    %504 = arith.extui %503 : vector<1x128xi1> to vector<1x128xi32>
    %505 = arith.sitofp %504 : vector<1x128xi32> to vector<1x128xf32>
    %506 = vector.broadcast %505 : vector<1x128xf32> to vector<8x128xf32>
    %507 = arith.mulf %501, %506 : vector<8x128xf32>
    %508 = arith.addf %495, %507 : vector<8x128xf32>
    %c39 = arith.constant 39 : index
    %c0_165 = arith.constant 0 : index
    %c0_166 = arith.constant 0 : index
    %509 = vector.load %arg5[%c39, %c0_165, %c0_166] : memref<41x8x32xf32, #tpu.memory_space<vmem>>, vector<1x8x32xf32>
    %510 = vector.shape_cast %509 : vector<1x8x32xf32> to vector<8x32xf32>
    %cst_167 = arith.constant dense<0.000000e+00> : vector<8x128xf32>
    %511 = tpu.matmul %510, %5, %cst_167 {dimension_numbers = #tpu.dot_dimension_numbers<[1], [0], [0], [1], [0, 0, 1, 1], [], []>} : vector<8x32xf32>, vector<32x128xf32>, vector<8x128xf32> -> vector<8x128xf32>
    %512 = vector.extract_strided_slice %511 {offsets = [0, 19], sizes = [8, 109], strides = [1, 1]} : vector<8x128xf32> to vector<8x109xf32>
    %cst_168 = arith.constant 0.000000e+00 : f32
    %513 = vector.broadcast %cst_168 : f32 to vector<8x19xf32>
    %514 = tpu.concatenate %512, %513 in 1 : vector<8x109xf32>, vector<8x19xf32> -> vector<8x128xf32>
    %c45_i32 = arith.constant 45 : i32
    %515 = vector.broadcast %c45_i32 : i32 to vector<1x128xi32>
    %516 = arith.cmpi slt, %2, %515 : vector<1x128xi32>
    %517 = arith.extui %516 : vector<1x128xi1> to vector<1x128xi32>
    %518 = arith.sitofp %517 : vector<1x128xi32> to vector<1x128xf32>
    %519 = vector.broadcast %518 : vector<1x128xf32> to vector<8x128xf32>
    %520 = arith.mulf %514, %519 : vector<8x128xf32>
    %521 = arith.addf %508, %520 : vector<8x128xf32>
    %c40 = arith.constant 40 : index
    %c0_169 = arith.constant 0 : index
    %c0_170 = arith.constant 0 : index
    %522 = vector.load %arg5[%c40, %c0_169, %c0_170] : memref<41x8x32xf32, #tpu.memory_space<vmem>>, vector<1x8x32xf32>
    %523 = vector.shape_cast %522 : vector<1x8x32xf32> to vector<8x32xf32>
    %cst_171 = arith.constant dense<0.000000e+00> : vector<8x128xf32>
    %524 = tpu.matmul %523, %5, %cst_171 {dimension_numbers = #tpu.dot_dimension_numbers<[1], [0], [0], [1], [0, 0, 1, 1], [], []>} : vector<8x32xf32>, vector<32x128xf32>, vector<8x128xf32> -> vector<8x128xf32>
    %525 = vector.extract_strided_slice %524 {offsets = [0, 20], sizes = [8, 108], strides = [1, 1]} : vector<8x128xf32> to vector<8x108xf32>
    %cst_172 = arith.constant 0.000000e+00 : f32
    %526 = vector.broadcast %cst_172 : f32 to vector<8x20xf32>
    %527 = tpu.concatenate %525, %526 in 1 : vector<8x108xf32>, vector<8x20xf32> -> vector<8x128xf32>
    %c44_i32 = arith.constant 44 : i32
    %528 = vector.broadcast %c44_i32 : i32 to vector<1x128xi32>
    %529 = arith.cmpi slt, %2, %528 : vector<1x128xi32>
    %530 = arith.extui %529 : vector<1x128xi1> to vector<1x128xi32>
    %531 = arith.sitofp %530 : vector<1x128xi32> to vector<1x128xf32>
    %532 = vector.broadcast %531 : vector<1x128xf32> to vector<8x128xf32>
    %533 = arith.mulf %527, %532 : vector<8x128xf32>
    %534 = arith.addf %521, %533 : vector<8x128xf32>
    %c0_173 = arith.constant 0 : index
    %c0_174 = arith.constant 0 : index
    %c0_175 = arith.constant 0 : index
    %535 = vector.load %arg6[%c0_173, %c0_174, %c0_175] : memref<20x8x8xf32, #tpu.memory_space<vmem>>, vector<1x8x8xf32>
    %536 = vector.shape_cast %535 : vector<1x8x8xf32> to vector<8x8xf32>
    %cst_176 = arith.constant dense<0.000000e+00> : vector<8x128xf32>
    %537 = tpu.matmul %536, %534, %cst_176 {dimension_numbers = #tpu.dot_dimension_numbers<[1], [0], [0], [1], [0, 0, 1, 1], [], []>} : vector<8x8xf32>, vector<8x128xf32>, vector<8x128xf32> -> vector<8x128xf32>
    %cst_177 = arith.constant 0.000000e+00 : f32
    %538 = vector.broadcast %cst_177 : f32 to vector<8x9xf32>
    %539 = vector.extract_strided_slice %537 {offsets = [0, 0], sizes = [8, 119], strides = [1, 1]} : vector<8x128xf32> to vector<8x119xf32>
    %540 = tpu.concatenate %538, %539 in 1 : vector<8x9xf32>, vector<8x119xf32> -> vector<8x128xf32>
    %c9_i32_178 = arith.constant 9 : i32
    %541 = vector.broadcast %c9_i32_178 : i32 to vector<1x128xi32>
    %542 = arith.cmpi sge, %2, %541 : vector<1x128xi32>
    %543 = arith.extui %542 : vector<1x128xi1> to vector<1x128xi32>
    %544 = arith.sitofp %543 : vector<1x128xi32> to vector<1x128xf32>
    %545 = vector.broadcast %544 : vector<1x128xf32> to vector<8x128xf32>
    %546 = arith.mulf %540, %545 : vector<8x128xf32>
    %c1_179 = arith.constant 1 : index
    %c0_180 = arith.constant 0 : index
    %c0_181 = arith.constant 0 : index
    %547 = vector.load %arg6[%c1_179, %c0_180, %c0_181] : memref<20x8x8xf32, #tpu.memory_space<vmem>>, vector<1x8x8xf32>
    %548 = vector.shape_cast %547 : vector<1x8x8xf32> to vector<8x8xf32>
    %cst_182 = arith.constant dense<0.000000e+00> : vector<8x128xf32>
    %549 = tpu.matmul %548, %534, %cst_182 {dimension_numbers = #tpu.dot_dimension_numbers<[1], [0], [0], [1], [0, 0, 1, 1], [], []>} : vector<8x8xf32>, vector<8x128xf32>, vector<8x128xf32> -> vector<8x128xf32>
    %cst_183 = arith.constant 0.000000e+00 : f32
    %550 = vector.broadcast %cst_183 : f32 to vector<8x8xf32>
    %551 = vector.extract_strided_slice %549 {offsets = [0, 0], sizes = [8, 120], strides = [1, 1]} : vector<8x128xf32> to vector<8x120xf32>
    %552 = tpu.concatenate %550, %551 in 1 : vector<8x8xf32>, vector<8x120xf32> -> vector<8x128xf32>
    %c8_i32_184 = arith.constant 8 : i32
    %553 = vector.broadcast %c8_i32_184 : i32 to vector<1x128xi32>
    %554 = arith.cmpi sge, %2, %553 : vector<1x128xi32>
    %555 = arith.extui %554 : vector<1x128xi1> to vector<1x128xi32>
    %556 = arith.sitofp %555 : vector<1x128xi32> to vector<1x128xf32>
    %557 = vector.broadcast %556 : vector<1x128xf32> to vector<8x128xf32>
    %558 = arith.mulf %552, %557 : vector<8x128xf32>
    %559 = arith.addf %546, %558 : vector<8x128xf32>
    %c2_185 = arith.constant 2 : index
    %c0_186 = arith.constant 0 : index
    %c0_187 = arith.constant 0 : index
    %560 = vector.load %arg6[%c2_185, %c0_186, %c0_187] : memref<20x8x8xf32, #tpu.memory_space<vmem>>, vector<1x8x8xf32>
    %561 = vector.shape_cast %560 : vector<1x8x8xf32> to vector<8x8xf32>
    %cst_188 = arith.constant dense<0.000000e+00> : vector<8x128xf32>
    %562 = tpu.matmul %561, %534, %cst_188 {dimension_numbers = #tpu.dot_dimension_numbers<[1], [0], [0], [1], [0, 0, 1, 1], [], []>} : vector<8x8xf32>, vector<8x128xf32>, vector<8x128xf32> -> vector<8x128xf32>
    %cst_189 = arith.constant 0.000000e+00 : f32
    %563 = vector.broadcast %cst_189 : f32 to vector<8x7xf32>
    %564 = vector.extract_strided_slice %562 {offsets = [0, 0], sizes = [8, 121], strides = [1, 1]} : vector<8x128xf32> to vector<8x121xf32>
    %565 = tpu.concatenate %563, %564 in 1 : vector<8x7xf32>, vector<8x121xf32> -> vector<8x128xf32>
    %c7_i32_190 = arith.constant 7 : i32
    %566 = vector.broadcast %c7_i32_190 : i32 to vector<1x128xi32>
    %567 = arith.cmpi sge, %2, %566 : vector<1x128xi32>
    %568 = arith.extui %567 : vector<1x128xi1> to vector<1x128xi32>
    %569 = arith.sitofp %568 : vector<1x128xi32> to vector<1x128xf32>
    %570 = vector.broadcast %569 : vector<1x128xf32> to vector<8x128xf32>
    %571 = arith.mulf %565, %570 : vector<8x128xf32>
    %572 = arith.addf %559, %571 : vector<8x128xf32>
    %c3_191 = arith.constant 3 : index
    %c0_192 = arith.constant 0 : index
    %c0_193 = arith.constant 0 : index
    %573 = vector.load %arg6[%c3_191, %c0_192, %c0_193] : memref<20x8x8xf32, #tpu.memory_space<vmem>>, vector<1x8x8xf32>
    %574 = vector.shape_cast %573 : vector<1x8x8xf32> to vector<8x8xf32>
    %cst_194 = arith.constant dense<0.000000e+00> : vector<8x128xf32>
    %575 = tpu.matmul %574, %534, %cst_194 {dimension_numbers = #tpu.dot_dimension_numbers<[1], [0], [0], [1], [0, 0, 1, 1], [], []>} : vector<8x8xf32>, vector<8x128xf32>, vector<8x128xf32> -> vector<8x128xf32>
    %cst_195 = arith.constant 0.000000e+00 : f32
    %576 = vector.broadcast %cst_195 : f32 to vector<8x6xf32>
    %577 = vector.extract_strided_slice %575 {offsets = [0, 0], sizes = [8, 122], strides = [1, 1]} : vector<8x128xf32> to vector<8x122xf32>
    %578 = tpu.concatenate %576, %577 in 1 : vector<8x6xf32>, vector<8x122xf32> -> vector<8x128xf32>
    %c6_i32_196 = arith.constant 6 : i32
    %579 = vector.broadcast %c6_i32_196 : i32 to vector<1x128xi32>
    %580 = arith.cmpi sge, %2, %579 : vector<1x128xi32>
    %581 = arith.extui %580 : vector<1x128xi1> to vector<1x128xi32>
    %582 = arith.sitofp %581 : vector<1x128xi32> to vector<1x128xf32>
    %583 = vector.broadcast %582 : vector<1x128xf32> to vector<8x128xf32>
    %584 = arith.mulf %578, %583 : vector<8x128xf32>
    %585 = arith.addf %572, %584 : vector<8x128xf32>
    %c4_197 = arith.constant 4 : index
    %c0_198 = arith.constant 0 : index
    %c0_199 = arith.constant 0 : index
    %586 = vector.load %arg6[%c4_197, %c0_198, %c0_199] : memref<20x8x8xf32, #tpu.memory_space<vmem>>, vector<1x8x8xf32>
    %587 = vector.shape_cast %586 : vector<1x8x8xf32> to vector<8x8xf32>
    %cst_200 = arith.constant dense<0.000000e+00> : vector<8x128xf32>
    %588 = tpu.matmul %587, %534, %cst_200 {dimension_numbers = #tpu.dot_dimension_numbers<[1], [0], [0], [1], [0, 0, 1, 1], [], []>} : vector<8x8xf32>, vector<8x128xf32>, vector<8x128xf32> -> vector<8x128xf32>
    %cst_201 = arith.constant 0.000000e+00 : f32
    %589 = vector.broadcast %cst_201 : f32 to vector<8x5xf32>
    %590 = vector.extract_strided_slice %588 {offsets = [0, 0], sizes = [8, 123], strides = [1, 1]} : vector<8x128xf32> to vector<8x123xf32>
    %591 = tpu.concatenate %589, %590 in 1 : vector<8x5xf32>, vector<8x123xf32> -> vector<8x128xf32>
    %c5_i32_202 = arith.constant 5 : i32
    %592 = vector.broadcast %c5_i32_202 : i32 to vector<1x128xi32>
    %593 = arith.cmpi sge, %2, %592 : vector<1x128xi32>
    %594 = arith.extui %593 : vector<1x128xi1> to vector<1x128xi32>
    %595 = arith.sitofp %594 : vector<1x128xi32> to vector<1x128xf32>
    %596 = vector.broadcast %595 : vector<1x128xf32> to vector<8x128xf32>
    %597 = arith.mulf %591, %596 : vector<8x128xf32>
    %598 = arith.addf %585, %597 : vector<8x128xf32>
    %c5_203 = arith.constant 5 : index
    %c0_204 = arith.constant 0 : index
    %c0_205 = arith.constant 0 : index
    %599 = vector.load %arg6[%c5_203, %c0_204, %c0_205] : memref<20x8x8xf32, #tpu.memory_space<vmem>>, vector<1x8x8xf32>
    %600 = vector.shape_cast %599 : vector<1x8x8xf32> to vector<8x8xf32>
    %cst_206 = arith.constant dense<0.000000e+00> : vector<8x128xf32>
    %601 = tpu.matmul %600, %534, %cst_206 {dimension_numbers = #tpu.dot_dimension_numbers<[1], [0], [0], [1], [0, 0, 1, 1], [], []>} : vector<8x8xf32>, vector<8x128xf32>, vector<8x128xf32> -> vector<8x128xf32>
    %cst_207 = arith.constant 0.000000e+00 : f32
    %602 = vector.broadcast %cst_207 : f32 to vector<8x4xf32>
    %603 = vector.extract_strided_slice %601 {offsets = [0, 0], sizes = [8, 124], strides = [1, 1]} : vector<8x128xf32> to vector<8x124xf32>
    %604 = tpu.concatenate %602, %603 in 1 : vector<8x4xf32>, vector<8x124xf32> -> vector<8x128xf32>
    %c4_i32_208 = arith.constant 4 : i32
    %605 = vector.broadcast %c4_i32_208 : i32 to vector<1x128xi32>
    %606 = arith.cmpi sge, %2, %605 : vector<1x128xi32>
    %607 = arith.extui %606 : vector<1x128xi1> to vector<1x128xi32>
    %608 = arith.sitofp %607 : vector<1x128xi32> to vector<1x128xf32>
    %609 = vector.broadcast %608 : vector<1x128xf32> to vector<8x128xf32>
    %610 = arith.mulf %604, %609 : vector<8x128xf32>
    %611 = arith.addf %598, %610 : vector<8x128xf32>
    %c6_209 = arith.constant 6 : index
    %c0_210 = arith.constant 0 : index
    %c0_211 = arith.constant 0 : index
    %612 = vector.load %arg6[%c6_209, %c0_210, %c0_211] : memref<20x8x8xf32, #tpu.memory_space<vmem>>, vector<1x8x8xf32>
    %613 = vector.shape_cast %612 : vector<1x8x8xf32> to vector<8x8xf32>
    %cst_212 = arith.constant dense<0.000000e+00> : vector<8x128xf32>
    %614 = tpu.matmul %613, %534, %cst_212 {dimension_numbers = #tpu.dot_dimension_numbers<[1], [0], [0], [1], [0, 0, 1, 1], [], []>} : vector<8x8xf32>, vector<8x128xf32>, vector<8x128xf32> -> vector<8x128xf32>
    %cst_213 = arith.constant 0.000000e+00 : f32
    %615 = vector.broadcast %cst_213 : f32 to vector<8x3xf32>
    %616 = vector.extract_strided_slice %614 {offsets = [0, 0], sizes = [8, 125], strides = [1, 1]} : vector<8x128xf32> to vector<8x125xf32>
    %617 = tpu.concatenate %615, %616 in 1 : vector<8x3xf32>, vector<8x125xf32> -> vector<8x128xf32>
    %c3_i32_214 = arith.constant 3 : i32
    %618 = vector.broadcast %c3_i32_214 : i32 to vector<1x128xi32>
    %619 = arith.cmpi sge, %2, %618 : vector<1x128xi32>
    %620 = arith.extui %619 : vector<1x128xi1> to vector<1x128xi32>
    %621 = arith.sitofp %620 : vector<1x128xi32> to vector<1x128xf32>
    %622 = vector.broadcast %621 : vector<1x128xf32> to vector<8x128xf32>
    %623 = arith.mulf %617, %622 : vector<8x128xf32>
    %624 = arith.addf %611, %623 : vector<8x128xf32>
    %c7_215 = arith.constant 7 : index
    %c0_216 = arith.constant 0 : index
    %c0_217 = arith.constant 0 : index
    %625 = vector.load %arg6[%c7_215, %c0_216, %c0_217] : memref<20x8x8xf32, #tpu.memory_space<vmem>>, vector<1x8x8xf32>
    %626 = vector.shape_cast %625 : vector<1x8x8xf32> to vector<8x8xf32>
    %cst_218 = arith.constant dense<0.000000e+00> : vector<8x128xf32>
    %627 = tpu.matmul %626, %534, %cst_218 {dimension_numbers = #tpu.dot_dimension_numbers<[1], [0], [0], [1], [0, 0, 1, 1], [], []>} : vector<8x8xf32>, vector<8x128xf32>, vector<8x128xf32> -> vector<8x128xf32>
    %cst_219 = arith.constant 0.000000e+00 : f32
    %628 = vector.broadcast %cst_219 : f32 to vector<8x2xf32>
    %629 = vector.extract_strided_slice %627 {offsets = [0, 0], sizes = [8, 126], strides = [1, 1]} : vector<8x128xf32> to vector<8x126xf32>
    %630 = tpu.concatenate %628, %629 in 1 : vector<8x2xf32>, vector<8x126xf32> -> vector<8x128xf32>
    %c2_i32_220 = arith.constant 2 : i32
    %631 = vector.broadcast %c2_i32_220 : i32 to vector<1x128xi32>
    %632 = arith.cmpi sge, %2, %631 : vector<1x128xi32>
    %633 = arith.extui %632 : vector<1x128xi1> to vector<1x128xi32>
    %634 = arith.sitofp %633 : vector<1x128xi32> to vector<1x128xf32>
    %635 = vector.broadcast %634 : vector<1x128xf32> to vector<8x128xf32>
    %636 = arith.mulf %630, %635 : vector<8x128xf32>
    %637 = arith.addf %624, %636 : vector<8x128xf32>
    %c8_221 = arith.constant 8 : index
    %c0_222 = arith.constant 0 : index
    %c0_223 = arith.constant 0 : index
    %638 = vector.load %arg6[%c8_221, %c0_222, %c0_223] : memref<20x8x8xf32, #tpu.memory_space<vmem>>, vector<1x8x8xf32>
    %639 = vector.shape_cast %638 : vector<1x8x8xf32> to vector<8x8xf32>
    %cst_224 = arith.constant dense<0.000000e+00> : vector<8x128xf32>
    %640 = tpu.matmul %639, %534, %cst_224 {dimension_numbers = #tpu.dot_dimension_numbers<[1], [0], [0], [1], [0, 0, 1, 1], [], []>} : vector<8x8xf32>, vector<8x128xf32>, vector<8x128xf32> -> vector<8x128xf32>
    %cst_225 = arith.constant 0.000000e+00 : f32
    %641 = vector.broadcast %cst_225 : f32 to vector<8x1xf32>
    %642 = vector.extract_strided_slice %640 {offsets = [0, 0], sizes = [8, 127], strides = [1, 1]} : vector<8x128xf32> to vector<8x127xf32>
    %643 = tpu.concatenate %641, %642 in 1 : vector<8x1xf32>, vector<8x127xf32> -> vector<8x128xf32>
    %c1_i32_226 = arith.constant 1 : i32
    %644 = vector.broadcast %c1_i32_226 : i32 to vector<1x128xi32>
    %645 = arith.cmpi sge, %2, %644 : vector<1x128xi32>
    %646 = arith.extui %645 : vector<1x128xi1> to vector<1x128xi32>
    %647 = arith.sitofp %646 : vector<1x128xi32> to vector<1x128xf32>
    %648 = vector.broadcast %647 : vector<1x128xf32> to vector<8x128xf32>
    %649 = arith.mulf %643, %648 : vector<8x128xf32>
    %650 = arith.addf %637, %649 : vector<8x128xf32>
    %c9_227 = arith.constant 9 : index
    %c0_228 = arith.constant 0 : index
    %c0_229 = arith.constant 0 : index
    %651 = vector.load %arg6[%c9_227, %c0_228, %c0_229] : memref<20x8x8xf32, #tpu.memory_space<vmem>>, vector<1x8x8xf32>
    %652 = vector.shape_cast %651 : vector<1x8x8xf32> to vector<8x8xf32>
    %cst_230 = arith.constant dense<0.000000e+00> : vector<8x128xf32>
    %653 = tpu.matmul %652, %534, %cst_230 {dimension_numbers = #tpu.dot_dimension_numbers<[1], [0], [0], [1], [0, 0, 1, 1], [], []>} : vector<8x8xf32>, vector<8x128xf32>, vector<8x128xf32> -> vector<8x128xf32>
    %654 = arith.addf %650, %653 : vector<8x128xf32>
    %c10_231 = arith.constant 10 : index
    %c0_232 = arith.constant 0 : index
    %c0_233 = arith.constant 0 : index
    %655 = vector.load %arg6[%c10_231, %c0_232, %c0_233] : memref<20x8x8xf32, #tpu.memory_space<vmem>>, vector<1x8x8xf32>
    %656 = vector.shape_cast %655 : vector<1x8x8xf32> to vector<8x8xf32>
    %cst_234 = arith.constant dense<0.000000e+00> : vector<8x128xf32>
    %657 = tpu.matmul %656, %534, %cst_234 {dimension_numbers = #tpu.dot_dimension_numbers<[1], [0], [0], [1], [0, 0, 1, 1], [], []>} : vector<8x8xf32>, vector<8x128xf32>, vector<8x128xf32> -> vector<8x128xf32>
    %658 = vector.extract_strided_slice %657 {offsets = [0, 1], sizes = [8, 127], strides = [1, 1]} : vector<8x128xf32> to vector<8x127xf32>
    %cst_235 = arith.constant 0.000000e+00 : f32
    %659 = vector.broadcast %cst_235 : f32 to vector<8x1xf32>
    %660 = tpu.concatenate %658, %659 in 1 : vector<8x127xf32>, vector<8x1xf32> -> vector<8x128xf32>
    %c63_i32_236 = arith.constant 63 : i32
    %661 = vector.broadcast %c63_i32_236 : i32 to vector<1x128xi32>
    %662 = arith.cmpi slt, %2, %661 : vector<1x128xi32>
    %663 = arith.extui %662 : vector<1x128xi1> to vector<1x128xi32>
    %664 = arith.sitofp %663 : vector<1x128xi32> to vector<1x128xf32>
    %665 = vector.broadcast %664 : vector<1x128xf32> to vector<8x128xf32>
    %666 = arith.mulf %660, %665 : vector<8x128xf32>
    %667 = arith.addf %654, %666 : vector<8x128xf32>
    %c11_237 = arith.constant 11 : index
    %c0_238 = arith.constant 0 : index
    %c0_239 = arith.constant 0 : index
    %668 = vector.load %arg6[%c11_237, %c0_238, %c0_239] : memref<20x8x8xf32, #tpu.memory_space<vmem>>, vector<1x8x8xf32>
    %669 = vector.shape_cast %668 : vector<1x8x8xf32> to vector<8x8xf32>
    %cst_240 = arith.constant dense<0.000000e+00> : vector<8x128xf32>
    %670 = tpu.matmul %669, %534, %cst_240 {dimension_numbers = #tpu.dot_dimension_numbers<[1], [0], [0], [1], [0, 0, 1, 1], [], []>} : vector<8x8xf32>, vector<8x128xf32>, vector<8x128xf32> -> vector<8x128xf32>
    %671 = vector.extract_strided_slice %670 {offsets = [0, 2], sizes = [8, 126], strides = [1, 1]} : vector<8x128xf32> to vector<8x126xf32>
    %cst_241 = arith.constant 0.000000e+00 : f32
    %672 = vector.broadcast %cst_241 : f32 to vector<8x2xf32>
    %673 = tpu.concatenate %671, %672 in 1 : vector<8x126xf32>, vector<8x2xf32> -> vector<8x128xf32>
    %c62_i32_242 = arith.constant 62 : i32
    %674 = vector.broadcast %c62_i32_242 : i32 to vector<1x128xi32>
    %675 = arith.cmpi slt, %2, %674 : vector<1x128xi32>
    %676 = arith.extui %675 : vector<1x128xi1> to vector<1x128xi32>
    %677 = arith.sitofp %676 : vector<1x128xi32> to vector<1x128xf32>
    %678 = vector.broadcast %677 : vector<1x128xf32> to vector<8x128xf32>
    %679 = arith.mulf %673, %678 : vector<8x128xf32>
    %680 = arith.addf %667, %679 : vector<8x128xf32>
    %c12_243 = arith.constant 12 : index
    %c0_244 = arith.constant 0 : index
    %c0_245 = arith.constant 0 : index
    %681 = vector.load %arg6[%c12_243, %c0_244, %c0_245] : memref<20x8x8xf32, #tpu.memory_space<vmem>>, vector<1x8x8xf32>
    %682 = vector.shape_cast %681 : vector<1x8x8xf32> to vector<8x8xf32>
    %cst_246 = arith.constant dense<0.000000e+00> : vector<8x128xf32>
    %683 = tpu.matmul %682, %534, %cst_246 {dimension_numbers = #tpu.dot_dimension_numbers<[1], [0], [0], [1], [0, 0, 1, 1], [], []>} : vector<8x8xf32>, vector<8x128xf32>, vector<8x128xf32> -> vector<8x128xf32>
    %684 = vector.extract_strided_slice %683 {offsets = [0, 3], sizes = [8, 125], strides = [1, 1]} : vector<8x128xf32> to vector<8x125xf32>
    %cst_247 = arith.constant 0.000000e+00 : f32
    %685 = vector.broadcast %cst_247 : f32 to vector<8x3xf32>
    %686 = tpu.concatenate %684, %685 in 1 : vector<8x125xf32>, vector<8x3xf32> -> vector<8x128xf32>
    %c61_i32_248 = arith.constant 61 : i32
    %687 = vector.broadcast %c61_i32_248 : i32 to vector<1x128xi32>
    %688 = arith.cmpi slt, %2, %687 : vector<1x128xi32>
    %689 = arith.extui %688 : vector<1x128xi1> to vector<1x128xi32>
    %690 = arith.sitofp %689 : vector<1x128xi32> to vector<1x128xf32>
    %691 = vector.broadcast %690 : vector<1x128xf32> to vector<8x128xf32>
    %692 = arith.mulf %686, %691 : vector<8x128xf32>
    %693 = arith.addf %680, %692 : vector<8x128xf32>
    %c13_249 = arith.constant 13 : index
    %c0_250 = arith.constant 0 : index
    %c0_251 = arith.constant 0 : index
    %694 = vector.load %arg6[%c13_249, %c0_250, %c0_251] : memref<20x8x8xf32, #tpu.memory_space<vmem>>, vector<1x8x8xf32>
    %695 = vector.shape_cast %694 : vector<1x8x8xf32> to vector<8x8xf32>
    %cst_252 = arith.constant dense<0.000000e+00> : vector<8x128xf32>
    %696 = tpu.matmul %695, %534, %cst_252 {dimension_numbers = #tpu.dot_dimension_numbers<[1], [0], [0], [1], [0, 0, 1, 1], [], []>} : vector<8x8xf32>, vector<8x128xf32>, vector<8x128xf32> -> vector<8x128xf32>
    %697 = vector.extract_strided_slice %696 {offsets = [0, 4], sizes = [8, 124], strides = [1, 1]} : vector<8x128xf32> to vector<8x124xf32>
    %cst_253 = arith.constant 0.000000e+00 : f32
    %698 = vector.broadcast %cst_253 : f32 to vector<8x4xf32>
    %699 = tpu.concatenate %697, %698 in 1 : vector<8x124xf32>, vector<8x4xf32> -> vector<8x128xf32>
    %c60_i32_254 = arith.constant 60 : i32
    %700 = vector.broadcast %c60_i32_254 : i32 to vector<1x128xi32>
    %701 = arith.cmpi slt, %2, %700 : vector<1x128xi32>
    %702 = arith.extui %701 : vector<1x128xi1> to vector<1x128xi32>
    %703 = arith.sitofp %702 : vector<1x128xi32> to vector<1x128xf32>
    %704 = vector.broadcast %703 : vector<1x128xf32> to vector<8x128xf32>
    %705 = arith.mulf %699, %704 : vector<8x128xf32>
    %706 = arith.addf %693, %705 : vector<8x128xf32>
    %c14_255 = arith.constant 14 : index
    %c0_256 = arith.constant 0 : index
    %c0_257 = arith.constant 0 : index
    %707 = vector.load %arg6[%c14_255, %c0_256, %c0_257] : memref<20x8x8xf32, #tpu.memory_space<vmem>>, vector<1x8x8xf32>
    %708 = vector.shape_cast %707 : vector<1x8x8xf32> to vector<8x8xf32>
    %cst_258 = arith.constant dense<0.000000e+00> : vector<8x128xf32>
    %709 = tpu.matmul %708, %534, %cst_258 {dimension_numbers = #tpu.dot_dimension_numbers<[1], [0], [0], [1], [0, 0, 1, 1], [], []>} : vector<8x8xf32>, vector<8x128xf32>, vector<8x128xf32> -> vector<8x128xf32>
    %710 = vector.extract_strided_slice %709 {offsets = [0, 5], sizes = [8, 123], strides = [1, 1]} : vector<8x128xf32> to vector<8x123xf32>
    %cst_259 = arith.constant 0.000000e+00 : f32
    %711 = vector.broadcast %cst_259 : f32 to vector<8x5xf32>
    %712 = tpu.concatenate %710, %711 in 1 : vector<8x123xf32>, vector<8x5xf32> -> vector<8x128xf32>
    %c59_i32_260 = arith.constant 59 : i32
    %713 = vector.broadcast %c59_i32_260 : i32 to vector<1x128xi32>
    %714 = arith.cmpi slt, %2, %713 : vector<1x128xi32>
    %715 = arith.extui %714 : vector<1x128xi1> to vector<1x128xi32>
    %716 = arith.sitofp %715 : vector<1x128xi32> to vector<1x128xf32>
    %717 = vector.broadcast %716 : vector<1x128xf32> to vector<8x128xf32>
    %718 = arith.mulf %712, %717 : vector<8x128xf32>
    %719 = arith.addf %706, %718 : vector<8x128xf32>
    %c15_261 = arith.constant 15 : index
    %c0_262 = arith.constant 0 : index
    %c0_263 = arith.constant 0 : index
    %720 = vector.load %arg6[%c15_261, %c0_262, %c0_263] : memref<20x8x8xf32, #tpu.memory_space<vmem>>, vector<1x8x8xf32>
    %721 = vector.shape_cast %720 : vector<1x8x8xf32> to vector<8x8xf32>
    %cst_264 = arith.constant dense<0.000000e+00> : vector<8x128xf32>
    %722 = tpu.matmul %721, %534, %cst_264 {dimension_numbers = #tpu.dot_dimension_numbers<[1], [0], [0], [1], [0, 0, 1, 1], [], []>} : vector<8x8xf32>, vector<8x128xf32>, vector<8x128xf32> -> vector<8x128xf32>
    %723 = vector.extract_strided_slice %722 {offsets = [0, 6], sizes = [8, 122], strides = [1, 1]} : vector<8x128xf32> to vector<8x122xf32>
    %cst_265 = arith.constant 0.000000e+00 : f32
    %724 = vector.broadcast %cst_265 : f32 to vector<8x6xf32>
    %725 = tpu.concatenate %723, %724 in 1 : vector<8x122xf32>, vector<8x6xf32> -> vector<8x128xf32>
    %c58_i32_266 = arith.constant 58 : i32
    %726 = vector.broadcast %c58_i32_266 : i32 to vector<1x128xi32>
    %727 = arith.cmpi slt, %2, %726 : vector<1x128xi32>
    %728 = arith.extui %727 : vector<1x128xi1> to vector<1x128xi32>
    %729 = arith.sitofp %728 : vector<1x128xi32> to vector<1x128xf32>
    %730 = vector.broadcast %729 : vector<1x128xf32> to vector<8x128xf32>
    %731 = arith.mulf %725, %730 : vector<8x128xf32>
    %732 = arith.addf %719, %731 : vector<8x128xf32>
    %c16_267 = arith.constant 16 : index
    %c0_268 = arith.constant 0 : index
    %c0_269 = arith.constant 0 : index
    %733 = vector.load %arg6[%c16_267, %c0_268, %c0_269] : memref<20x8x8xf32, #tpu.memory_space<vmem>>, vector<1x8x8xf32>
    %734 = vector.shape_cast %733 : vector<1x8x8xf32> to vector<8x8xf32>
    %cst_270 = arith.constant dense<0.000000e+00> : vector<8x128xf32>
    %735 = tpu.matmul %734, %534, %cst_270 {dimension_numbers = #tpu.dot_dimension_numbers<[1], [0], [0], [1], [0, 0, 1, 1], [], []>} : vector<8x8xf32>, vector<8x128xf32>, vector<8x128xf32> -> vector<8x128xf32>
    %736 = vector.extract_strided_slice %735 {offsets = [0, 7], sizes = [8, 121], strides = [1, 1]} : vector<8x128xf32> to vector<8x121xf32>
    %cst_271 = arith.constant 0.000000e+00 : f32
    %737 = vector.broadcast %cst_271 : f32 to vector<8x7xf32>
    %738 = tpu.concatenate %736, %737 in 1 : vector<8x121xf32>, vector<8x7xf32> -> vector<8x128xf32>
    %c57_i32_272 = arith.constant 57 : i32
    %739 = vector.broadcast %c57_i32_272 : i32 to vector<1x128xi32>
    %740 = arith.cmpi slt, %2, %739 : vector<1x128xi32>
    %741 = arith.extui %740 : vector<1x128xi1> to vector<1x128xi32>
    %742 = arith.sitofp %741 : vector<1x128xi32> to vector<1x128xf32>
    %743 = vector.broadcast %742 : vector<1x128xf32> to vector<8x128xf32>
    %744 = arith.mulf %738, %743 : vector<8x128xf32>
    %745 = arith.addf %732, %744 : vector<8x128xf32>
    %c17_273 = arith.constant 17 : index
    %c0_274 = arith.constant 0 : index
    %c0_275 = arith.constant 0 : index
    %746 = vector.load %arg6[%c17_273, %c0_274, %c0_275] : memref<20x8x8xf32, #tpu.memory_space<vmem>>, vector<1x8x8xf32>
    %747 = vector.shape_cast %746 : vector<1x8x8xf32> to vector<8x8xf32>
    %cst_276 = arith.constant dense<0.000000e+00> : vector<8x128xf32>
    %748 = tpu.matmul %747, %534, %cst_276 {dimension_numbers = #tpu.dot_dimension_numbers<[1], [0], [0], [1], [0, 0, 1, 1], [], []>} : vector<8x8xf32>, vector<8x128xf32>, vector<8x128xf32> -> vector<8x128xf32>
    %749 = vector.extract_strided_slice %748 {offsets = [0, 8], sizes = [8, 120], strides = [1, 1]} : vector<8x128xf32> to vector<8x120xf32>
    %cst_277 = arith.constant 0.000000e+00 : f32
    %750 = vector.broadcast %cst_277 : f32 to vector<8x8xf32>
    %751 = tpu.concatenate %749, %750 in 1 : vector<8x120xf32>, vector<8x8xf32> -> vector<8x128xf32>
    %c56_i32_278 = arith.constant 56 : i32
    %752 = vector.broadcast %c56_i32_278 : i32 to vector<1x128xi32>
    %753 = arith.cmpi slt, %2, %752 : vector<1x128xi32>
    %754 = arith.extui %753 : vector<1x128xi1> to vector<1x128xi32>
    %755 = arith.sitofp %754 : vector<1x128xi32> to vector<1x128xf32>
    %756 = vector.broadcast %755 : vector<1x128xf32> to vector<8x128xf32>
    %757 = arith.mulf %751, %756 : vector<8x128xf32>
    %758 = arith.addf %745, %757 : vector<8x128xf32>
    %c18_279 = arith.constant 18 : index
    %c0_280 = arith.constant 0 : index
    %c0_281 = arith.constant 0 : index
    %759 = vector.load %arg6[%c18_279, %c0_280, %c0_281] : memref<20x8x8xf32, #tpu.memory_space<vmem>>, vector<1x8x8xf32>
    %760 = vector.shape_cast %759 : vector<1x8x8xf32> to vector<8x8xf32>
    %cst_282 = arith.constant dense<0.000000e+00> : vector<8x128xf32>
    %761 = tpu.matmul %760, %534, %cst_282 {dimension_numbers = #tpu.dot_dimension_numbers<[1], [0], [0], [1], [0, 0, 1, 1], [], []>} : vector<8x8xf32>, vector<8x128xf32>, vector<8x128xf32> -> vector<8x128xf32>
    %762 = vector.extract_strided_slice %761 {offsets = [0, 9], sizes = [8, 119], strides = [1, 1]} : vector<8x128xf32> to vector<8x119xf32>
    %cst_283 = arith.constant 0.000000e+00 : f32
    %763 = vector.broadcast %cst_283 : f32 to vector<8x9xf32>
    %764 = tpu.concatenate %762, %763 in 1 : vector<8x119xf32>, vector<8x9xf32> -> vector<8x128xf32>
    %c55_i32_284 = arith.constant 55 : i32
    %765 = vector.broadcast %c55_i32_284 : i32 to vector<1x128xi32>
    %766 = arith.cmpi slt, %2, %765 : vector<1x128xi32>
    %767 = arith.extui %766 : vector<1x128xi1> to vector<1x128xi32>
    %768 = arith.sitofp %767 : vector<1x128xi32> to vector<1x128xf32>
    %769 = vector.broadcast %768 : vector<1x128xf32> to vector<8x128xf32>
    %770 = arith.mulf %764, %769 : vector<8x128xf32>
    %771 = arith.addf %758, %770 : vector<8x128xf32>
    %c19_285 = arith.constant 19 : index
    %c0_286 = arith.constant 0 : index
    %c0_287 = arith.constant 0 : index
    %772 = vector.load %arg6[%c19_285, %c0_286, %c0_287] : memref<20x8x8xf32, #tpu.memory_space<vmem>>, vector<1x8x8xf32>
    %773 = vector.shape_cast %772 : vector<1x8x8xf32> to vector<8x8xf32>
    %cst_288 = arith.constant dense<0.000000e+00> : vector<8x128xf32>
    %774 = tpu.matmul %773, %534, %cst_288 {dimension_numbers = #tpu.dot_dimension_numbers<[1], [0], [0], [1], [0, 0, 1, 1], [], []>} : vector<8x8xf32>, vector<8x128xf32>, vector<8x128xf32> -> vector<8x128xf32>
    %775 = vector.extract_strided_slice %774 {offsets = [0, 10], sizes = [8, 118], strides = [1, 1]} : vector<8x128xf32> to vector<8x118xf32>
    %cst_289 = arith.constant 0.000000e+00 : f32
    %776 = vector.broadcast %cst_289 : f32 to vector<8x10xf32>
    %777 = tpu.concatenate %775, %776 in 1 : vector<8x118xf32>, vector<8x10xf32> -> vector<8x128xf32>
    %c54_i32_290 = arith.constant 54 : i32
    %778 = vector.broadcast %c54_i32_290 : i32 to vector<1x128xi32>
    %779 = arith.cmpi slt, %2, %778 : vector<1x128xi32>
    %780 = arith.extui %779 : vector<1x128xi1> to vector<1x128xi32>
    %781 = arith.sitofp %780 : vector<1x128xi32> to vector<1x128xf32>
    %782 = vector.broadcast %781 : vector<1x128xf32> to vector<8x128xf32>
    %783 = arith.mulf %777, %782 : vector<8x128xf32>
    %784 = arith.addf %771, %783 : vector<8x128xf32>
    %c0_291 = arith.constant 0 : index
    %c0_292 = arith.constant 0 : index
    %c0_293 = arith.constant 0 : index
    %785 = vector.load %arg7[%c0_291, %c0_292, %c0_293] : memref<10x8x8xf32, #tpu.memory_space<vmem>>, vector<1x8x8xf32>
    %786 = vector.shape_cast %785 : vector<1x8x8xf32> to vector<8x8xf32>
    %cst_294 = arith.constant dense<0.000000e+00> : vector<8x128xf32>
    %787 = tpu.matmul %786, %784, %cst_294 {dimension_numbers = #tpu.dot_dimension_numbers<[1], [0], [0], [1], [0, 0, 1, 1], [], []>} : vector<8x8xf32>, vector<8x128xf32>, vector<8x128xf32> -> vector<8x128xf32>
    %cst_295 = arith.constant 0.000000e+00 : f32
    %788 = vector.broadcast %cst_295 : f32 to vector<8x4xf32>
    %789 = vector.extract_strided_slice %787 {offsets = [0, 0], sizes = [8, 124], strides = [1, 1]} : vector<8x128xf32> to vector<8x124xf32>
    %790 = tpu.concatenate %788, %789 in 1 : vector<8x4xf32>, vector<8x124xf32> -> vector<8x128xf32>
    %c4_i32_296 = arith.constant 4 : i32
    %791 = vector.broadcast %c4_i32_296 : i32 to vector<1x128xi32>
    %792 = arith.cmpi sge, %2, %791 : vector<1x128xi32>
    %793 = arith.extui %792 : vector<1x128xi1> to vector<1x128xi32>
    %794 = arith.sitofp %793 : vector<1x128xi32> to vector<1x128xf32>
    %795 = vector.broadcast %794 : vector<1x128xf32> to vector<8x128xf32>
    %796 = arith.mulf %790, %795 : vector<8x128xf32>
    %c1_297 = arith.constant 1 : index
    %c0_298 = arith.constant 0 : index
    %c0_299 = arith.constant 0 : index
    %797 = vector.load %arg7[%c1_297, %c0_298, %c0_299] : memref<10x8x8xf32, #tpu.memory_space<vmem>>, vector<1x8x8xf32>
    %798 = vector.shape_cast %797 : vector<1x8x8xf32> to vector<8x8xf32>
    %cst_300 = arith.constant dense<0.000000e+00> : vector<8x128xf32>
    %799 = tpu.matmul %798, %784, %cst_300 {dimension_numbers = #tpu.dot_dimension_numbers<[1], [0], [0], [1], [0, 0, 1, 1], [], []>} : vector<8x8xf32>, vector<8x128xf32>, vector<8x128xf32> -> vector<8x128xf32>
    %cst_301 = arith.constant 0.000000e+00 : f32
    %800 = vector.broadcast %cst_301 : f32 to vector<8x3xf32>
    %801 = vector.extract_strided_slice %799 {offsets = [0, 0], sizes = [8, 125], strides = [1, 1]} : vector<8x128xf32> to vector<8x125xf32>
    %802 = tpu.concatenate %800, %801 in 1 : vector<8x3xf32>, vector<8x125xf32> -> vector<8x128xf32>
    %c3_i32_302 = arith.constant 3 : i32
    %803 = vector.broadcast %c3_i32_302 : i32 to vector<1x128xi32>
    %804 = arith.cmpi sge, %2, %803 : vector<1x128xi32>
    %805 = arith.extui %804 : vector<1x128xi1> to vector<1x128xi32>
    %806 = arith.sitofp %805 : vector<1x128xi32> to vector<1x128xf32>
    %807 = vector.broadcast %806 : vector<1x128xf32> to vector<8x128xf32>
    %808 = arith.mulf %802, %807 : vector<8x128xf32>
    %809 = arith.addf %796, %808 : vector<8x128xf32>
    %c2_303 = arith.constant 2 : index
    %c0_304 = arith.constant 0 : index
    %c0_305 = arith.constant 0 : index
    %810 = vector.load %arg7[%c2_303, %c0_304, %c0_305] : memref<10x8x8xf32, #tpu.memory_space<vmem>>, vector<1x8x8xf32>
    %811 = vector.shape_cast %810 : vector<1x8x8xf32> to vector<8x8xf32>
    %cst_306 = arith.constant dense<0.000000e+00> : vector<8x128xf32>
    %812 = tpu.matmul %811, %784, %cst_306 {dimension_numbers = #tpu.dot_dimension_numbers<[1], [0], [0], [1], [0, 0, 1, 1], [], []>} : vector<8x8xf32>, vector<8x128xf32>, vector<8x128xf32> -> vector<8x128xf32>
    %cst_307 = arith.constant 0.000000e+00 : f32
    %813 = vector.broadcast %cst_307 : f32 to vector<8x2xf32>
    %814 = vector.extract_strided_slice %812 {offsets = [0, 0], sizes = [8, 126], strides = [1, 1]} : vector<8x128xf32> to vector<8x126xf32>
    %815 = tpu.concatenate %813, %814 in 1 : vector<8x2xf32>, vector<8x126xf32> -> vector<8x128xf32>
    %c2_i32_308 = arith.constant 2 : i32
    %816 = vector.broadcast %c2_i32_308 : i32 to vector<1x128xi32>
    %817 = arith.cmpi sge, %2, %816 : vector<1x128xi32>
    %818 = arith.extui %817 : vector<1x128xi1> to vector<1x128xi32>
    %819 = arith.sitofp %818 : vector<1x128xi32> to vector<1x128xf32>
    %820 = vector.broadcast %819 : vector<1x128xf32> to vector<8x128xf32>
    %821 = arith.mulf %815, %820 : vector<8x128xf32>
    %822 = arith.addf %809, %821 : vector<8x128xf32>
    %c3_309 = arith.constant 3 : index
    %c0_310 = arith.constant 0 : index
    %c0_311 = arith.constant 0 : index
    %823 = vector.load %arg7[%c3_309, %c0_310, %c0_311] : memref<10x8x8xf32, #tpu.memory_space<vmem>>, vector<1x8x8xf32>
    %824 = vector.shape_cast %823 : vector<1x8x8xf32> to vector<8x8xf32>
    %cst_312 = arith.constant dense<0.000000e+00> : vector<8x128xf32>
    %825 = tpu.matmul %824, %784, %cst_312 {dimension_numbers = #tpu.dot_dimension_numbers<[1], [0], [0], [1], [0, 0, 1, 1], [], []>} : vector<8x8xf32>, vector<8x128xf32>, vector<8x128xf32> -> vector<8x128xf32>
    %cst_313 = arith.constant 0.000000e+00 : f32
    %826 = vector.broadcast %cst_313 : f32 to vector<8x1xf32>
    %827 = vector.extract_strided_slice %825 {offsets = [0, 0], sizes = [8, 127], strides = [1, 1]} : vector<8x128xf32> to vector<8x127xf32>
    %828 = tpu.concatenate %826, %827 in 1 : vector<8x1xf32>, vector<8x127xf32> -> vector<8x128xf32>
    %c1_i32_314 = arith.constant 1 : i32
    %829 = vector.broadcast %c1_i32_314 : i32 to vector<1x128xi32>
    %830 = arith.cmpi sge, %2, %829 : vector<1x128xi32>
    %831 = arith.extui %830 : vector<1x128xi1> to vector<1x128xi32>
    %832 = arith.sitofp %831 : vector<1x128xi32> to vector<1x128xf32>
    %833 = vector.broadcast %832 : vector<1x128xf32> to vector<8x128xf32>
    %834 = arith.mulf %828, %833 : vector<8x128xf32>
    %835 = arith.addf %822, %834 : vector<8x128xf32>
    %c4_315 = arith.constant 4 : index
    %c0_316 = arith.constant 0 : index
    %c0_317 = arith.constant 0 : index
    %836 = vector.load %arg7[%c4_315, %c0_316, %c0_317] : memref<10x8x8xf32, #tpu.memory_space<vmem>>, vector<1x8x8xf32>
    %837 = vector.shape_cast %836 : vector<1x8x8xf32> to vector<8x8xf32>
    %cst_318 = arith.constant dense<0.000000e+00> : vector<8x128xf32>
    %838 = tpu.matmul %837, %784, %cst_318 {dimension_numbers = #tpu.dot_dimension_numbers<[1], [0], [0], [1], [0, 0, 1, 1], [], []>} : vector<8x8xf32>, vector<8x128xf32>, vector<8x128xf32> -> vector<8x128xf32>
    %839 = arith.addf %835, %838 : vector<8x128xf32>
    %c5_319 = arith.constant 5 : index
    %c0_320 = arith.constant 0 : index
    %c0_321 = arith.constant 0 : index
    %840 = vector.load %arg7[%c5_319, %c0_320, %c0_321] : memref<10x8x8xf32, #tpu.memory_space<vmem>>, vector<1x8x8xf32>
    %841 = vector.shape_cast %840 : vector<1x8x8xf32> to vector<8x8xf32>
    %cst_322 = arith.constant dense<0.000000e+00> : vector<8x128xf32>
    %842 = tpu.matmul %841, %784, %cst_322 {dimension_numbers = #tpu.dot_dimension_numbers<[1], [0], [0], [1], [0, 0, 1, 1], [], []>} : vector<8x8xf32>, vector<8x128xf32>, vector<8x128xf32> -> vector<8x128xf32>
    %843 = vector.extract_strided_slice %842 {offsets = [0, 1], sizes = [8, 127], strides = [1, 1]} : vector<8x128xf32> to vector<8x127xf32>
    %cst_323 = arith.constant 0.000000e+00 : f32
    %844 = vector.broadcast %cst_323 : f32 to vector<8x1xf32>
    %845 = tpu.concatenate %843, %844 in 1 : vector<8x127xf32>, vector<8x1xf32> -> vector<8x128xf32>
    %c63_i32_324 = arith.constant 63 : i32
    %846 = vector.broadcast %c63_i32_324 : i32 to vector<1x128xi32>
    %847 = arith.cmpi slt, %2, %846 : vector<1x128xi32>
    %848 = arith.extui %847 : vector<1x128xi1> to vector<1x128xi32>
    %849 = arith.sitofp %848 : vector<1x128xi32> to vector<1x128xf32>
    %850 = vector.broadcast %849 : vector<1x128xf32> to vector<8x128xf32>
    %851 = arith.mulf %845, %850 : vector<8x128xf32>
    %852 = arith.addf %839, %851 : vector<8x128xf32>
    %c6_325 = arith.constant 6 : index
    %c0_326 = arith.constant 0 : index
    %c0_327 = arith.constant 0 : index
    %853 = vector.load %arg7[%c6_325, %c0_326, %c0_327] : memref<10x8x8xf32, #tpu.memory_space<vmem>>, vector<1x8x8xf32>
    %854 = vector.shape_cast %853 : vector<1x8x8xf32> to vector<8x8xf32>
    %cst_328 = arith.constant dense<0.000000e+00> : vector<8x128xf32>
    %855 = tpu.matmul %854, %784, %cst_328 {dimension_numbers = #tpu.dot_dimension_numbers<[1], [0], [0], [1], [0, 0, 1, 1], [], []>} : vector<8x8xf32>, vector<8x128xf32>, vector<8x128xf32> -> vector<8x128xf32>
    %856 = vector.extract_strided_slice %855 {offsets = [0, 2], sizes = [8, 126], strides = [1, 1]} : vector<8x128xf32> to vector<8x126xf32>
    %cst_329 = arith.constant 0.000000e+00 : f32
    %857 = vector.broadcast %cst_329 : f32 to vector<8x2xf32>
    %858 = tpu.concatenate %856, %857 in 1 : vector<8x126xf32>, vector<8x2xf32> -> vector<8x128xf32>
    %c62_i32_330 = arith.constant 62 : i32
    %859 = vector.broadcast %c62_i32_330 : i32 to vector<1x128xi32>
    %860 = arith.cmpi slt, %2, %859 : vector<1x128xi32>
    %861 = arith.extui %860 : vector<1x128xi1> to vector<1x128xi32>
    %862 = arith.sitofp %861 : vector<1x128xi32> to vector<1x128xf32>
    %863 = vector.broadcast %862 : vector<1x128xf32> to vector<8x128xf32>
    %864 = arith.mulf %858, %863 : vector<8x128xf32>
    %865 = arith.addf %852, %864 : vector<8x128xf32>
    %c7_331 = arith.constant 7 : index
    %c0_332 = arith.constant 0 : index
    %c0_333 = arith.constant 0 : index
    %866 = vector.load %arg7[%c7_331, %c0_332, %c0_333] : memref<10x8x8xf32, #tpu.memory_space<vmem>>, vector<1x8x8xf32>
    %867 = vector.shape_cast %866 : vector<1x8x8xf32> to vector<8x8xf32>
    %cst_334 = arith.constant dense<0.000000e+00> : vector<8x128xf32>
    %868 = tpu.matmul %867, %784, %cst_334 {dimension_numbers = #tpu.dot_dimension_numbers<[1], [0], [0], [1], [0, 0, 1, 1], [], []>} : vector<8x8xf32>, vector<8x128xf32>, vector<8x128xf32> -> vector<8x128xf32>
    %869 = vector.extract_strided_slice %868 {offsets = [0, 3], sizes = [8, 125], strides = [1, 1]} : vector<8x128xf32> to vector<8x125xf32>
    %cst_335 = arith.constant 0.000000e+00 : f32
    %870 = vector.broadcast %cst_335 : f32 to vector<8x3xf32>
    %871 = tpu.concatenate %869, %870 in 1 : vector<8x125xf32>, vector<8x3xf32> -> vector<8x128xf32>
    %c61_i32_336 = arith.constant 61 : i32
    %872 = vector.broadcast %c61_i32_336 : i32 to vector<1x128xi32>
    %873 = arith.cmpi slt, %2, %872 : vector<1x128xi32>
    %874 = arith.extui %873 : vector<1x128xi1> to vector<1x128xi32>
    %875 = arith.sitofp %874 : vector<1x128xi32> to vector<1x128xf32>
    %876 = vector.broadcast %875 : vector<1x128xf32> to vector<8x128xf32>
    %877 = arith.mulf %871, %876 : vector<8x128xf32>
    %878 = arith.addf %865, %877 : vector<8x128xf32>
    %c8_337 = arith.constant 8 : index
    %c0_338 = arith.constant 0 : index
    %c0_339 = arith.constant 0 : index
    %879 = vector.load %arg7[%c8_337, %c0_338, %c0_339] : memref<10x8x8xf32, #tpu.memory_space<vmem>>, vector<1x8x8xf32>
    %880 = vector.shape_cast %879 : vector<1x8x8xf32> to vector<8x8xf32>
    %cst_340 = arith.constant dense<0.000000e+00> : vector<8x128xf32>
    %881 = tpu.matmul %880, %784, %cst_340 {dimension_numbers = #tpu.dot_dimension_numbers<[1], [0], [0], [1], [0, 0, 1, 1], [], []>} : vector<8x8xf32>, vector<8x128xf32>, vector<8x128xf32> -> vector<8x128xf32>
    %882 = vector.extract_strided_slice %881 {offsets = [0, 4], sizes = [8, 124], strides = [1, 1]} : vector<8x128xf32> to vector<8x124xf32>
    %cst_341 = arith.constant 0.000000e+00 : f32
    %883 = vector.broadcast %cst_341 : f32 to vector<8x4xf32>
    %884 = tpu.concatenate %882, %883 in 1 : vector<8x124xf32>, vector<8x4xf32> -> vector<8x128xf32>
    %c60_i32_342 = arith.constant 60 : i32
    %885 = vector.broadcast %c60_i32_342 : i32 to vector<1x128xi32>
    %886 = arith.cmpi slt, %2, %885 : vector<1x128xi32>
    %887 = arith.extui %886 : vector<1x128xi1> to vector<1x128xi32>
    %888 = arith.sitofp %887 : vector<1x128xi32> to vector<1x128xf32>
    %889 = vector.broadcast %888 : vector<1x128xf32> to vector<8x128xf32>
    %890 = arith.mulf %884, %889 : vector<8x128xf32>
    %891 = arith.addf %878, %890 : vector<8x128xf32>
    %c9_343 = arith.constant 9 : index
    %c0_344 = arith.constant 0 : index
    %c0_345 = arith.constant 0 : index
    %892 = vector.load %arg7[%c9_343, %c0_344, %c0_345] : memref<10x8x8xf32, #tpu.memory_space<vmem>>, vector<1x8x8xf32>
    %893 = vector.shape_cast %892 : vector<1x8x8xf32> to vector<8x8xf32>
    %cst_346 = arith.constant dense<0.000000e+00> : vector<8x128xf32>
    %894 = tpu.matmul %893, %784, %cst_346 {dimension_numbers = #tpu.dot_dimension_numbers<[1], [0], [0], [1], [0, 0, 1, 1], [], []>} : vector<8x8xf32>, vector<8x128xf32>, vector<8x128xf32> -> vector<8x128xf32>
    %895 = vector.extract_strided_slice %894 {offsets = [0, 5], sizes = [8, 123], strides = [1, 1]} : vector<8x128xf32> to vector<8x123xf32>
    %cst_347 = arith.constant 0.000000e+00 : f32
    %896 = vector.broadcast %cst_347 : f32 to vector<8x5xf32>
    %897 = tpu.concatenate %895, %896 in 1 : vector<8x123xf32>, vector<8x5xf32> -> vector<8x128xf32>
    %c59_i32_348 = arith.constant 59 : i32
    %898 = vector.broadcast %c59_i32_348 : i32 to vector<1x128xi32>
    %899 = arith.cmpi slt, %2, %898 : vector<1x128xi32>
    %900 = arith.extui %899 : vector<1x128xi1> to vector<1x128xi32>
    %901 = arith.sitofp %900 : vector<1x128xi32> to vector<1x128xf32>
    %902 = vector.broadcast %901 : vector<1x128xf32> to vector<8x128xf32>
    %903 = arith.mulf %897, %902 : vector<8x128xf32>
    %904 = arith.addf %891, %903 : vector<8x128xf32>
    %905 = arith.addf %904, %11 : vector<8x128xf32>
    %c0_349 = arith.constant 0 : index
    %c0_350 = arith.constant 0 : index
    %c0_351 = arith.constant 0 : index
    %906 = vector.load %arg8[%c0_349, %c0_350, %c0_351] : memref<1x8x128xf32, #tpu.memory_space<vmem>>, vector<1x8x128xf32>
    %907 = vector.shape_cast %906 : vector<1x8x128xf32> to vector<8x128xf32>
    %908 = vector.shape_cast %905 : vector<8x128xf32> to vector<1x8x128xf32>
    tpu.vector_store %arg8[%c0_349, %c0_350, %c0_351], %908 {strides = array<i32>} : memref<1x8x128xf32, #tpu.memory_space<vmem>>, vector<1x8x128xf32>,
    return
  }
  func.func @transform_0(%arg0: i32) -> (i32, i32, i32) {
    %c0_i32 = arith.constant 0 : i32
    %c0_i32_0 = arith.constant 0 : i32
    %c0_i32_1 = arith.constant 0 : i32
    return %arg0, %c0_i32, %c0_i32_0 : i32, i32, i32
  }
  func.func @transform_1(%arg0: i32) -> (i32, i32) {
    %c0_i32 = arith.constant 0 : i32
    %c0_i32_0 = arith.constant 0 : i32
    %c0_i32_1 = arith.constant 0 : i32
    return %c0_i32, %c0_i32_0 : i32, i32
  }
  func.func @transform_2(%arg0: i32) -> (i32, i32) {
    %c0_i32 = arith.constant 0 : i32
    %c0_i32_0 = arith.constant 0 : i32
    %c0_i32_1 = arith.constant 0 : i32
    return %c0_i32, %c0_i32_0 : i32, i32
  }
  func.func @transform_3(%arg0: i32) -> (i32, i32) {
    %c0_i32 = arith.constant 0 : i32
    %c0_i32_0 = arith.constant 0 : i32
    %c0_i32_1 = arith.constant 0 : i32
    return %c0_i32, %c0_i32_0 : i32, i32
  }
  func.func @transform_4(%arg0: i32) -> (i32, i32, i32) {
    %c0_i32 = arith.constant 0 : i32
    %c0_i32_0 = arith.constant 0 : i32
    %c0_i32_1 = arith.constant 0 : i32
    %c0_i32_2 = arith.constant 0 : i32
    return %c0_i32, %c0_i32_0, %c0_i32_1 : i32, i32, i32
  }
  func.func @transform_5(%arg0: i32) -> (i32, i32, i32) {
    %c0_i32 = arith.constant 0 : i32
    %c0_i32_0 = arith.constant 0 : i32
    %c0_i32_1 = arith.constant 0 : i32
    %c0_i32_2 = arith.constant 0 : i32
    return %c0_i32, %c0_i32_0, %c0_i32_1 : i32, i32, i32
  }
  func.func @transform_6(%arg0: i32) -> (i32, i32, i32) {
    %c0_i32 = arith.constant 0 : i32
    %c0_i32_0 = arith.constant 0 : i32
    %c0_i32_1 = arith.constant 0 : i32
    %c0_i32_2 = arith.constant 0 : i32
    return %c0_i32, %c0_i32_0, %c0_i32_1 : i32, i32, i32
  }
  func.func @transform_7(%arg0: i32) -> (i32, i32, i32) {
    %c0_i32 = arith.constant 0 : i32
    %c0_i32_0 = arith.constant 0 : i32
    %c0_i32_1 = arith.constant 0 : i32
    return %arg0, %c0_i32, %c0_i32_0 : i32, i32, i32
  }
}

</mosaic_0001>

<bundles_post_ra>
// kernel: tile.9
= control target key start
LH: loop header
LB: loop body
LE: loop exit
PB: predicated region body
PF: predicated region fallthrough
CT: control target
= control target key end

     0   :  { %vm7_vm0 = vcmask 523264   ;;  %vm13_vm1 = vcmask 1048064   ;;  %s39_s0 = inlined_call_operand.vmem [shape: s32[2,64], index: 0, kind: input, shape index: {}]   ;;  %s40_s1 = inlined_call_operand.vmem [shape: s32[1,128], index: 1, kind: output, shape index: {}]  }
   0x1   :  { %v4_v0 = vld [vmem:[%s39_s0] sm:$0x3]  ;;  %s22_s0 = smov 64  }
   0x2   :  { %5 = vst [vmem:[#allocation1] sm:$0x3] %v4_v0 }
   0x9   :  { %v10_v1 = vld [vmem:[#allocation1 + $0x1] sm:$0x1]   ;;  %v6_v2 = vld [vmem:[#allocation1] sm:$0x1]  }
   0xa   :  { %11 = vrot.lane.b32.xlu0 %v10_v1, %s22_s0  ;;  %8 = vst.msk [vmem:[#allocation0] sm:$0x1] %vm7_vm0, %v6_v2  }
  0x7c   :  { %v12_v3 = vpop.permute.xlu0 %11  }
  0x7d   :  { %14 = vst.msk [vmem:[#allocation0] sm:$0x1] %vm13_vm1, %v12_v3  }
  0x84   :  { %v18_v4 = vld [vmem:[#allocation0] sm:$0x1] }
  0x85   :  { %20 = vst [vmem:[%s40_s1] sm:$0x1] %v18_v4 }

// kernel: inception_block_forward.1
= control target key start
LH: loop header
LB: loop body
LE: loop exit
PB: predicated region body
PF: predicated region fallthrough
CT: control target
= control target key end

     0   :  { %vm49_vm0 = vcmask 1043456   ;;  %vm33_vm1 = vcmask 31744   ;;  %v7720_v0 = vmov 0.0   ;;  %vm7721_vm2 = vmmov 0   ;;  %s7723_s18 = smov 20   ;;  %s7724_s19 = smov 18   ;;  %s8805_s0 = inlined_call_operand.vmem [shape: f32[1,4,128], index: 0, kind: input, shape index: {}]   ;;  %s8806_s2 = inlined_call_operand.vmem [shape: f32[40,4], index: 2, kind: input, shape index: {}]   ;;  %s8807_s4 = inlined_call_operand.vmem [shape: f32[41,8,32], index: 4, kind: input, shape index: {}]   ;;  %s8808_s1 = inlined_call_operand.vmem [shape: s32[1,128], index: 1, kind: input, shape index: {}]   ;;  %s8809_s5 = inlined_call_operand.vmem [shape: f32[20,8,8], index: 5, kind: input, shape index: {}]   ;;  %s8810_s6 = inlined_call_operand.vmem [shape: f32[10,8,8], index: 6, kind: input, shape index: {}]   ;;  %s8811_s3 = inlined_call_operand.vmem [shape: f32[8,1], index: 3, kind: input, shape index: {}]   ;;  %s8812_s7 = inlined_call_operand.vmem [shape: f32[1,8,128], index: 7, kind: output, shape index: {}]  }
   0x1   :  { %6811 = vmatprep.subr.mxu0 %v7720_v0  ;;  %v26_v1 = vld [vmem:[%s8805_s0] sm:$0xf]  ;;  %6813 = vmatprep.mubr.msk.f32.mxu0 %vm7721_vm2, %v7720_v0  ;;  %v29_v3 = vld [vmem:[%s8806_s2 + $0x8] sm:$0xff]  ;;  %v30_v4 = vld [vmem:[%s8806_s2 + $0x10] sm:$0xff]  ;;  %v7722_v6 = vmov 0.0|0.0   ;;  %vm152_vm3 = vcmask 261120  }
   0x2   :  { %v28_v2 = vld [vmem:[%s8806_s2] sm:$0xff]  ;;  %6812 = vmatpush3.msk.msra.mxu0 %vm49_vm0, %v26_v1  ;;  %6836 = vmatprep.mubr.msk.f32.mxu1 %vm7721_vm2, %v7720_v0  ;;  %v31_v5 = vld [vmem:[%s8806_s2 + $0x18] sm:$0xff]  ;;  %v6366_v19 = vld [vmem:[%s8807_s4 + $0x10] sm:$0xff]  ;;  %s7725_s20 = smov 19   ;;  %s7727_s21 = smov 17   ;;  %vm321_vm6 = vcmask 154624  }
   0x3   :  { %6814 = vmatmul.mubr.msk.f32.vlgmr.msra.gmra.mrb[0].mxu0 %vm33_vm1, %v28_v2  ;;  %7429 = vmatprep.subr.bf16.mxu1 %v7722_v6  ;;  %v32_v7 = vld [vmem:[%s8806_s2 + $0x20] sm:$0xff]  ;;  %v6363_v20 = vld [vmem:[%s8807_s4 + $0x8] sm:$0xff]  ;;  %v6369_v22 = vld [vmem:[%s8807_s4 + $0x18] sm:$0xff]  ;;  %s7728_s22 = smov 14   ;;  %s7729_s23 = smov 15   ;;  %vm230_vm8 = vcmask 162816  }
   0x4   :  { %6816 = vmatprep.mubr.msk.f32.mxu0 %vm7721_vm2, %v7720_v0  ;;  %7441 = vmatprep.subr.bf16.mxu0 %v7722_v6  ;;  %v151_v18 = vld [vmem:[%s8807_s4] sm:$0xff]  ;;  %v6378_v23 = vld [vmem:[%s8807_s4 + $0x30] sm:$0xff]  ;;  %v6375_v24 = vld [vmem:[%s8807_s4 + $0x28] sm:$0xff]  ;;  %s7730_s24 = smov 12   ;;  %s7731_s25 = smov 13   ;;  %vm413_vm10 = vcmask 146432  }
   0x5   :  { %v6372_v21 = vld [vmem:[%s8807_s4 + $0x20] sm:$0xff]  ;;  %v6381_v26 = vld [vmem:[%s8807_s4 + $0x38] sm:$0xff]  ;;  %v6390_v27 = vld [vmem:[%s8807_s4 + $0x50] sm:$0xff]  ;;  %s7732_s26 = smov 10   ;;  %s7733_s27 = smov 11   ;;  %vm505_vm11 = vcmask 138240  }
   0x6   :  { %v6384_v25 = vld [vmem:[%s8807_s4 + $0x40] sm:$0xff]  ;;  %v6387_v28 = vld [vmem:[%s8807_s4 + $0x48] sm:$0xff]  ;;  %v6393_v30 = vld [vmem:[%s8807_s4 + $0x58] sm:$0xff]  ;;  %s7734_s28 = smov 8   ;;  %s7735_s29 = smov 9   ;;  %vm597_vm14 = vcmask 130048  }
   0x7   :  { %6817 = vmatmul.mubr.msk.f32.gmra.mrb[2].mxu0 %vm33_vm1, %v29_v3  ;;  %v6396_v29 = vld [vmem:[%s8807_s4 + $0x60] sm:$0xff]  ;;  %v6402_v31 = vld [vmem:[%s8807_s4 + $0x70] sm:$0xff]  ;;  %v6399_v32 = vld [vmem:[%s8807_s4 + $0x68] sm:$0xff]  ;;  %s7736_s0 = smov 6   ;;  %s7737_s30 = smov 7   ;;  %vm689_vm15 = vcmask 121856  }
   0x8   :  { %6819 = vmatprep.mubr.msk.f32.mxu0 %vm7721_vm2, %v7720_v0  ;;  %v6408_v33 = vld [vmem:[%s8807_s4 + $0x80] sm:$0xff]  ;;  %v6405_v34 = vld [vmem:[%s8807_s4 + $0x78] sm:$0xff]  ;;  %v6414_v35 = vld [vmem:[%s8807_s4 + $0x90] sm:$0xff]  ;;  %s7738_s8 = smov 4   ;;  %s7739_s9 = smov 5  }
   0x9   :  { %v6411_v36 = vld [vmem:[%s8807_s4 + $0x88] sm:$0xff]  ;;  %v6420_v37 = vld [vmem:[%s8807_s4 + $0xa0] sm:$0xff]  ;;  %v6417_v38 = vld [vmem:[%s8807_s4 + $0x98] sm:$0xff]  ;;  %s7740_s10 = smov 2   ;;  %s7741_s11 = smov 3  }
   0xa   :  { %v6425_v39 = vld [vmem:[%s8807_s4 + $0xb0] sm:$0xff]  ;;  %v6422_v41 = vld [vmem:[%s8807_s4 + $0xa8] sm:$0xff]  ;;  %v6431_v42 = vld [vmem:[%s8807_s4 + $0xc0] sm:$0xff]  ;;  %s7742_s2 = smov 1   ;;  %s7743_s12 = smov 126  }
   0xb   :  { %6820 = vmatmul.mubr.msk.f32.gmra.mrb[4].mxu0 %vm33_vm1, %v30_v4  ;;  %v6428_v44 = vld [vmem:[%s8807_s4 + $0xb8] sm:$0xff]  ;;  %v6437_v45 = vld [vmem:[%s8807_s4 + $0xd0] sm:$0xff]  ;;  %v6434_v46 = vld [vmem:[%s8807_s4 + $0xc8] sm:$0xff]  ;;  %s7744_s13 = smov 127   ;;  %s7745_s14 = smov 124  }
   0xc   :  { %6822 = vmatprep.mubr.msk.f32.mxu0 %vm7721_vm2, %v7720_v0  ;;  %v6443_v47 = vld [vmem:[%s8807_s4 + $0xe0] sm:$0xff]  ;;  %v6440_v48 = vld [vmem:[%s8807_s4 + $0xd8] sm:$0xff]  ;;  %v6449_v49 = vld [vmem:[%s8807_s4 + $0xf0] sm:$0xff]  ;;  %s7746_s15 = smov 125   ;;  %s7747_s16 = smov 122  }
   0xd   :  { %v6446_v50 = vld [vmem:[%s8807_s4 + $0xe8] sm:$0xff]  ;;  %v6455_v51 = vld [vmem:[%s8807_s4 + $0x100] sm:$0xff]  ;;  %v6452_v52 = vld [vmem:[%s8807_s4 + $0xf8] sm:$0xff]  ;;  %s7748_s17 = smov 123  }
   0xe   :  { %v6461_v53 = vld [vmem:[%s8807_s4 + $0x110] sm:$0xff]  ;;  %v6458_v54 = vld [vmem:[%s8807_s4 + $0x108] sm:$0xff]  ;;  %v6467_v55 = vld [vmem:[%s8807_s4 + $0x120] sm:$0xff] }
   0xf   :  { %6823 = vmatmul.mubr.msk.f32.gmra.mrb[6].mxu0 %vm33_vm1, %v31_v5  ;;  %v6464_v56 = vld [vmem:[%s8807_s4 + $0x118] sm:$0xff]  ;;  %v6473_v57 = vld [vmem:[%s8807_s4 + $0x130] sm:$0xff]  ;;  %v6470_v58 = vld [vmem:[%s8807_s4 + $0x128] sm:$0xff] }
  0x10   :  { %6825 = vmatprep.mubr.msk.f32.mxu0 %vm7721_vm2, %v7720_v0  ;;  %v6479_v59 = vld [vmem:[%s8807_s4 + $0x140] sm:$0xff]  ;;  %v6476_v60 = vld [vmem:[%s8807_s4 + $0x138] sm:$0xff]  ;;  %s7726_s4 = smov 16  }
  0x13   :  { %6826 = vmatmul.mubr.msk.f32.gmra.mrb[8].mxu0 %vm33_vm1, %v32_v7 }
  0x14   :  { %6858 = vmatprep.mubr.msk.f32.mxu0 %vm7721_vm2, %v7720_v0 }
  0xd6   :  { %v119_v8 = vpop.f32.mrb[0].mxu0 }
  0xd7   :  { %v6815_v9 = vpop.f32.mrb[1].mxu0 }
  0xda   :  { %v124_v10 = vpop.f32.mrb[2].mxu0 }
  0xdb   :  { %v7844_v11 = vpack.c.bf16 %v124_v10, %v119_v8  ;;  %v6818_v12 = vpop.f32.mrb[3].mxu0 }
  0xdd   :  { %7431 = vmatpush3.bf16.msra.mxu1 %v7844_v11  ;;  %7443 = vmatpush3.bf16.msra.mxu0 %v7844_v11 }
  0xde   :  { %v129_v13 = vpop.f32.mrb[4].mxu0  ;;  %7432 = vmatprep.subr.bf16.mxu1 %v7722_v6  ;;  %7444 = vmatprep.subr.bf16.mxu0 %v7722_v6 }
  0xdf   :  { %v6821_v14 = vpop.f32.mrb[5].mxu0 }
  0xe2   :  { %v134_v15 = vpop.f32.mrb[6].mxu0 }
  0xe3   :  { %v7850_v16 = vpack.c.bf16 %v134_v15, %v129_v13  ;;  %v6824_v17 = vpop.f32.mrb[7].mxu0 }
  0xe5   :  { %7434 = vmatpush3.bf16.msra.mxu1 %v7850_v16  ;;  %7446 = vmatpush3.bf16.msra.mxu0 %v7850_v16 }
  0xe6   :  { %7435 = vmatprep.subr.bf16.mxu1 %v7722_v6  ;;  %7453 = vmatprep.subr.bf16.mxu0 %v7722_v6  ;;  %v8072_v40 = vpop.f32.mrb[8].mxu0 }
  0xe7   :  { %v6827_v43 = vpop.f32.mrb[9].mxu0 }
  0xe8   :  { %6837 = vmatmul.mubr.msk.f32.vlgmr.msra.gmra.mrb[0].mxu1 %vm152_vm3, %v151_v18  ;;  %6859 = vmatmul.mubr.msk.f32.vlgmr.msra.gmra.mrb[10].mxu0 %vm152_vm3, %v6366_v19 }
  0xe9   :  { %7437 = vmatpush3.bf16.msra.mxu1 %v7844_v11  ;;  %7455 = vmatpush3.bf16.msra.mxu0 %v7844_v11 }
  0xea   :  { %7438 = vmatprep.subr.bf16.mxu1 %v7722_v6  ;;  %7456 = vmatprep.subr.bf16.mxu0 %v7722_v6 }
  0xeb   :  { %6847 = vmatprep.mubr.msk.f32.mxu1 %vm7721_vm2, %v7720_v0  ;;  %6880 = vmatprep.mubr.msk.f32.mxu0 %vm7721_vm2, %v7720_v0 }
  0xed   :  { %7440 = vmatpush3.bf16.msra.mxu1 %v7850_v16  ;;  %7458 = vmatpush3.bf16.msra.mxu0 %v7850_v16 }
  0xee   :  { %7447 = vmatprep.subr.bf16.mxu1 %v7722_v6  ;;  %7465 = vmatprep.subr.bf16.mxu0 %v7722_v6 }
  0xf0   :  { %6848 = vmatmul.mubr.msk.f32.vlgmr.msra.gmra.mrb[2].mxu1 %vm152_vm3, %v6363_v20  ;;  %6881 = vmatmul.mubr.msk.f32.vlgmr.msra.gmra.mrb[12].mxu0 %vm152_vm3, %v6372_v21 }
  0xf1   :  { %7449 = vmatpush3.bf16.msra.mxu1 %v7844_v11  ;;  %7467 = vmatpush3.bf16.msra.mxu0 %v7844_v11 }
  0xf2   :  { %7450 = vmatprep.subr.bf16.mxu1 %v7722_v6  ;;  %7468 = vmatprep.subr.bf16.mxu0 %v7722_v6 }
  0xf3   :  { %6869 = vmatprep.mubr.msk.f32.mxu1 %vm7721_vm2, %v7720_v0  ;;  %6902 = vmatprep.mubr.msk.f32.mxu0 %vm7721_vm2, %v7720_v0 }
  0xf5   :  { %7452 = vmatpush3.bf16.msra.mxu1 %v7850_v16  ;;  %7470 = vmatpush3.bf16.msra.mxu0 %v7850_v16 }
  0xf6   :  { %7459 = vmatprep.subr.bf16.mxu1 %v7722_v6  ;;  %7477 = vmatprep.subr.bf16.mxu0 %v7722_v6 }
  0xf8   :  { %6870 = vmatmul.mubr.msk.f32.vlgmr.msra.gmra.mrb[4].mxu1 %vm152_vm3, %v6369_v22  ;;  %6903 = vmatmul.mubr.msk.f32.vlgmr.msra.gmra.mrb[14].mxu0 %vm152_vm3, %v6378_v23 }
  0xf9   :  { %7461 = vmatpush3.bf16.msra.mxu1 %v7844_v11  ;;  %7479 = vmatpush3.bf16.msra.mxu0 %v7844_v11 }
  0xfa   :  { %7462 = vmatprep.subr.bf16.mxu1 %v7722_v6  ;;  %7480 = vmatprep.subr.bf16.mxu0 %v7722_v6 }
  0xfb   :  { %6891 = vmatprep.mubr.msk.f32.mxu1 %vm7721_vm2, %v7720_v0  ;;  %6924 = vmatprep.mubr.msk.f32.mxu0 %vm7721_vm2, %v7720_v0 }
  0xfd   :  { %7464 = vmatpush3.bf16.msra.mxu1 %v7850_v16  ;;  %7482 = vmatpush3.bf16.msra.mxu0 %v7850_v16 }
  0xfe   :  { %7471 = vmatprep.subr.bf16.mxu1 %v7722_v6  ;;  %7489 = vmatprep.subr.bf16.mxu0 %v7722_v6 }
 0x100   :  { %6892 = vmatmul.mubr.msk.f32.vlgmr.msra.gmra.mrb[6].mxu1 %vm152_vm3, %v6375_v24  ;;  %6925 = vmatmul.mubr.msk.f32.vlgmr.msra.gmra.mrb[16].mxu0 %vm152_vm3, %v6384_v25 }
 0x101   :  { %7473 = vmatpush3.bf16.msra.mxu1 %v7844_v11  ;;  %7491 = vmatpush3.bf16.msra.mxu0 %v7844_v11 }
 0x102   :  { %7474 = vmatprep.subr.bf16.mxu1 %v7722_v6  ;;  %7492 = vmatprep.subr.bf16.mxu0 %v7722_v6 }
 0x103   :  { %6913 = vmatprep.mubr.msk.f32.mxu1 %vm7721_vm2, %v7720_v0  ;;  %6946 = vmatprep.mubr.msk.f32.mxu0 %vm7721_vm2, %v7720_v0 }
 0x105   :  { %7476 = vmatpush3.bf16.msra.mxu1 %v7850_v16  ;;  %7494 = vmatpush3.bf16.msra.mxu0 %v7850_v16 }
 0x106   :  { %7483 = vmatprep.subr.bf16.mxu1 %v7722_v6  ;;  %7501 = vmatprep.subr.bf16.mxu0 %v7722_v6 }
 0x108   :  { %6914 = vmatmul.mubr.msk.f32.vlgmr.msra.gmra.mrb[8].mxu1 %vm152_vm3, %v6381_v26  ;;  %6947 = vmatmul.mubr.msk.f32.vlgmr.msra.gmra.mrb[18].mxu0 %vm152_vm3, %v6390_v27 }
 0x109   :  { %7485 = vmatpush3.bf16.msra.mxu1 %v7844_v11  ;;  %7503 = vmatpush3.bf16.msra.mxu0 %v7844_v11 }
 0x10a   :  { %7486 = vmatprep.subr.bf16.mxu1 %v7722_v6  ;;  %7504 = vmatprep.subr.bf16.mxu0 %v7722_v6 }
 0x10b   :  { %6935 = vmatprep.mubr.msk.f32.mxu1 %vm7721_vm2, %v7720_v0  ;;  %6968 = vmatprep.mubr.msk.f32.mxu0 %vm7721_vm2, %v7720_v0 }
 0x10d   :  { %7488 = vmatpush3.bf16.msra.mxu1 %v7850_v16  ;;  %7506 = vmatpush3.bf16.msra.mxu0 %v7850_v16 }
 0x10e   :  { %7495 = vmatprep.subr.bf16.mxu1 %v7722_v6  ;;  %7513 = vmatprep.subr.bf16.mxu0 %v7722_v6 }
 0x110   :  { %6936 = vmatmul.mubr.msk.f32.vlgmr.msra.gmra.mrb[10].mxu1 %vm152_vm3, %v6387_v28  ;;  %6969 = vmatmul.mubr.msk.f32.vlgmr.msra.gmra.mrb[20].mxu0 %vm152_vm3, %v6396_v29 }
 0x111   :  { %7497 = vmatpush3.bf16.msra.mxu1 %v7844_v11  ;;  %7515 = vmatpush3.bf16.msra.mxu0 %v7844_v11 }
 0x112   :  { %7498 = vmatprep.subr.bf16.mxu1 %v7722_v6  ;;  %7516 = vmatprep.subr.bf16.mxu0 %v7722_v6 }
 0x113   :  { %6957 = vmatprep.mubr.msk.f32.mxu1 %vm7721_vm2, %v7720_v0  ;;  %6990 = vmatprep.mubr.msk.f32.mxu0 %vm7721_vm2, %v7720_v0 }
 0x115   :  { %7500 = vmatpush3.bf16.msra.mxu1 %v7850_v16  ;;  %7518 = vmatpush3.bf16.msra.mxu0 %v7850_v16 }
 0x116   :  { %7507 = vmatprep.subr.bf16.mxu1 %v7722_v6  ;;  %7525 = vmatprep.subr.bf16.mxu0 %v7722_v6 }
 0x118   :  { %6958 = vmatmul.mubr.msk.f32.vlgmr.msra.gmra.mrb[12].mxu1 %vm152_vm3, %v6393_v30  ;;  %6991 = vmatmul.mubr.msk.f32.vlgmr.msra.gmra.mrb[22].mxu0 %vm152_vm3, %v6402_v31 }
 0x119   :  { %7509 = vmatpush3.bf16.msra.mxu1 %v7844_v11  ;;  %7527 = vmatpush3.bf16.msra.mxu0 %v7844_v11 }
 0x11a   :  { %7510 = vmatprep.subr.bf16.mxu1 %v7722_v6  ;;  %7528 = vmatprep.subr.bf16.mxu0 %v7722_v6 }
 0x11b   :  { %6979 = vmatprep.mubr.msk.f32.mxu1 %vm7721_vm2, %v7720_v0  ;;  %7012 = vmatprep.mubr.msk.f32.mxu0 %vm7721_vm2, %v7720_v0 }
 0x11d   :  { %7512 = vmatpush3.bf16.msra.mxu1 %v7850_v16  ;;  %7530 = vmatpush3.bf16.msra.mxu0 %v7850_v16 }
 0x11e   :  { %7519 = vmatprep.subr.bf16.mxu1 %v7722_v6  ;;  %7537 = vmatprep.subr.bf16.mxu0 %v7722_v6 }
 0x120   :  { %6980 = vmatmul.mubr.msk.f32.vlgmr.msra.gmra.mrb[14].mxu1 %vm152_vm3, %v6399_v32  ;;  %7013 = vmatmul.mubr.msk.f32.vlgmr.msra.gmra.mrb[24].mxu0 %vm152_vm3, %v6408_v33 }
 0x121   :  { %7521 = vmatpush3.bf16.msra.mxu1 %v7844_v11  ;;  %7539 = vmatpush3.bf16.msra.mxu0 %v7844_v11 }
 0x122   :  { %7522 = vmatprep.subr.bf16.mxu1 %v7722_v6  ;;  %7540 = vmatprep.subr.bf16.mxu0 %v7722_v6 }
 0x123   :  { %7001 = vmatprep.mubr.msk.f32.mxu1 %vm7721_vm2, %v7720_v0  ;;  %7034 = vmatprep.mubr.msk.f32.mxu0 %vm7721_vm2, %v7720_v0 }
 0x125   :  { %7524 = vmatpush3.bf16.msra.mxu1 %v7850_v16  ;;  %7542 = vmatpush3.bf16.msra.mxu0 %v7850_v16 }
 0x126   :  { %7531 = vmatprep.subr.bf16.mxu1 %v7722_v6  ;;  %7549 = vmatprep.subr.bf16.mxu0 %v7722_v6 }
 0x128   :  { %7002 = vmatmul.mubr.msk.f32.vlgmr.msra.gmra.mrb[16].mxu1 %vm152_vm3, %v6405_v34  ;;  %7035 = vmatmul.mubr.msk.f32.vlgmr.msra.gmra.mrb[26].mxu0 %vm152_vm3, %v6414_v35 }
 0x129   :  { %7533 = vmatpush3.bf16.msra.mxu1 %v7844_v11  ;;  %7551 = vmatpush3.bf16.msra.mxu0 %v7844_v11 }
 0x12a   :  { %7534 = vmatprep.subr.bf16.mxu1 %v7722_v6  ;;  %7552 = vmatprep.subr.bf16.mxu0 %v7722_v6 }
 0x12b   :  { %7023 = vmatprep.mubr.msk.f32.mxu1 %vm7721_vm2, %v7720_v0  ;;  %7056 = vmatprep.mubr.msk.f32.mxu0 %vm7721_vm2, %v7720_v0 }
 0x12d   :  { %7536 = vmatpush3.bf16.msra.mxu1 %v7850_v16  ;;  %7554 = vmatpush3.bf16.msra.mxu0 %v7850_v16 }
 0x12e   :  { %7543 = vmatprep.subr.bf16.mxu1 %v7722_v6  ;;  %7561 = vmatprep.subr.bf16.mxu0 %v7722_v6 }
 0x130   :  { %7024 = vmatmul.mubr.msk.f32.vlgmr.msra.gmra.mrb[18].mxu1 %vm152_vm3, %v6411_v36  ;;  %7057 = vmatmul.mubr.msk.f32.vlgmr.msra.gmra.mrb[28].mxu0 %vm152_vm3, %v6420_v37 }
 0x131   :  { %7545 = vmatpush3.bf16.msra.mxu1 %v7844_v11  ;;  %7563 = vmatpush3.bf16.msra.mxu0 %v7844_v11 }
 0x132   :  { %7546 = vmatprep.subr.bf16.mxu1 %v7722_v6  ;;  %7564 = vmatprep.subr.bf16.mxu0 %v7722_v6 }
 0x133   :  { %7045 = vmatprep.mubr.msk.f32.mxu1 %vm7721_vm2, %v7720_v0  ;;  %7078 = vmatprep.mubr.msk.f32.mxu0 %vm7721_vm2, %v7720_v0 }
 0x135   :  { %7548 = vmatpush3.bf16.msra.mxu1 %v7850_v16  ;;  %7566 = vmatpush3.bf16.msra.mxu0 %v7850_v16 }
 0x136   :  { %7555 = vmatprep.subr.bf16.mxu1 %v7722_v6  ;;  %7573 = vmatprep.subr.bf16.mxu0 %v7722_v6 }
 0x138   :  { %7046 = vmatmul.mubr.msk.f32.vlgmr.msra.gmra.mrb[20].mxu1 %vm152_vm3, %v6417_v38  ;;  %7079 = vmatmul.mubr.msk.f32.vlgmr.msra.gmra.mrb[30].mxu0 %vm152_vm3, %v6425_v39 }
 0x139   :  { %7557 = vmatpush3.bf16.msra.mxu1 %v7844_v11  ;;  %7575 = vmatpush3.bf16.msra.mxu0 %v7844_v11 }
 0x13a   :  { %7558 = vmatprep.subr.bf16.mxu1 %v7722_v6  ;;  %7576 = vmatprep.subr.bf16.mxu0 %v7722_v6 }
 0x13b   :  { %7067 = vmatprep.mubr.msk.f32.mxu1 %vm7721_vm2, %v7720_v0  ;;  %7100 = vmatprep.mubr.msk.f32.mxu0 %vm7721_vm2, %v7720_v0 }
 0x13d   :  { %7560 = vmatpush3.bf16.msra.mxu1 %v7850_v16  ;;  %7578 = vmatpush3.bf16.msra.mxu0 %v7850_v16 }
 0x13e   :  { %7567 = vmatprep.subr.bf16.mxu1 %v7722_v6  ;;  %7585 = vmatprep.subr.bf16.mxu0 %v7722_v6 }
 0x140   :  { %7068 = vmatmul.mubr.msk.f32.vlgmr.msra.gmra.mrb[22].mxu1 %vm152_vm3, %v6422_v41  ;;  %7101 = vmatmul.mubr.msk.f32.vlgmr.msra.gmra.mrb[32].mxu0 %vm152_vm3, %v6431_v42 }
 0x141   :  { %7569 = vmatpush3.bf16.msra.mxu1 %v7844_v11  ;;  %7587 = vmatpush3.bf16.msra.mxu0 %v7844_v11 }
 0x142   :  { %7570 = vmatprep.subr.bf16.mxu1 %v7722_v6  ;;  %7588 = vmatprep.subr.bf16.mxu0 %v7722_v6 }
 0x143   :  { %7089 = vmatprep.mubr.msk.f32.mxu1 %vm7721_vm2, %v7720_v0  ;;  %7122 = vmatprep.mubr.msk.f32.mxu0 %vm7721_vm2, %v7720_v0 }
 0x145   :  { %7572 = vmatpush3.bf16.msra.mxu1 %v7850_v16  ;;  %7590 = vmatpush3.bf16.msra.mxu0 %v7850_v16 }
 0x146   :  { %7579 = vmatprep.subr.bf16.mxu1 %v7722_v6  ;;  %7597 = vmatprep.subr.bf16.mxu0 %v7722_v6 }
 0x148   :  { %7090 = vmatmul.mubr.msk.f32.vlgmr.msra.gmra.mrb[24].mxu1 %vm152_vm3, %v6428_v44  ;;  %7123 = vmatmul.mubr.msk.f32.vlgmr.msra.gmra.mrb[34].mxu0 %vm152_vm3, %v6437_v45 }
 0x149   :  { %7581 = vmatpush3.bf16.msra.mxu1 %v7844_v11  ;;  %7599 = vmatpush3.bf16.msra.mxu0 %v7844_v11 }
 0x14a   :  { %7582 = vmatprep.subr.bf16.mxu1 %v7722_v6  ;;  %7600 = vmatprep.subr.bf16.mxu0 %v7722_v6 }
 0x14b   :  { %7111 = vmatprep.mubr.msk.f32.mxu1 %vm7721_vm2, %v7720_v0  ;;  %7144 = vmatprep.mubr.msk.f32.mxu0 %vm7721_vm2, %v7720_v0 }
 0x14d   :  { %7584 = vmatpush3.bf16.msra.mxu1 %v7850_v16  ;;  %7602 = vmatpush3.bf16.msra.mxu0 %v7850_v16 }
 0x14e   :  { %7591 = vmatprep.subr.bf16.mxu1 %v7722_v6  ;;  %7609 = vmatprep.subr.bf16.mxu0 %v7722_v6 }
 0x150   :  { %7112 = vmatmul.mubr.msk.f32.vlgmr.msra.gmra.mrb[26].mxu1 %vm152_vm3, %v6434_v46  ;;  %7145 = vmatmul.mubr.msk.f32.vlgmr.msra.gmra.mrb[36].mxu0 %vm152_vm3, %v6443_v47 }
 0x151   :  { %7593 = vmatpush3.bf16.msra.mxu1 %v7844_v11  ;;  %7611 = vmatpush3.bf16.msra.mxu0 %v7844_v11 }
 0x152   :  { %7594 = vmatprep.subr.bf16.mxu1 %v7722_v6  ;;  %7612 = vmatprep.subr.bf16.mxu0 %v7722_v6 }
 0x153   :  { %7133 = vmatprep.mubr.msk.f32.mxu1 %vm7721_vm2, %v7720_v0  ;;  %7166 = vmatprep.mubr.msk.f32.mxu0 %vm7721_vm2, %v7720_v0 }
 0x155   :  { %7596 = vmatpush3.bf16.msra.mxu1 %v7850_v16  ;;  %7614 = vmatpush3.bf16.msra.mxu0 %v7850_v16 }
 0x156   :  { %7603 = vmatprep.subr.bf16.mxu1 %v7722_v6  ;;  %7621 = vmatprep.subr.bf16.mxu0 %v7722_v6 }
 0x158   :  { %7134 = vmatmul.mubr.msk.f32.vlgmr.msra.gmra.mrb[28].mxu1 %vm152_vm3, %v6440_v48  ;;  %7167 = vmatmul.mubr.msk.f32.vlgmr.msra.gmra.mrb[38].mxu0 %vm152_vm3, %v6449_v49 }
 0x159   :  { %7605 = vmatpush3.bf16.msra.mxu1 %v7844_v11  ;;  %7623 = vmatpush3.bf16.msra.mxu0 %v7844_v11 }
 0x15a   :  { %7606 = vmatprep.subr.bf16.mxu1 %v7722_v6  ;;  %7624 = vmatprep.subr.bf16.mxu0 %v7722_v6 }
 0x15b   :  { %7155 = vmatprep.mubr.msk.f32.mxu1 %vm7721_vm2, %v7720_v0  ;;  %7188 = vmatprep.mubr.msk.f32.mxu0 %vm7721_vm2, %v7720_v0 }
 0x15d   :  { %7608 = vmatpush3.bf16.msra.mxu1 %v7850_v16  ;;  %7626 = vmatpush3.bf16.msra.mxu0 %v7850_v16 }
 0x15e   :  { %7615 = vmatprep.subr.bf16.mxu1 %v7722_v6  ;;  %7633 = vmatprep.subr.bf16.mxu0 %v7722_v6 }
 0x160   :  { %7156 = vmatmul.mubr.msk.f32.vlgmr.msra.gmra.mrb[30].mxu1 %vm152_vm3, %v6446_v50  ;;  %7189 = vmatmul.mubr.msk.f32.vlgmr.msra.gmra.mrb[40].mxu0 %vm152_vm3, %v6455_v51 }
 0x161   :  { %7617 = vmatpush3.bf16.msra.mxu1 %v7844_v11  ;;  %7635 = vmatpush3.bf16.msra.mxu0 %v7844_v11 }
 0x162   :  { %7618 = vmatprep.subr.bf16.mxu1 %v7722_v6  ;;  %7636 = vmatprep.subr.bf16.mxu0 %v7722_v6 }
 0x163   :  { %7177 = vmatprep.mubr.msk.f32.mxu1 %vm7721_vm2, %v7720_v0  ;;  %7210 = vmatprep.mubr.msk.f32.mxu0 %vm7721_vm2, %v7720_v0 }
 0x165   :  { %7620 = vmatpush3.bf16.msra.mxu1 %v7850_v16  ;;  %7638 = vmatpush3.bf16.msra.mxu0 %v7850_v16 }
 0x166   :  { %7627 = vmatprep.subr.bf16.mxu1 %v7722_v6  ;;  %7645 = vmatprep.subr.bf16.mxu0 %v7722_v6 }
 0x168   :  { %7178 = vmatmul.mubr.msk.f32.vlgmr.msra.gmra.mrb[32].mxu1 %vm152_vm3, %v6452_v52  ;;  %7211 = vmatmul.mubr.msk.f32.vlgmr.msra.gmra.mrb[42].mxu0 %vm152_vm3, %v6461_v53 }
 0x169   :  { %7629 = vmatpush3.bf16.msra.mxu1 %v7844_v11  ;;  %7647 = vmatpush3.bf16.msra.mxu0 %v7844_v11 }
 0x16a   :  { %7630 = vmatprep.subr.bf16.mxu1 %v7722_v6  ;;  %7648 = vmatprep.subr.bf16.mxu0 %v7722_v6 }
 0x16b   :  { %7199 = vmatprep.mubr.msk.f32.mxu1 %vm7721_vm2, %v7720_v0  ;;  %7232 = vmatprep.mubr.msk.f32.mxu0 %vm7721_vm2, %v7720_v0 }
 0x16d   :  { %7632 = vmatpush3.bf16.msra.mxu1 %v7850_v16  ;;  %7650 = vmatpush3.bf16.msra.mxu0 %v7850_v16 }
 0x16e   :  { %7639 = vmatprep.subr.bf16.mxu1 %v7722_v6  ;;  %7657 = vmatprep.subr.bf16.mxu0 %v7722_v6 }
 0x170   :  { %7200 = vmatmul.mubr.msk.f32.vlgmr.msra.gmra.mrb[34].mxu1 %vm152_vm3, %v6458_v54  ;;  %7233 = vmatmul.mubr.msk.f32.vlgmr.msra.gmra.mrb[44].mxu0 %vm152_vm3, %v6467_v55 }
 0x171   :  { %7641 = vmatpush3.bf16.msra.mxu1 %v7844_v11  ;;  %7659 = vmatpush3.bf16.msra.mxu0 %v7844_v11 }
 0x172   :  { %7642 = vmatprep.subr.bf16.mxu1 %v7722_v6  ;;  %7660 = vmatprep.subr.bf16.mxu0 %v7722_v6 }
 0x173   :  { %7221 = vmatprep.mubr.msk.f32.mxu1 %vm7721_vm2, %v7720_v0  ;;  %7254 = vmatprep.mubr.msk.f32.mxu0 %vm7721_vm2, %v7720_v0 }
 0x175   :  { %7644 = vmatpush3.bf16.msra.mxu1 %v7850_v16  ;;  %7662 = vmatpush3.bf16.msra.mxu0 %v7850_v16 }
 0x176   :  { %7651 = vmatprep.subr.bf16.mxu1 %v7722_v6  ;;  %7669 = vmatprep.subr.bf16.mxu0 %v7722_v6 }
 0x178   :  { %7222 = vmatmul.mubr.msk.f32.vlgmr.msra.gmra.mrb[36].mxu1 %vm152_vm3, %v6464_v56  ;;  %7255 = vmatmul.mubr.msk.f32.vlgmr.msra.gmra.mrb[46].mxu0 %vm152_vm3, %v6473_v57 }
 0x179   :  { %7653 = vmatpush3.bf16.msra.mxu1 %v7844_v11  ;;  %7671 = vmatpush3.bf16.msra.mxu0 %v7844_v11 }
 0x17a   :  { %7654 = vmatprep.subr.bf16.mxu1 %v7722_v6  ;;  %7672 = vmatprep.subr.bf16.mxu0 %v7722_v6 }
 0x17b   :  { %7243 = vmatprep.mubr.msk.f32.mxu1 %vm7721_vm2, %v7720_v0  ;;  %7276 = vmatprep.mubr.msk.f32.mxu0 %vm7721_vm2, %v7720_v0 }
 0x17d   :  { %7656 = vmatpush3.bf16.msra.mxu1 %v7850_v16  ;;  %7674 = vmatpush3.bf16.msra.mxu0 %v7850_v16 }
 0x17e   :  { %7663 = vmatprep.subr.bf16.mxu1 %v7722_v6  ;;  %7289 = vmatprep.subr.mxu0 %v7720_v0 }
 0x180   :  { %7244 = vmatmul.mubr.msk.f32.vlgmr.msra.gmra.mrb[38].mxu1 %vm152_vm3, %v6470_v58  ;;  %7277 = vmatmul.mubr.msk.f32.vlgmr.msra.gmra.mrb[48].mxu0 %vm152_vm3, %v6479_v59 }
 0x181   :  { %7665 = vmatpush3.bf16.msra.mxu1 %v7844_v11  ;;  %7265 = vmatprep.mubr.msk.f32.mxu1 %vm7721_vm2, %v7720_v0 }
 0x182   :  { %7666 = vmatprep.subr.bf16.mxu1 %v7722_v6  ;;  %7291 = vmatprep.mubr.msk.f32.mxu0 %vm7721_vm2, %v7720_v0 }
 0x185   :  { %7668 = vmatpush3.bf16.msra.mxu1 %v7850_v16 }
 0x186   :  { %7279 = vmatprep.subr.mxu1 %v7720_v0 }
 0x188   :  { %7266 = vmatmul.mubr.msk.f32.vlgmr.msra.gmra.mrb[40].mxu1 %vm152_vm3, %v6476_v60 }
 0x189   :  { %7281 = vmatprep.mubr.msk.f32.mxu1 %vm7721_vm2, %v7720_v0 }
 0x1bb   :  { %v222_v61 = vpop.f32.mrb[0].mxu1  ;;  %v405_v62 = vpop.f32.mrb[10].mxu0 }
 0x1bc   :  { %v6838_v63 = vpop.f32.mrb[1].mxu1  ;;  %227 = vrot.lane.b32.xlu0 %v222_v61, %s7723_s18  ;;  %410 = vrot.lane.b32.xlu1 %v405_v62, %s7724_s19  ;;  %v6860_v1 = vpop.f32.mrb[11].mxu0  ;;  %s7749_s18 = smov 120   ;;  %s7750_s19 = smov 121  }
 0x1c3   :  { %v313_v2 = vpop.f32.mrb[2].mxu1  ;;  %v589_v3 = vpop.f32.mrb[12].mxu0 }
 0x1c4   :  { %318 = vrot.lane.b32.xlu0 %v313_v2, %s7725_s20  ;;  %v6849_v4 = vpop.f32.mrb[3].mxu1  ;;  %v6882_v5 = vpop.f32.mrb[13].mxu0  ;;  %s7751_s20 = smov 118  }
 0x1c8   :  { %594 = vrot.lane.b32.xlu0 %v589_v3, %s7726_s4  ;;  %s7752_s4 = smov 119  }
 0x1cb   :  { %v497_v6 = vpop.f32.mrb[4].mxu1  ;;  %v773_v7 = vpop.f32.mrb[14].mxu0 }
 0x1cc   :  { %v6871_v8 = vpop.f32.mrb[5].mxu1  ;;  %502 = vrot.lane.b32.xlu1 %v497_v6, %s7727_s21  ;;  %778 = vrot.lane.b32.xlu0 %v773_v7, %s7728_s22  ;;  %v6904_v9 = vpop.f32.mrb[15].mxu0  ;;  %s7753_s21 = smov 116   ;;  %s7754_s22 = smov 117  }
 0x1d3   :  { %v681_v10 = vpop.f32.mrb[6].mxu1  ;;  %v957_v11 = vpop.f32.mrb[16].mxu0 }
 0x1d4   :  { %v6893_v12 = vpop.f32.mrb[7].mxu1  ;;  %686 = vrot.lane.b32.xlu1 %v681_v10, %s7729_s23  ;;  %962 = vrot.lane.b32.xlu0 %v957_v11, %s7730_s24  ;;  %v6926_v13 = vpop.f32.mrb[17].mxu0  ;;  %s7755_s23 = smov 114   ;;  %s7756_s24 = smov 115  }
 0x1d5   :  { %v236_v12 = vlaneseq  ;;  %v8284_v13 = vld [vmem:[%s8808_s1] sm:$0x1]  ;;  %s7762_s1 = smov 109  }
 0x1d6   :  { %vm323_vm4 = vcmp.ge.s32.totalorder %v8284_v13, 19  ;;  %vm232_vm5 = vcmp.ge.s32.totalorder %v8284_v13, 20  ;;  %vm415_vm7 = vcmp.ge.s32.totalorder %v8284_v13, 18  ;;  %vm507_vm9 = vcmp.ge.s32.totalorder %v8284_v13, 17 }
 0x1d7   :  { %vm599_vm12 = vcmp.ge.s32.totalorder %v8284_v13, 16  ;;  %vm691_vm13 = vcmp.ge.s32.totalorder %v8284_v13, 15  ;;  %vm783_vm0 = vcmp.ge.s32.totalorder %v8284_v13, 14  ;;  %vm875_vm3 = vcmp.ge.s32.totalorder %v8284_v13, 13 }
 0x1db   :  { %v865_v14 = vpop.f32.mrb[8].mxu1  ;;  %v1141_v15 = vpop.f32.mrb[18].mxu0 }
 0x1dc   :  { %v6915_v16 = vpop.f32.mrb[9].mxu1  ;;  %870 = vrot.lane.b32.xlu1 %v865_v14, %s7731_s25  ;;  %1146 = vrot.lane.b32.xlu0 %v1141_v15, %s7732_s26  ;;  %v6948_v17 = vpop.f32.mrb[19].mxu0  ;;  %s7757_s25 = smov 112   ;;  %s7758_s26 = smov 113   ;;  %v237_v14 = vshrl.u32 %v236_v12, 7 }
 0x1e3   :  { %v1049_v18 = vpop.f32.mrb[10].mxu1  ;;  %v1325_v19 = vpop.f32.mrb[20].mxu0 }
 0x1e4   :  { %v6937_v20 = vpop.f32.mrb[11].mxu1  ;;  %1054 = vrot.lane.b32.xlu1 %v1049_v18, %s7733_s27  ;;  %1330 = vrot.lane.b32.xlu0 %v1325_v19, %s7734_s28  ;;  %v6970_v21 = vpop.f32.mrb[21].mxu0  ;;  %s7759_s27 = smov 110  }
 0x1e5   :  { %v6365_v20 = vsel %vm323_vm4, 1.0, %v7720_v0  ;;  %v8289_v21 = vsub.s32 0, %v237_v14  ;;  %vm781_vm4 = vcmask 113664  }
 0x1eb   :  { %v1233_v22 = vpop.f32.mrb[12].mxu1  ;;  %v1509_v23 = vpop.f32.mrb[22].mxu0 }
 0x1ec   :  { %v6959_v24 = vpop.f32.mrb[13].mxu1  ;;  %1238 = vrot.lane.b32.xlu1 %v1233_v22, %s7735_s29  ;;  %1514 = vrot.lane.b32.xlu0 %v1509_v23, %s7736_s0  ;;  %v6992_v25 = vpop.f32.mrb[23].mxu0  ;;  %v6362_v23 = vsel %vm232_vm5, 1.0, %v7720_v0  ;;  %vm873_vm5 = vcmask 105472  }
 0x1ed   :  { %v330_v24 = vrot.slane %v6365_v20, %v8289_v21 }
 0x1f3   :  { %v1417_v26 = vpop.f32.mrb[14].mxu1  ;;  %v1693_v27 = vpop.f32.mrb[24].mxu0 }
 0x1f4   :  { %v6981_v28 = vpop.f32.mrb[15].mxu1  ;;  %1422 = vrot.lane.b32.xlu1 %v1417_v26, %s7737_s30  ;;  %1698 = vrot.lane.b32.xlu0 %v1693_v27, %s7738_s8  ;;  %v7014_v29 = vpop.f32.mrb[25].mxu0  ;;  %v6368_v27 = vsel %vm415_vm7, 1.0, %v7720_v0  ;;  %vm1059_vm7 = vcmp.ge.s32.totalorder %v8284_v13, 11 }
 0x1f5   :  { %v239_v28 = vrot.slane %v6362_v23, %v8289_v21 }
 0x1fb   :  { %v1601_v30 = vpop.f32.mrb[16].mxu1  ;;  %v1876_v31 = vpop.f32.mrb[26].mxu0 }
 0x1fc   :  { %v7003_v32 = vpop.f32.mrb[17].mxu1  ;;  %1606 = vrot.lane.b32.xlu1 %v1601_v30, %s7739_s9  ;;  %1881 = vrot.lane.b32.xlu0 %v1876_v31, %s7740_s10  ;;  %v7036_v33 = vpop.f32.mrb[27].mxu0  ;;  %v6371_v30 = vsel %vm507_vm9, 1.0, %v7720_v0  ;;  %vm1057_vm9 = vcmask 89088  }
 0x1fd   :  { %v422_v33 = vrot.slane %v6368_v27, %v8289_v21 }
 0x203   :  { %v1784_v34 = vpop.f32.mrb[18].mxu1  ;;  %v8267_v35 = vpop.f32.mrb[28].mxu0 }
 0x204   :  { %v7025_v36 = vpop.f32.mrb[19].mxu1  ;;  %1789 = vrot.lane.b32.xlu1 %v1784_v34, %s7741_s11  ;;  %v7058_v37 = vpop.f32.mrb[29].mxu0 }
 0x20b   :  { %v1968_v38 = vpop.f32.mrb[20].mxu1  ;;  %v2228_v39 = vpop.f32.mrb[30].mxu0 }
 0x20c   :  { %v7047_v41 = vpop.f32.mrb[21].mxu1  ;;  %1973 = vrot.lane.b32.xlu1 %v1968_v38, %s7742_s2  ;;  %v7080_v42 = vpop.f32.mrb[31].mxu0 }
 0x20d   :  { %v6374_v42 = vsel %vm599_vm12, 1.0, %v7720_v0  ;;  %vm1149_vm12 = vcmask 80896  }
 0x210   :  { %2233 = vrot.lane.b32.xlu1 %v2228_v39, %s7743_s12  ;;  %v514_v39 = vrot.slane %v6371_v30, %v8289_v21 }
 0x213   :  { %v2136_v43 = vpop.f32.mrb[22].mxu1  ;;  %v2412_v44 = vpop.f32.mrb[32].mxu0 }
 0x214   :  { %v7069_v45 = vpop.f32.mrb[23].mxu1  ;;  %2141 = vrot.lane.b32.xlu0 %v2136_v43, %s7744_s13  ;;  %2417 = vrot.lane.b32.xlu1 %v2412_v44, %s7745_s14  ;;  %v7102_v46 = vpop.f32.mrb[33].mxu0 }
 0x215   :  { %v6377_v46 = vsel %vm691_vm13, 1.0, %v7720_v0  ;;  %vm1241_vm13 = vcmask 72704  }
 0x21b   :  { %v2320_v47 = vpop.f32.mrb[24].mxu1  ;;  %v2596_v48 = vpop.f32.mrb[34].mxu0 }
 0x21c   :  { %v7091_v49 = vpop.f32.mrb[25].mxu1  ;;  %2325 = vrot.lane.b32.xlu0 %v2320_v47, %s7746_s15  ;;  %2601 = vrot.lane.b32.xlu1 %v2596_v48, %s7747_s16  ;;  %v7124_v50 = vpop.f32.mrb[35].mxu0  ;;  %v606_v48 = vrot.slane %v6374_v42, %v8289_v21 }
 0x223   :  { %v2504_v51 = vpop.f32.mrb[26].mxu1  ;;  %v2780_v52 = vpop.f32.mrb[36].mxu0 }
 0x224   :  { %v7113_v53 = vpop.f32.mrb[27].mxu1  ;;  %2509 = vrot.lane.b32.xlu0 %v2504_v51, %s7748_s17  ;;  %2785 = vrot.lane.b32.xlu1 %v2780_v52, %s7749_s18  ;;  %v7146_v54 = vpop.f32.mrb[37].mxu0  ;;  %v698_v52 = vrot.slane %v6377_v46, %v8289_v21 }
 0x225   :  { %v6380_v54 = vsel %vm783_vm0, 1.0, %v7720_v0  ;;  %vm1333_vm0 = vcmask 64512  }
 0x22b   :  { %v2688_v55 = vpop.f32.mrb[28].mxu1  ;;  %v2964_v56 = vpop.f32.mrb[38].mxu0 }
 0x22c   :  { %v7135_v57 = vpop.f32.mrb[29].mxu1  ;;  %2693 = vrot.lane.b32.xlu0 %v2688_v55, %s7750_s19  ;;  %2969 = vrot.lane.b32.xlu1 %v2964_v56, %s7751_s20  ;;  %v7168_v58 = vpop.f32.mrb[39].mxu0 }
 0x22d   :  { %v6383_v58 = vsel %vm875_vm3, 1.0, %v7720_v0  ;;  %vm1425_vm3 = vcmask 56320  }
 0x22e   :  { %v228_v15 = vpop.permute.xlu0 %227  ;;  %v411_v25 = vpop.permute.xlu1 %410 }
 0x22f   :  { %v231_v29 = vsel %vm230_vm8, 0.0, %v228_v15  ;;  %v414_v37 = vsel %vm413_vm10, 0.0, %v411_v25  ;;  %vm965_vm8 = vcmask 97280   ;;  %vm1151_vm10 = vcmp.ge.s32.totalorder %v8284_v13, 10 }
 0x230   :  { %v241_v38 = vmul.f32 %v239_v28, %v231_v29  ;;  %v424_v44 = vmul.f32 %v422_v33, %v414_v37 }
 0x233   :  { %v2872_v59 = vpop.f32.mrb[30].mxu1  ;;  %v3148_v60 = vpop.f32.mrb[40].mxu0 }
 0x234   :  { %v7157_v61 = vpop.f32.mrb[31].mxu1  ;;  %2877 = vrot.lane.b32.xlu0 %v2872_v59, %s7752_s4  ;;  %3153 = vrot.lane.b32.xlu1 %v3148_v60, %s7753_s21  ;;  %v7190_v62 = vpop.f32.mrb[41].mxu0  ;;  %v790_v60 = vrot.slane %v6380_v54, %v8289_v21 }
 0x236   :  { %v319_v22 = vpop.permute.xlu0 %318 }
 0x237   :  { %v322_v26 = vsel %vm321_vm6, 0.0, %v319_v22  ;;  %vm967_vm6 = vcmp.ge.s32.totalorder %v8284_v13, 12 }
 0x238   :  { %v332_v32 = vmul.f32 %v330_v24, %v322_v26 }
 0x23a   :  { %v333_v43 = vadd.f32 %v332_v32, %v241_v38  ;;  %v595_v45 = vpop.permute.xlu0 %594 }
 0x23b   :  { %v3056_v63 = vpop.f32.mrb[32].mxu1  ;;  %v3332_v1 = vpop.f32.mrb[42].mxu0  ;;  %v598_v50 = vsel %vm597_vm14, 0.0, %v595_v45  ;;  %vm1335_vm14 = vcmp.ge.s32.totalorder %v8284_v13, 8 }
 0x23c   :  { %v7179_v2 = vpop.f32.mrb[33].mxu1  ;;  %3061 = vrot.lane.b32.xlu0 %v3056_v63, %s7754_s22  ;;  %3337 = vrot.lane.b32.xlu1 %v3332_v1, %s7755_s23  ;;  %v7212_v3 = vpop.f32.mrb[43].mxu0  ;;  %s7760_s23 = smov 111   ;;  %v425_v51 = vadd.f32 %v424_v44, %v333_v43  ;;  %v608_v56 = vmul.f32 %v606_v48, %v598_v50  ;;  %v882_v1 = vrot.slane %v6383_v58, %v8289_v21  ;;  %v6398_v29 = vsel %vm1335_vm14, 1.0, %v7720_v0 }
 0x23d   :  { %v6386_v3 = vsel %vm967_vm6, 1.0, %v7720_v0  ;;  %vm1517_vm6 = vcmask 48128   ;;  %vm8823_vm14 = vcmask 15360  }
 0x23e   :  { %v503_v34 = vpop.permute.xlu1 %502  ;;  %v779_v57 = vpop.permute.xlu0 %778 }
 0x23f   :  { %v506_v41 = vsel %vm505_vm11, 0.0, %v503_v34  ;;  %v782_v62 = vsel %vm781_vm4, 0.0, %v779_v57  ;;  %vm1243_vm11 = vcmp.ge.s32.totalorder %v8284_v13, 9  ;;  %vm1519_vm4 = vcmp.ge.s32.totalorder %v8284_v13, 6 }
 0x240   :  { %v516_v47 = vmul.f32 %v514_v39, %v506_v41  ;;  %v6395_v20 = vsel %vm1243_vm11, 1.0, %v7720_v0  ;;  %v6404_v43 = vsel %vm1519_vm4, 1.0, %v7720_v0  ;;  %vm1886_vm11 = vcmp.ge.s32.totalorder %v8284_v13, 2 }
 0x241   :  { %v8325_v27 = vrot.slane %v6395_v20, %v8289_v21  ;;  %vm2146_vm4 = vcmp.lt.s32.totalorder %v8284_v13, 63 }
 0x242   :  { %v517_v55 = vadd.f32 %v516_v47, %v425_v51 }
 0x243   :  { %v3240_v4 = vpop.f32.mrb[34].mxu1  ;;  %v3516_v5 = vpop.f32.mrb[44].mxu0 }
 0x244   :  { %v7201_v6 = vpop.f32.mrb[35].mxu1  ;;  %3245 = vrot.lane.b32.xlu0 %v3240_v4, %s7756_s24  ;;  %3521 = vrot.lane.b32.xlu1 %v3516_v5, %s7757_s25  ;;  %v7234_v7 = vpop.f32.mrb[45].mxu0  ;;  %s7761_s24 = smov 108   ;;  %v609_v63 = vadd.f32 %v608_v56, %v517_v55  ;;  %v792_v5 = vmul.f32 %v790_v60, %v782_v62 }
 0x245   :  { %v6389_v7 = vsel %vm1059_vm7, 1.0, %v7720_v0  ;;  %vm1609_vm7 = vcmask 39936  }
 0x246   :  { %v687_v49 = vpop.permute.xlu1 %686  ;;  %v963_v6 = vpop.permute.xlu0 %962  ;;  %v1066_v14 = vrot.slane %v6389_v7, %v8289_v21 }
 0x247   :  { %v690_v53 = vsel %vm689_vm15, 0.0, %v687_v49  ;;  %vm1427_vm15 = vcmp.ge.s32.totalorder %v8284_v13, 7  ;;  %v8347_v49 = vrot.slane %v6404_v43, %v8289_v21 }
 0x248   :  { %v700_v59 = vmul.f32 %v698_v52, %v690_v53  ;;  %v6401_v33 = vsel %vm1427_vm15, 1.0, %v7720_v0  ;;  %vm1976_vm15 = vcmask 7168  }
 0x249   :  { %v8338_v41 = vrot.slane %v6401_v33, %v8289_v21 }
 0x24a   :  { %v701_v4 = vadd.f32 %v700_v59, %v609_v63 }
 0x24b   :  { %v3424_v8 = vpop.f32.mrb[36].mxu1  ;;  %v3700_v9 = vpop.f32.mrb[46].mxu0 }
 0x24c   :  { %v7223_v10 = vpop.f32.mrb[37].mxu1  ;;  %3429 = vrot.lane.b32.xlu0 %v3424_v8, %s7758_s26  ;;  %3705 = vrot.lane.b32.xlu1 %v3700_v9, %s7759_s27  ;;  %v7256_v11 = vpop.f32.mrb[47].mxu0  ;;  %v974_v9 = vrot.slane %v6386_v3, %v8289_v21  ;;  %v793_v12 = vadd.f32 %v792_v5, %v701_v4  ;;  %v6416_v4 = vsel %vm1886_vm11, 1.0, %v7720_v0  ;;  %vm8813_vm11 = vcmask 1031168  }
 0x24d   :  { %v966_v11 = vsel %vm965_vm8, 0.0, %v963_v6  ;;  %vm1702_vm8 = vcmp.ge.s32.totalorder %v8284_v13, 4 }
 0x24e   :  { %v871_v61 = vpop.permute.xlu1 %870  ;;  %v6410_v55 = vsel %vm1702_vm8, 1.0, %v7720_v0  ;;  %vm2238_vm8 = vcmp.lt.s32.totalorder %v8284_v13, 62 }
 0x24f   :  { %v874_v2 = vsel %vm873_vm5, 0.0, %v871_v61  ;;  %vm1611_vm5 = vcmp.ge.s32.totalorder %v8284_v13, 5  ;;  %v8361_v61 = vrot.slane %v6410_v55, %v8289_v21 }
 0x250   :  { %v884_v8 = vmul.f32 %v882_v1, %v874_v2  ;;  %v6407_v47 = vsel %vm1611_vm5, 1.0, %v7720_v0  ;;  %vm8814_vm5 = vcmask 1039360  }
 0x251   :  { %v8352_v53 = vrot.slane %v6407_v47, %v8289_v21 }
 0x253   :  { %v3608_v16 = vpop.f32.mrb[38].mxu1  ;;  %v3884_v17 = vpop.f32.mrb[48].mxu0 }
 0x254   :  { %v7245_v18 = vpop.f32.mrb[39].mxu1  ;;  %3613 = vrot.lane.b32.xlu0 %v3608_v16, %s7760_s23  ;;  %v7278_v19 = vpop.f32.mrb[49].mxu0  ;;  %3889 = vrot.lane.b32.xlu1 %v3884_v17, %s7761_s24  ;;  %v6392_v16 = vsel %vm1151_vm10, 1.0, %v7720_v0  ;;  %v885_v17 = vadd.f32 %v884_v8, %v793_v12  ;;  %vm1792_vm10 = vcmask 23552  }
 0x255   :  { %v976_v18 = vmul.f32 %v974_v9, %v966_v11  ;;  %v1147_v19 = vpop.permute.xlu0 %1146  ;;  %v1158_v23 = vrot.slane %v6392_v16, %v8289_v21 }
 0x256   :  { %v1055_v10 = vpop.permute.xlu1 %1054  ;;  %v1150_v25 = vsel %vm1149_vm12, 0.0, %v1147_v19  ;;  %vm1978_vm12 = vcmp.ge.s32.totalorder %v8284_v13, 1  ;;  %v6424_v19 = vsel %vm2146_vm4, 1.0, %v7720_v0  ;;  %vm2422_vm4 = vcmp.lt.s32.totalorder %v8284_v13, 60 }
 0x257   :  { %v1058_v15 = vsel %vm1057_vm9, 0.0, %v1055_v10  ;;  %v977_v26 = vadd.f32 %v976_v18, %v885_v17  ;;  %vm1794_vm9 = vcmp.ge.s32.totalorder %v8284_v13, 3  ;;  %v6419_v8 = vsel %vm1978_vm12, 1.0, %v7720_v0 }
 0x258   :  { %v1068_v22 = vmul.f32 %v1066_v14, %v1058_v15  ;;  %v6413_v59 = vsel %vm1794_vm9, 1.0, %v7720_v0  ;;  %v8375_v10 = vrot.slane %v6416_v4, %v8289_v21  ;;  %v8379_v15 = vrot.slane %v6419_v8, %v8289_v21 }
 0x259   :  { %v1331_v32 = vpop.permute.xlu0 %1330  ;;  %v8366_v2 = vrot.slane %v6413_v59, %v8289_v21  ;;  %vm2330_vm9 = vcmp.lt.s32.totalorder %v8284_v13, 61  ;;  %vm8816_vm12 = vcmask 1022976  }
 0x25a   :  { %v1069_v30 = vadd.f32 %v1068_v22, %v977_v26  ;;  %v1334_v38 = vsel %vm1333_vm0, 0.0, %v1331_v32  ;;  %v6427_v26 = vsel %vm2238_vm8, 1.0, %v7720_v0  ;;  %vm2514_vm8 = vcmp.lt.s32.totalorder %v8284_v13, 59 }
 0x25b   :  { %v3792_v31 = vpop.f32.mrb[40].mxu1  ;;  %v8396_v32 = vrot.slane %v6427_v26, %v8289_v21 }
 0x25c   :  { %v7267_v36 = vpop.f32.mrb[41].mxu1  ;;  %3797 = vrot.lane.b32.xlu0 %v3792_v31, %s7762_s1  ;;  %v1160_v31 = vmul.f32 %v1158_v23, %v1150_v25 }
 0x25d   :  { %v8333_v36 = vrot.slane %v6398_v29, %v8289_v21 }
 0x25e   :  { %v1239_v24 = vpop.permute.xlu1 %1238  ;;  %v1161_v39 = vadd.f32 %v1160_v31, %v1069_v30  ;;  %v1515_v46 = vpop.permute.xlu0 %1514  ;;  %v6430_v30 = vsel %vm2330_vm9, 1.0, %v7720_v0  ;;  %vm8815_vm9 = vcmask 1014784  }
 0x25f   :  { %v1242_v28 = vsel %vm1241_vm13, 0.0, %v1239_v24  ;;  %v1344_v45 = vmul.f32 %v8333_v36, %v1334_v38  ;;  %v1518_v51 = vsel %vm1517_vm6, 0.0, %v1515_v46  ;;  %v8388_v24 = vrot.slane %v6424_v19, %v8289_v21 }
 0x260   :  { %v1252_v34 = vmul.f32 %v8325_v27, %v1242_v28  ;;  %v1528_v57 = vmul.f32 %v8347_v49, %v1518_v51  ;;  %v8402_v38 = vrot.slane %v6430_v30, %v8289_v21  ;;  %v6436_v46 = vsel %vm2514_vm8, 1.0, %v7720_v0 }
 0x261   :  { %vm8817_vm8 = vcmask 998400  }
 0x262   :  { %v1253_v44 = vadd.f32 %v1252_v34, %v1161_v39 }
 0x264   :  { %v1345_v52 = vadd.f32 %v1344_v45, %v1253_v44 }
 0x266   :  { %v1423_v37 = vpop.permute.xlu1 %1422  ;;  %v1699_v58 = vpop.permute.xlu0 %1698 }
 0x267   :  { %v1426_v42 = vsel %vm1425_vm3, 0.0, %v1423_v37  ;;  %v1701_v63 = vsel %vm33_vm1, 0.0, %v1699_v58 }
 0x268   :  { %v1436_v48 = vmul.f32 %v8338_v41, %v1426_v42  ;;  %v1711_v6 = vmul.f32 %v8361_v61, %v1701_v63  ;;  %v6433_v42 = vsel %vm2422_vm4, 1.0, %v7720_v0  ;;  %vm2698_vm4 = vcmp.lt.s32.totalorder %v8284_v13, 57 }
 0x269   :  { %v6442_v59 = vsel %vm2698_vm4, 1.0, %v7720_v0  ;;  %vm8819_vm4 = vcmask 982016  }
 0x26a   :  { %v1437_v56 = vadd.f32 %v1436_v48, %v1345_v52  ;;  %v8416_v52 = vrot.slane %v6436_v46, %v8289_v21  ;;  %v8430_v4 = vrot.slane %v6442_v59, %v8289_v21 }
 0x26c   :  { %v1529_v1 = vadd.f32 %v1528_v57, %v1437_v56 }
 0x26e   :  { %v1607_v50 = vpop.permute.xlu1 %1606  ;;  %v1882_v7 = vpop.permute.xlu0 %1881 }
 0x26f   :  { %v1610_v54 = vsel %vm1609_vm7, 0.0, %v1607_v50  ;;  %v1885_v12 = vsel %vm8823_vm14, 0.0, %v1882_v7  ;;  %vm3708_vm14 = vcmask 900096  }
 0x270   :  { %v1620_v60 = vmul.f32 %v8352_v53, %v1610_v54  ;;  %v1895_v18 = vmul.f32 %v8375_v10, %v1885_v12 }
 0x272   :  { %v1621_v5 = vadd.f32 %v1620_v60, %v1529_v1 }
 0x274   :  { %v1712_v14 = vadd.f32 %v1711_v6, %v1621_v5 }
 0x276   :  { %v1790_v62 = vpop.permute.xlu1 %1789 }
 0x277   :  { %v1793_v3 = vsel %vm1792_vm10, 0.0, %v1790_v62 }
 0x278   :  { %v1803_v9 = vmul.f32 %v8366_v2, %v1793_v3 }
 0x27a   :  { %v1804_v17 = vadd.f32 %v1803_v9, %v1712_v14 }
 0x27c   :  { %v1896_v23 = vadd.f32 %v1895_v18, %v1804_v17 }
 0x27e   :  { %v1974_v11 = vpop.permute.xlu1 %1973 }
 0x27f   :  { %v1977_v16 = vsel %vm1976_vm15, 0.0, %v1974_v11 }
 0x280   :  { %v1987_v20 = vmul.f32 %v8379_v15, %v1977_v16 }
 0x282   :  { %v1988_v28 = vadd.f32 %v1987_v20, %v1896_v23  ;;  %v2234_v29 = vpop.permute.xlu1 %2233 }
 0x283   :  { %v2237_v34 = vsel %vm8813_vm11, %v2234_v29, 0.0  ;;  %vm8818_vm11 = vcmask 1006592  }
 0x284   :  { %v2064_v37 = vadd.f32 %v8267_v35, %v1988_v28  ;;  %v2247_v44 = vmul.f32 %v8396_v32, %v2237_v34  ;;  %v8411_v35 = vrot.slane %v6433_v42, %v8289_v21 }
 0x286   :  { %v2142_v22 = vpop.permute.xlu0 %2141  ;;  %v2418_v45 = vpop.permute.xlu1 %2417 }
 0x287   :  { %v2145_v25 = vsel %vm8814_vm5, %v2142_v22, 0.0  ;;  %vm2606_vm5 = vcmp.lt.s32.totalorder %v8284_v13, 58  ;;  %v2421_v50 = vsel %vm8815_vm9, %v2418_v45, 0.0  ;;  %vm8820_vm9 = vcmask 990208  }
 0x288   :  { %v2155_v31 = vmul.f32 %v8388_v24, %v2145_v25  ;;  %v6439_v55 = vsel %vm2606_vm5, 1.0, %v7720_v0  ;;  %v2431_v57 = vmul.f32 %v8411_v35, %v2421_v50  ;;  %vm2882_vm5 = vcmp.lt.s32.totalorder %v8284_v13, 55 }
 0x289   :  { %v8425_v62 = vrot.slane %v6439_v55, %v8289_v21  ;;  %v6448_v11 = vsel %vm2882_vm5, 1.0, %v7720_v0  ;;  %vm8822_vm5 = vcmask 965632  }
 0x28a   :  { %v2156_v43 = vadd.f32 %v2155_v31, %v2064_v37  ;;  %v8444_v19 = vrot.slane %v6448_v11, %v8289_v21 }
 0x28c   :  { %v2248_v51 = vadd.f32 %v2247_v44, %v2156_v43 }
 0x28e   :  { %v2326_v33 = vpop.permute.xlu0 %2325  ;;  %v2602_v58 = vpop.permute.xlu1 %2601 }
 0x28f   :  { %v2329_v39 = vsel %vm8816_vm12, %v2326_v33, 0.0  ;;  %vm2790_vm12 = vcmp.lt.s32.totalorder %v8284_v13, 56  ;;  %v2605_v1 = vsel %vm8817_vm8, %v2602_v58, 0.0  ;;  %vm8821_vm8 = vcmask 973824  }
 0x290   :  { %v2339_v47 = vmul.f32 %v8402_v38, %v2329_v39  ;;  %v6445_v6 = vsel %vm2790_vm12, 1.0, %v7720_v0  ;;  %v2615_v8 = vmul.f32 %v8425_v62, %v2605_v1  ;;  %vm3066_vm12 = vcmp.lt.s32.totalorder %v8284_v13, 53 }
 0x291   :  { %v8439_v14 = vrot.slane %v6445_v6, %v8289_v21  ;;  %v6454_v28 = vsel %vm3066_vm12, 1.0, %v7720_v0  ;;  %vm3156_vm12 = vcmask 949248  }
 0x292   :  { %v2340_v56 = vadd.f32 %v2339_v47, %v2248_v51  ;;  %v3073_v37 = vrot.slane %v6454_v28, %v8289_v21 }
 0x294   :  { %v2432_v3 = vadd.f32 %v2431_v57, %v2340_v56 }
 0x296   :  { %v2510_v48 = vpop.permute.xlu0 %2509  ;;  %v2786_v9 = vpop.permute.xlu1 %2785 }
 0x297   :  { %v2513_v54 = vsel %vm8818_vm11, %v2510_v48, 0.0  ;;  %vm2974_vm11 = vcmp.lt.s32.totalorder %v8284_v13, 54  ;;  %v2789_v17 = vsel %vm8819_vm4, %v2786_v9, 0.0  ;;  %vm3064_vm4 = vcmask 957440  }
 0x298   :  { %v2523_v60 = vmul.f32 %v8416_v52, %v2513_v54  ;;  %v6451_v22 = vsel %vm2974_vm11, 1.0, %v7720_v0  ;;  %v2799_v25 = vmul.f32 %v8439_v14, %v2789_v17  ;;  %vm3250_vm11 = vcmp.lt.s32.totalorder %v8284_v13, 51 }
 0x299   :  { %v8453_v30 = vrot.slane %v6451_v22, %v8289_v21  ;;  %v6460_v46 = vsel %vm3250_vm11, 1.0, %v7720_v0  ;;  %vm3432_vm11 = vcmask 924672  }
 0x29a   :  { %v2524_v7 = vadd.f32 %v2523_v60, %v2432_v3  ;;  %v3257_v55 = vrot.slane %v6460_v46, %v8289_v21 }
 0x29c   :  { %v2616_v18 = vadd.f32 %v2615_v8, %v2524_v7 }
 0x29e   :  { %v2694_v63 = vpop.permute.xlu0 %2693  ;;  %v2970_v26 = vpop.permute.xlu1 %2969 }
 0x29f   :  { %v2697_v5 = vsel %vm8820_vm9, %v2694_v63, 0.0  ;;  %vm3158_vm9 = vcmp.lt.s32.totalorder %v8284_v13, 52  ;;  %v2973_v33 = vsel %vm8822_vm5, %v2970_v26, 0.0  ;;  %vm3342_vm5 = vcmp.lt.s32.totalorder %v8284_v13, 50 }
 0x2a0   :  { %v2707_v12 = vmul.f32 %v8430_v4, %v2697_v5  ;;  %v6457_v42 = vsel %vm3158_vm9, 1.0, %v7720_v0  ;;  %v2983_v44 = vmul.f32 %v8453_v30, %v2973_v33  ;;  %vm3434_vm9 = vcmp.lt.s32.totalorder %v8284_v13, 49 }
 0x2a1   :  { %v3165_v48 = vrot.slane %v6457_v42, %v8289_v21  ;;  %v6463_v57 = vsel %vm3342_vm5, 1.0, %v7720_v0  ;;  %v6466_v63 = vsel %vm3434_vm9, 1.0, %v7720_v0  ;;  %vm3524_vm5 = vcmask 916480  }
 0x2a2   :  { %v2708_v23 = vadd.f32 %v2707_v12, %v2616_v18  ;;  %v3349_v3 = vrot.slane %v6463_v57, %v8289_v21  ;;  %v3441_v7 = vrot.slane %v6466_v63, %v8289_v21  ;;  %vm3710_vm9 = vcmp.lt.s32.totalorder %v8284_v13, 46 }
 0x2a3   :  { %v6475_v28 = vsel %vm3710_vm9, 1.0, %v7720_v0  ;;  %vm8829_vm9 = vcmask 1006592  }
 0x2a4   :  { %v2800_v34 = vadd.f32 %v2799_v25, %v2708_v23  ;;  %v3717_v42 = vrot.slane %v6475_v28, %v8289_v21  ;;  %v6515_v28 = vld [vmem:[%s8809_s5 + $0x88] sm:$0xff] }
 0x2a6   :  { %v2878_v16 = vpop.permute.xlu0 %2877  ;;  %v3154_v45 = vpop.permute.xlu1 %3153 }
 0x2a7   :  { %v2881_v20 = vsel %vm8821_vm8, %v2878_v16, 0.0  ;;  %vm3248_vm8 = vcmask 941056   ;;  %v3157_v51 = vsel %vm3156_vm12, %v3154_v45, 0.0  ;;  %vm3526_vm12 = vcmp.lt.s32.totalorder %v8284_v13, 48 }
 0x2a8   :  { %v2891_v29 = vmul.f32 %v8444_v19, %v2881_v20  ;;  %v3167_v59 = vmul.f32 %v3165_v48, %v3157_v51  ;;  %v6469_v11 = vsel %vm3526_vm12, 1.0, %v7720_v0  ;;  %vm3894_vm12 = vcmp.lt.s32.totalorder %v8284_v13, 44 }
 0x2a9   :  { %v3533_v22 = vrot.slane %v6469_v11, %v8289_v21  ;;  %v6481_v45 = vsel %vm3894_vm12, 1.0, %v7720_v0  ;;  %v6495_v11 = vld [vmem:[%s8809_s5 + $0x38] sm:$0xff]  ;;  %vm8832_vm12 = vcmask 982016  }
 0x2aa   :  { %v2892_v43 = vadd.f32 %v2891_v29, %v2800_v34 }
 0x2ac   :  { %v2984_v54 = vadd.f32 %v2983_v44, %v2892_v43 }
 0x2ae   :  { %v3062_v31 = vpop.permute.xlu0 %3061  ;;  %v3338_v60 = vpop.permute.xlu1 %3337 }
 0x2af   :  { %v3065_v39 = vsel %vm3064_vm4, %v3062_v31, 0.0  ;;  %vm3340_vm4 = vcmask 932864  }
 0x2b0   :  { %v3075_v47 = vmul.f32 %v3073_v37, %v3065_v39  ;;  %v3341_v5 = vsel %vm3340_vm4, %v3338_v60, 0.0  ;;  %vm3616_vm4 = vcmask 908288  }
 0x2b1   :  { %v3351_v16 = vmul.f32 %v3349_v3, %v3341_v5  ;;  %v6485_v3 = vld [vmem:[%s8809_s5 + $0x10] sm:$0xff]  ;;  %v6489_v5 = vld [vmem:[%s8809_s5 + $0x20] sm:$0xff] }
 0x2b2   :  { %v3076_v58 = vadd.f32 %v3075_v47, %v2984_v54  ;;  %v3901_v54 = vrot.slane %v6481_v45, %v8289_v21 }
 0x2b4   :  { %v3168_v6 = vadd.f32 %v3167_v59, %v3076_v58 }
 0x2b6   :  { %v3246_v50 = vpop.permute.xlu0 %3245  ;;  %v3522_v17 = vpop.permute.xlu1 %3521 }
 0x2b7   :  { %v3249_v56 = vsel %vm3248_vm8, %v3246_v50, 0.0  ;;  %vm3618_vm8 = vcmp.lt.s32.totalorder %v8284_v13, 47  ;;  %v3525_v23 = vsel %vm3524_vm5, %v3522_v17, 0.0  ;;  %vm3800_vm5 = vcmask 891904   ;;  %v6505_v17 = vld [vmem:[%s8809_s5 + $0x60] sm:$0xff] }
 0x2b8   :  { %v3259_v1 = vmul.f32 %v3257_v55, %v3249_v56  ;;  %v6472_v18 = vsel %vm3618_vm8, 1.0, %v7720_v0  ;;  %v3535_v31 = vmul.f32 %v3533_v22, %v3525_v23  ;;  %vm3892_vm8 = vcmask 883712   ;;  %v6507_v22 = vld [vmem:[%s8809_s5 + $0x68] sm:$0xff]  ;;  %v6513_v23 = vld [vmem:[%s8809_s5 + $0x80] sm:$0xff] }
 0x2b9   :  { %v3625_v26 = vrot.slane %v6472_v18, %v8289_v21  ;;  %v6503_v18 = vld [vmem:[%s8809_s5 + $0x58] sm:$0xff] }
 0x2ba   :  { %v3260_v12 = vadd.f32 %v3259_v1, %v3168_v6  ;;  %v3905_v1 = vld [vmem:[%s8809_s5] sm:$0xff]  ;;  %v6487_v6 = vld [vmem:[%s8809_s5 + $0x18] sm:$0xff] }
 0x2bc   :  { %v3352_v25 = vadd.f32 %v3351_v16, %v3260_v12  ;;  %v6501_v12 = vld [vmem:[%s8809_s5 + $0x50] sm:$0xff]  ;;  %v6499_v16 = vld [vmem:[%s8809_s5 + $0x48] sm:$0xff] }
 0x2be   :  { %v3430_v8 = vpop.permute.xlu0 %3429  ;;  %v3706_v34 = vpop.permute.xlu1 %3705 }
 0x2bf   :  { %v3433_v9 = vsel %vm3432_vm11, %v3430_v8, 0.0  ;;  %vm3802_vm11 = vcmp.lt.s32.totalorder %v8284_v13, 45  ;;  %v3709_v43 = vsel %vm3708_vm14, %v3706_v34, 0.0  ;;  %v6491_v8 = vld [vmem:[%s8809_s5 + $0x28] sm:$0xff]  ;;  %vm8828_vm14 = vcmask 1014784  }
 0x2c0   :  { %v3443_v20 = vmul.f32 %v3441_v7, %v3433_v9  ;;  %v6478_v44 = vsel %vm3802_vm11, 1.0, %v7720_v0  ;;  %v3719_v50 = vmul.f32 %v3717_v42, %v3709_v43  ;;  %v6493_v7 = vld [vmem:[%s8809_s5 + $0x30] sm:$0xff]  ;;  %v6497_v9 = vld [vmem:[%s8809_s5 + $0x40] sm:$0xff]  ;;  %vm8831_vm11 = vcmask 990208  }
 0x2c1   :  { %v3809_v51 = vrot.slane %v6478_v44, %v8289_v21  ;;  %v6483_v21 = vld [vmem:[%s8809_s5 + $0x8] sm:$0xff] }
 0x2c2   :  { %v3444_v29 = vadd.f32 %v3443_v20, %v3352_v25  ;;  %v6509_v20 = vld [vmem:[%s8809_s5 + $0x70] sm:$0xff]  ;;  %v6511_v25 = vld [vmem:[%s8809_s5 + $0x78] sm:$0xff] }
 0x2c4   :  { %v3536_v46 = vadd.f32 %v3535_v31, %v3444_v29  ;;  %v6519_v29 = vld [vmem:[%s8809_s5 + $0x98] sm:$0xff] }
 0x2c6   :  { %v3614_v33 = vpop.permute.xlu0 %3613  ;;  %v3890_v47 = vpop.permute.xlu1 %3889 }
 0x2c7   :  { %v3617_v37 = vsel %vm3616_vm4, %v3614_v33, 0.0  ;;  %v3893_v13 = vsel %vm3892_vm8, %v3890_v47, 0.0  ;;  %vm8830_vm4 = vcmask 998400   ;;  %vm8833_vm8 = vcmask 973824  }
 0x2c8   :  { %v3627_v39 = vmul.f32 %v3625_v26, %v3617_v37  ;;  %v3903_v59 = vmul.f32 %v3901_v54, %v3893_v13  ;;  %v6517_v26 = vld [vmem:[%s8809_s5 + $0x90] sm:$0xff] }
 0x2ca   :  { %v3628_v48 = vadd.f32 %v3627_v39, %v3536_v46 }
 0x2cc   :  { %v3720_v57 = vadd.f32 %v3719_v50, %v3628_v48 }
 0x2ce   :  { %v3798_v55 = vpop.permute.xlu0 %3797 }
 0x2cf   :  { %v3801_v56 = vsel %vm3800_vm5, %v3798_v55, 0.0  ;;  %vm8834_vm5 = vcmask 965632  }
 0x2d0   :  { %v3811_v58 = vmul.f32 %v3809_v51, %v3801_v56 }
 0x2d2   :  { %v3812_v60 = vadd.f32 %v3811_v58, %v3720_v57 }
 0x2d4   :  { %v8485_v63 = vadd.f32 %v3903_v59, %v3812_v60 }
 0x2d6   :  { %7280 = vmatpush3.msra.mxu1 %v8485_v63  ;;  %7290 = vmatpush3.msra.mxu0 %v8485_v63 }
 0x2d7   :  { %7282 = vmatmul.mubr.msk.f32.vlgmr.msra.gmra.mrb[42].mxu1 %vm1333_vm0, %v3905_v1  ;;  %7284 = vmatprep.subr.mxu1 %v7720_v0 }
 0x2d8   :  { %7292 = vmatmul.mubr.msk.f32.vlgmr.msra.gmra.mrb[50].mxu0 %vm1333_vm0, %v6485_v3  ;;  %7299 = vmatprep.subr.mxu0 %v7720_v0 }
 0x2d9   :  { %7285 = vmatpush3.msra.mxu1 %v8485_v63  ;;  %7300 = vmatpush3.msra.mxu0 %v8485_v63 }
 0x2da   :  { %7286 = vmatprep.mubr.msk.f32.mxu1 %vm7721_vm2, %v7720_v0  ;;  %7294 = vmatprep.subr.mxu1 %v7720_v0 }
 0x2db   :  { %7301 = vmatprep.mubr.msk.f32.mxu0 %vm7721_vm2, %v7720_v0  ;;  %7309 = vmatprep.subr.mxu0 %v7720_v0 }
 0x2dc   :  { %7287 = vmatmul.mubr.msk.f32.vlgmr.msra.gmra.mrb[44].mxu1 %vm1333_vm0, %v6483_v21  ;;  %7302 = vmatmul.mubr.msk.f32.vlgmr.msra.gmra.mrb[52].mxu0 %vm1333_vm0, %v6489_v5 }
 0x2dd   :  { %7295 = vmatpush3.msra.mxu1 %v8485_v63  ;;  %7310 = vmatpush3.msra.mxu0 %v8485_v63 }
 0x2de   :  { %7296 = vmatprep.mubr.msk.f32.mxu1 %vm7721_vm2, %v7720_v0  ;;  %7304 = vmatprep.subr.mxu1 %v7720_v0 }
 0x2df   :  { %7311 = vmatprep.mubr.msk.f32.mxu0 %vm7721_vm2, %v7720_v0  ;;  %7319 = vmatprep.subr.mxu0 %v7720_v0 }
 0x2e0   :  { %7297 = vmatmul.mubr.msk.f32.vlgmr.msra.gmra.mrb[46].mxu1 %vm1333_vm0, %v6487_v6  ;;  %7312 = vmatmul.mubr.msk.f32.vlgmr.msra.gmra.mrb[54].mxu0 %vm1333_vm0, %v6493_v7 }
 0x2e1   :  { %7305 = vmatpush3.msra.mxu1 %v8485_v63  ;;  %7320 = vmatpush3.msra.mxu0 %v8485_v63 }
 0x2e2   :  { %7306 = vmatprep.mubr.msk.f32.mxu1 %vm7721_vm2, %v7720_v0  ;;  %7314 = vmatprep.subr.mxu1 %v7720_v0 }
 0x2e3   :  { %7321 = vmatprep.mubr.msk.f32.mxu0 %vm7721_vm2, %v7720_v0  ;;  %7329 = vmatprep.subr.mxu0 %v7720_v0 }
 0x2e4   :  { %7307 = vmatmul.mubr.msk.f32.vlgmr.msra.gmra.mrb[48].mxu1 %vm1333_vm0, %v6491_v8  ;;  %7322 = vmatmul.mubr.msk.f32.vlgmr.msra.gmra.mrb[56].mxu0 %vm1333_vm0, %v6497_v9 }
 0x2e5   :  { %7315 = vmatpush3.msra.mxu1 %v8485_v63  ;;  %7330 = vmatpush3.msra.mxu0 %v8485_v63 }
 0x2e6   :  { %7316 = vmatprep.mubr.msk.f32.mxu1 %vm7721_vm2, %v7720_v0  ;;  %7324 = vmatprep.subr.mxu1 %v7720_v0 }
 0x2e7   :  { %7331 = vmatprep.mubr.msk.f32.mxu0 %vm7721_vm2, %v7720_v0  ;;  %7339 = vmatprep.subr.mxu0 %v7720_v0 }
 0x2e8   :  { %7317 = vmatmul.mubr.msk.f32.vlgmr.msra.gmra.mrb[50].mxu1 %vm1333_vm0, %v6495_v11  ;;  %7332 = vmatmul.mubr.msk.f32.vlgmr.msra.gmra.mrb[58].mxu0 %vm1333_vm0, %v6501_v12 }
 0x2e9   :  { %7325 = vmatpush3.msra.mxu1 %v8485_v63  ;;  %7340 = vmatpush3.msra.mxu0 %v8485_v63 }
 0x2ea   :  { %7326 = vmatprep.mubr.msk.f32.mxu1 %vm7721_vm2, %v7720_v0  ;;  %7334 = vmatprep.subr.mxu1 %v7720_v0 }
 0x2eb   :  { %7341 = vmatprep.mubr.msk.f32.mxu0 %vm7721_vm2, %v7720_v0  ;;  %7349 = vmatprep.subr.mxu0 %v7720_v0 }
 0x2ec   :  { %7327 = vmatmul.mubr.msk.f32.vlgmr.msra.gmra.mrb[52].mxu1 %vm1333_vm0, %v6499_v16  ;;  %7342 = vmatmul.mubr.msk.f32.vlgmr.msra.gmra.mrb[60].mxu0 %vm1333_vm0, %v6505_v17 }
 0x2ed   :  { %7335 = vmatpush3.msra.mxu1 %v8485_v63  ;;  %7350 = vmatpush3.msra.mxu0 %v8485_v63 }
 0x2ee   :  { %7336 = vmatprep.mubr.msk.f32.mxu1 %vm7721_vm2, %v7720_v0  ;;  %7344 = vmatprep.subr.mxu1 %v7720_v0 }
 0x2ef   :  { %7351 = vmatprep.mubr.msk.f32.mxu0 %vm7721_vm2, %v7720_v0  ;;  %7359 = vmatprep.subr.mxu0 %v7720_v0 }
 0x2f0   :  { %7337 = vmatmul.mubr.msk.f32.vlgmr.msra.gmra.mrb[54].mxu1 %vm1333_vm0, %v6503_v18  ;;  %7352 = vmatmul.mubr.msk.f32.vlgmr.msra.gmra.mrb[62].mxu0 %vm1333_vm0, %v6509_v20 }
 0x2f1   :  { %7345 = vmatpush3.msra.mxu1 %v8485_v63  ;;  %7360 = vmatpush3.msra.mxu0 %v8485_v63 }
 0x2f2   :  { %7346 = vmatprep.mubr.msk.f32.mxu1 %vm7721_vm2, %v7720_v0  ;;  %7354 = vmatprep.subr.mxu1 %v7720_v0 }
 0x2f3   :  { %7361 = vmatprep.mubr.msk.f32.mxu0 %vm7721_vm2, %v7720_v0  ;;  %7369 = vmatprep.subr.mxu0 %v7720_v0 }
 0x2f4   :  { %7347 = vmatmul.mubr.msk.f32.vlgmr.msra.gmra.mrb[56].mxu1 %vm1333_vm0, %v6507_v22  ;;  %7362 = vmatmul.mubr.msk.f32.vlgmr.msra.gmra.mrb[64].mxu0 %vm1333_vm0, %v6513_v23 }
 0x2f5   :  { %7355 = vmatpush3.msra.mxu1 %v8485_v63  ;;  %7370 = vmatpush3.msra.mxu0 %v8485_v63 }
 0x2f6   :  { %7356 = vmatprep.mubr.msk.f32.mxu1 %vm7721_vm2, %v7720_v0  ;;  %7364 = vmatprep.subr.mxu1 %v7720_v0 }
 0x2f7   :  { %7371 = vmatprep.mubr.msk.f32.mxu0 %vm7721_vm2, %v7720_v0  ;;  %7379 = vmatprep.subr.mxu0 %v7720_v0 }
 0x2f8   :  { %7357 = vmatmul.mubr.msk.f32.vlgmr.msra.gmra.mrb[58].mxu1 %vm1333_vm0, %v6511_v25  ;;  %7372 = vmatmul.mubr.msk.f32.vlgmr.msra.gmra.mrb[66].mxu0 %vm1333_vm0, %v6517_v26 }
 0x2f9   :  { %7365 = vmatpush3.msra.mxu1 %v8485_v63  ;;  %7366 = vmatprep.mubr.msk.f32.mxu1 %vm7721_vm2, %v7720_v0 }
 0x2fa   :  { %7374 = vmatprep.subr.mxu1 %v7720_v0  ;;  %7381 = vmatprep.mubr.msk.f32.mxu0 %vm7721_vm2, %v7720_v0 }
 0x2fc   :  { %7367 = vmatmul.mubr.msk.f32.vlgmr.msra.gmra.mrb[60].mxu1 %vm1333_vm0, %v6515_v28 }
 0x2fd   :  { %7375 = vmatpush3.msra.mxu1 %v8485_v63  ;;  %7376 = vmatprep.mubr.msk.f32.mxu1 %vm7721_vm2, %v7720_v0 }
 0x2fe   :  { %7384 = vmatprep.subr.mxu1 %v7720_v0 }
 0x300   :  { %7377 = vmatmul.mubr.msk.f32.vlgmr.msra.gmra.mrb[62].mxu1 %vm1333_vm0, %v6519_v29 }
 0x301   :  { %7386 = vmatprep.mubr.msk.f32.mxu1 %vm7721_vm2, %v7720_v0 }
 0x3aa   :  { %v3975_v31 = vpop.f32.mrb[42].mxu1 }
 0x3ab   :  { %3980 = vrot.lane.b32.xlu0 %v3975_v31, %s7735_s29  ;;  %v7283_v33 = vpop.f32.mrb[43].mxu1  ;;  %v4138_v34 = vpop.f32.mrb[50].mxu0 }
 0x3ac   :  { %v7293_v37 = vpop.f32.mrb[51].mxu0 }
 0x3af   :  { %v4056_v39 = vpop.f32.mrb[44].mxu1  ;;  %4143 = vrot.lane.b32.xlu0 %v4138_v34, %s7737_s30  ;;  %v4302_v42 = vpop.f32.mrb[52].mxu0 }
 0x3b0   :  { %4061 = vrot.lane.b32.xlu1 %v4056_v39, %s7734_s28  ;;  %v7288_v43 = vpop.f32.mrb[45].mxu1  ;;  %v7303_v44 = vpop.f32.mrb[53].mxu0 }
 0x3b3   :  { %v4220_v45 = vpop.f32.mrb[46].mxu1  ;;  %4307 = vrot.lane.b32.xlu0 %v4302_v42, %s7739_s9  ;;  %v4466_v46 = vpop.f32.mrb[54].mxu0 }
 0x3b4   :  { %4225 = vrot.lane.b32.xlu1 %v4220_v45, %s7736_s0  ;;  %v7298_v47 = vpop.f32.mrb[47].mxu1  ;;  %v7313_v48 = vpop.f32.mrb[55].mxu0 }
 0x3b7   :  { %v4384_v50 = vpop.f32.mrb[48].mxu1  ;;  %4471 = vrot.lane.b32.xlu0 %v4466_v46, %s7741_s11  ;;  %v4630_v51 = vpop.f32.mrb[56].mxu0 }
 0x3b8   :  { %4389 = vrot.lane.b32.xlu1 %v4384_v50, %s7738_s8  ;;  %v7308_v54 = vpop.f32.mrb[49].mxu1  ;;  %v7323_v13 = vpop.f32.mrb[57].mxu0 }
 0x3bb   :  { %v4548_v55 = vpop.f32.mrb[50].mxu1  ;;  %4635 = vrot.lane.b32.xlu0 %v4630_v51, %s7742_s2  ;;  %v4788_v56 = vpop.f32.mrb[58].mxu0 }
 0x3bc   :  { %4553 = vrot.lane.b32.xlu1 %v4548_v55, %s7740_s10  ;;  %v7318_v57 = vpop.f32.mrb[51].mxu1  ;;  %v7333_v58 = vpop.f32.mrb[59].mxu0 }
 0x3bf   :  { %v8656_v59 = vpop.f32.mrb[52].mxu1  ;;  %v4952_v60 = vpop.f32.mrb[60].mxu0 }
 0x3c0   :  { %v7328_v63 = vpop.f32.mrb[53].mxu1  ;;  %4793 = vrot.lane.b32.xlu1 %v4788_v56, %s7744_s13  ;;  %v7343_v1 = vpop.f32.mrb[61].mxu0 }
 0x3c3   :  { %v4870_v3 = vpop.f32.mrb[54].mxu1  ;;  %v5116_v21 = vpop.f32.mrb[62].mxu0 }
 0x3c4   :  { %v7338_v5 = vpop.f32.mrb[55].mxu1  ;;  %4875 = vrot.lane.b32.xlu0 %v4870_v3, %s7743_s12  ;;  %4957 = vrot.lane.b32.xlu1 %v4952_v60, %s7746_s15  ;;  %v7353_v6 = vpop.f32.mrb[63].mxu0 }
 0x3c7   :  { %v5034_v7 = vpop.f32.mrb[56].mxu1  ;;  %v5280_v8 = vpop.f32.mrb[64].mxu0 }
 0x3c8   :  { %v7348_v9 = vpop.f32.mrb[57].mxu1  ;;  %5039 = vrot.lane.b32.xlu0 %v5034_v7, %s7745_s14  ;;  %5121 = vrot.lane.b32.xlu1 %v5116_v21, %s7748_s17  ;;  %v7363_v11 = vpop.f32.mrb[65].mxu0 }
 0x3cb   :  { %v5198_v12 = vpop.f32.mrb[58].mxu1  ;;  %v5444_v16 = vpop.f32.mrb[66].mxu0 }
 0x3cc   :  { %v7358_v17 = vpop.f32.mrb[59].mxu1  ;;  %5203 = vrot.lane.b32.xlu0 %v5198_v12, %s7747_s16  ;;  %5285 = vrot.lane.b32.xlu1 %v5280_v8, %s7750_s19  ;;  %v7373_v18 = vpop.f32.mrb[67].mxu0 }
 0x3cf   :  { %v5362_v20 = vpop.f32.mrb[60].mxu1 }
 0x3d0   :  { %v7368_v22 = vpop.f32.mrb[61].mxu1  ;;  %5367 = vrot.lane.b32.xlu0 %v5362_v20, %s7749_s18  ;;  %5449 = vrot.lane.b32.xlu1 %v5444_v16, %s7752_s4 }
 0x3d3   :  { %v5526_v23 = vpop.f32.mrb[62].mxu1 }
 0x3d4   :  { %v7378_v25 = vpop.f32.mrb[63].mxu1  ;;  %5531 = vrot.lane.b32.xlu0 %v5526_v23, %s7751_s20 }
 0x41d   :  { %v3981_v26 = vpop.permute.xlu0 %3980 }
 0x41e   :  { %v3983_v28 = vsel %vm1241_vm13, 0.0, %v3981_v26  ;;  %vm8824_vm13 = vcmask 15360  }
 0x41f   :  { %v3984_v37 = vmul.f32 %v3983_v28, %v8325_v27 }
 0x421   :  { %v4144_v29 = vpop.permute.xlu0 %4143 }
 0x422   :  { %v4062_v31 = vpop.permute.xlu1 %4061  ;;  %v4146_v33 = vsel %vm1425_vm3, 0.0, %v4144_v29  ;;  %vm8825_vm3 = vcmask 1039360  }
 0x423   :  { %v4064_v34 = vsel %vm1333_vm0, 0.0, %v4062_v31  ;;  %v4147_v42 = vmul.f32 %v4146_v33, %v8338_v41 }
 0x424   :  { %v4065_v39 = vmul.f32 %v4064_v34, %v8333_v36 }
 0x425   :  { %v4308_v43 = vpop.permute.xlu0 %4307 }
 0x426   :  { %v4066_v44 = vadd.f32 %v4065_v39, %v3984_v37  ;;  %v4226_v45 = vpop.permute.xlu1 %4225  ;;  %v4310_v46 = vsel %vm1609_vm7, 0.0, %v4308_v43  ;;  %vm8827_vm7 = vcmask 1022976  }
 0x427   :  { %v4228_v47 = vsel %vm1517_vm6, 0.0, %v4226_v45  ;;  %v4311_v51 = vmul.f32 %v4310_v46, %v8352_v53  ;;  %vm8826_vm6 = vcmask 1031168  }
 0x428   :  { %v4148_v48 = vadd.f32 %v4147_v42, %v4066_v44  ;;  %v4229_v50 = vmul.f32 %v4228_v47, %v8347_v49 }
 0x429   :  { %v4472_v54 = vpop.permute.xlu0 %4471 }
 0x42a   :  { %v4230_v13 = vadd.f32 %v4229_v50, %v4148_v48  ;;  %v4390_v55 = vpop.permute.xlu1 %4389  ;;  %v4474_v27 = vsel %vm1792_vm10, 0.0, %v4472_v54 }
 0x42b   :  { %v4392_v36 = vsel %vm33_vm1, 0.0, %v4390_v55  ;;  %v4475_v57 = vmul.f32 %v4474_v27, %v8366_v2 }
 0x42c   :  { %v4312_v41 = vadd.f32 %v4311_v51, %v4230_v13  ;;  %v4393_v56 = vmul.f32 %v4392_v36, %v8361_v61 }
 0x42d   :  { %v4636_v58 = vpop.permute.xlu0 %4635 }
 0x42e   :  { %v4394_v60 = vadd.f32 %v4393_v56, %v4312_v41  ;;  %v4554_v63 = vpop.permute.xlu1 %4553  ;;  %v4638_v1 = vsel %vm1976_vm15, 0.0, %v4636_v58 }
 0x42f   :  { %v4556_v49 = vsel %vm8824_vm13, 0.0, %v4554_v63  ;;  %v4639_v21 = vmul.f32 %v4638_v1, %v8379_v15  ;;  %v6522_v63 = vld [vmem:[%s8810_s6 + $0x8] sm:$0xff] }
 0x430   :  { %v4476_v53 = vadd.f32 %v4475_v57, %v4394_v60  ;;  %v4557_v3 = vmul.f32 %v4556_v49, %v8375_v10  ;;  %v5537_v60 = vld [vmem:[%s8810_s6] sm:$0xff]  ;;  %v6530_v1 = vld [vmem:[%s8810_s6 + $0x28] sm:$0xff]  ;;  %v6532_v49 = vld [vmem:[%s8810_s6 + $0x30] sm:$0xff] }
 0x432   :  { %v4558_v5 = vadd.f32 %v4557_v3, %v4476_v53  ;;  %v4794_v6 = vpop.permute.xlu1 %4793  ;;  %v6534_v53 = vld [vmem:[%s8810_s6 + $0x38] sm:$0xff]  ;;  %v6536_v3 = vld [vmem:[%s8810_s6 + $0x40] sm:$0xff] }
 0x433   :  { %v4796_v7 = vsel %vm8825_vm3, %v4794_v6, 0.0 }
 0x434   :  { %v4640_v8 = vadd.f32 %v4639_v21, %v4558_v5  ;;  %v4797_v9 = vmul.f32 %v4796_v7, %v8388_v24  ;;  %v6538_v21 = vld [vmem:[%s8810_s6 + $0x48] sm:$0xff]  ;;  %v7763_v5 = vmov 0  }
 0x435   :  { %7719 = vset.pattern.permute.xlu0 %v7763_v5 }
 0x436   :  { %v4716_v11 = vadd.f32 %v8656_v59, %v4640_v8  ;;  %v4876_v12 = vpop.permute.xlu0 %4875  ;;  %v4958_v16 = vpop.permute.xlu1 %4957 }
 0x437   :  { %v4878_v17 = vsel %vm8826_vm6, %v4876_v12, 0.0  ;;  %v4960_v18 = vsel %vm8827_vm7, %v4958_v16, 0.0 }
 0x438   :  { %v4798_v20 = vadd.f32 %v4797_v9, %v4716_v11  ;;  %v4879_v22 = vmul.f32 %v4878_v17, %v8396_v32  ;;  %v4961_v23 = vmul.f32 %v4960_v18, %v8402_v38  ;;  %v143_v17 = vld [vmem:[%s8811_s3] sm:$0xff] }
 0x43a   :  { %v4880_v25 = vadd.f32 %v4879_v22, %v4798_v20  ;;  %v5040_v26 = vpop.permute.xlu0 %5039  ;;  %v5122_v28 = vpop.permute.xlu1 %5121 }
 0x43b   :  { %v5042_v29 = vsel %vm8828_vm14, %v5040_v26, 0.0  ;;  %v5124_v31 = vsel %vm8829_vm9, %v5122_v28, 0.0 }
 0x43c   :  { %v4962_v33 = vadd.f32 %v4961_v23, %v4880_v25  ;;  %v5043_v59 = vmul.f32 %v5042_v29, %v8411_v35  ;;  %v5125_v34 = vmul.f32 %v5124_v31, %v8416_v52 }
 0x43e   :  { %v5044_v37 = vadd.f32 %v5043_v59, %v4962_v33  ;;  %v5204_v39 = vpop.permute.xlu0 %5203  ;;  %v5286_v42 = vpop.permute.xlu1 %5285 }
 0x43f   :  { %v5206_v43 = vsel %vm8830_vm4, %v5204_v39, 0.0  ;;  %v5288_v44 = vsel %vm8831_vm11, %v5286_v42, 0.0 }
 0x440   :  { %v5126_v45 = vadd.f32 %v5125_v34, %v5044_v37  ;;  %v5207_v46 = vmul.f32 %v5206_v43, %v8425_v62  ;;  %v5289_v47 = vmul.f32 %v5288_v44, %v8430_v4 }
 0x442   :  { %v5208_v48 = vadd.f32 %v5207_v46, %v5126_v45  ;;  %v5368_v50 = vpop.permute.xlu0 %5367  ;;  %v5450_v51 = vpop.permute.xlu1 %5449 }
 0x443   :  { %v5370_v54 = vsel %vm8832_vm12, %v5368_v50, 0.0  ;;  %v5452_v13 = vsel %vm8833_vm8, %v5450_v51, 0.0 }
 0x444   :  { %v5290_v55 = vadd.f32 %v5289_v47, %v5208_v48  ;;  %v5371_v27 = vmul.f32 %v5370_v54, %v8439_v14  ;;  %v5453_v36 = vmul.f32 %v5452_v13, %v8444_v19  ;;  %v6524_v14 = vld [vmem:[%s8810_s6 + $0x10] sm:$0xff]  ;;  %v6526_v19 = vld [vmem:[%s8810_s6 + $0x18] sm:$0xff] }
 0x446   :  { %v5372_v41 = vadd.f32 %v5371_v27, %v5290_v55  ;;  %v5532_v56 = vpop.permute.xlu0 %5531 }
 0x447   :  { %v5534_v57 = vsel %vm8834_vm5, %v5532_v56, 0.0 }
 0x448   :  { %v5454_v58 = vadd.f32 %v5453_v36, %v5372_v41  ;;  %v5535_v62 = vmul.f32 %v5534_v57, %v8453_v30  ;;  %v6528_v30 = vld [vmem:[%s8810_s6 + $0x20] sm:$0xff] }
 0x44a   :  { %v5536_v4 = vadd.f32 %v5535_v62, %v5454_v58 }
 0x44c   :  { %7380 = vmatpush3.msra.mxu0 %v5536_v4  ;;  %7385 = vmatpush3.msra.mxu1 %v5536_v4 }
 0x44d   :  { %7382 = vmatmul.mubr.msk.f32.vlgmr.msra.gmra.mrb[68].mxu0 %vm1333_vm0, %v5537_v60  ;;  %7387 = vmatmul.mubr.msk.f32.vlgmr.msra.gmra.mrb[64].mxu1 %vm1333_vm0, %v6522_v63 }
 0x44e   :  { %7389 = vmatprep.subr.mxu0 %v7720_v0  ;;  %7394 = vmatprep.subr.mxu1 %v7720_v0 }
 0x44f   :  { %7390 = vmatpush3.msra.mxu0 %v5536_v4  ;;  %7395 = vmatpush3.msra.mxu1 %v5536_v4 }
 0x450   :  { %7391 = vmatprep.mubr.msk.f32.mxu0 %vm7721_vm2, %v7720_v0  ;;  %7396 = vmatprep.mubr.msk.f32.mxu1 %vm7721_vm2, %v7720_v0 }
 0x451   :  { %7399 = vmatprep.subr.mxu0 %v7720_v0  ;;  %7404 = vmatprep.subr.mxu1 %v7720_v0 }
 0x452   :  { %7392 = vmatmul.mubr.msk.f32.vlgmr.msra.gmra.mrb[70].mxu0 %vm1333_vm0, %v6524_v14  ;;  %7397 = vmatmul.mubr.msk.f32.vlgmr.msra.gmra.mrb[66].mxu1 %vm1333_vm0, %v6526_v19 }
 0x453   :  { %7400 = vmatpush3.msra.mxu0 %v5536_v4  ;;  %7405 = vmatpush3.msra.mxu1 %v5536_v4 }
 0x454   :  { %7401 = vmatprep.mubr.msk.f32.mxu0 %vm7721_vm2, %v7720_v0  ;;  %7406 = vmatprep.mubr.msk.f32.mxu1 %vm7721_vm2, %v7720_v0 }
 0x455   :  { %7409 = vmatprep.subr.mxu0 %v7720_v0  ;;  %7414 = vmatprep.subr.mxu1 %v7720_v0 }
 0x456   :  { %7402 = vmatmul.mubr.msk.f32.vlgmr.msra.gmra.mrb[72].mxu0 %vm1333_vm0, %v6528_v30  ;;  %7407 = vmatmul.mubr.msk.f32.vlgmr.msra.gmra.mrb[68].mxu1 %vm1333_vm0, %v6530_v1 }
 0x457   :  { %7410 = vmatpush3.msra.mxu0 %v5536_v4  ;;  %7415 = vmatpush3.msra.mxu1 %v5536_v4 }
 0x458   :  { %7411 = vmatprep.mubr.msk.f32.mxu0 %vm7721_vm2, %v7720_v0  ;;  %7416 = vmatprep.mubr.msk.f32.mxu1 %vm7721_vm2, %v7720_v0 }
 0x459   :  { %7419 = vmatprep.subr.mxu0 %v7720_v0  ;;  %7424 = vmatprep.subr.mxu1 %v7720_v0 }
 0x45a   :  { %7412 = vmatmul.mubr.msk.f32.vlgmr.msra.gmra.mrb[74].mxu0 %vm1333_vm0, %v6532_v49  ;;  %7417 = vmatmul.mubr.msk.f32.vlgmr.msra.gmra.mrb[70].mxu1 %vm1333_vm0, %v6534_v53 }
 0x45b   :  { %7420 = vmatpush3.msra.mxu0 %v5536_v4  ;;  %7425 = vmatpush3.msra.mxu1 %v5536_v4 }
 0x45c   :  { %7421 = vmatprep.mubr.msk.f32.mxu0 %vm7721_vm2, %v7720_v0  ;;  %7426 = vmatprep.mubr.msk.f32.mxu1 %vm7721_vm2, %v7720_v0  ;;  %vm8835_vm2 = vmmov %vm8824_vm13 }
 0x45d   :  { %vm8840_vm13 = vmmov %vm8828_vm14 }
 0x45e   :  { %7422 = vmatmul.mubr.msk.f32.vlgmr.msra.gmra.mrb[76].mxu0 %vm1333_vm0, %v6536_v3  ;;  %7427 = vmatmul.mubr.msk.f32.vlgmr.msra.gmra.mrb[72].mxu1 %vm1333_vm0, %v6538_v21  ;;  %vm8837_vm0 = vmmov %vm8826_vm6 }
 0x520   :  { %v5607_v6 = vpop.f32.mrb[68].mxu0  ;;  %v5688_v7 = vpop.f32.mrb[64].mxu1 }
 0x521   :  { %5693 = vrot.lane.b32.xlu0 %v5688_v7, %s7741_s11  ;;  %5612 = vrot.lane.b32.xlu1 %v5607_v6, %s7738_s8  ;;  %v7383_v8 = vpop.f32.mrb[69].mxu0  ;;  %v7388_v9 = vpop.f32.mrb[65].mxu1 }
 0x525   :  { %v5770_v11 = vpop.f32.mrb[70].mxu0  ;;  %v5852_v12 = vpop.f32.mrb[66].mxu1 }
 0x526   :  { %5857 = vrot.lane.b32.xlu0 %v5852_v12, %s7742_s2  ;;  %5775 = vrot.lane.b32.xlu1 %v5770_v11, %s7740_s10  ;;  %v7398_v0 = vpop.f32.mrb[67].mxu1  ;;  %v7393_v16 = vpop.f32.mrb[71].mxu0 }
 0x529   :  { %v6010_v18 = vpop.f32.mrb[68].mxu1  ;;  %v5934_v20 = vpop.f32.mrb[72].mxu0 }
 0x52a   :  { %146 = vperm.xlu0 %7719, %v143_v17   ;;  %6015 = vrot.lane.b32.xlu1 %v6010_v18, %s7744_s13  ;;  %v7403_v22 = vpop.f32.mrb[73].mxu0  ;;  %v7408_v23 = vpop.f32.mrb[69].mxu1 }
 0x52d   :  { %v6092_v25 = vpop.f32.mrb[74].mxu0  ;;  %v6174_v26 = vpop.f32.mrb[70].mxu1 }
 0x52e   :  { %6097 = vrot.lane.b32.xlu1 %v6092_v25, %s7743_s12  ;;  %v7413_v28 = vpop.f32.mrb[75].mxu0  ;;  %v7418_v29 = vpop.f32.mrb[71].mxu1 }
 0x531   :  { %v6256_v31 = vpop.f32.mrb[76].mxu0  ;;  %v6338_v33 = vpop.f32.mrb[72].mxu1 }
 0x532   :  { %6179 = vrot.lane.b32.xlu1 %v6174_v26, %s7746_s15  ;;  %6261 = vrot.lane.b32.xlu0 %v6256_v31, %s7745_s14  ;;  %v7423_v59 = vpop.f32.mrb[77].mxu0  ;;  %v7428_v34 = vpop.f32.mrb[73].mxu1 }
 0x536   :  { %6343 = vrot.lane.b32.xlu1 %v6338_v33, %s7748_s17 }
 0x593   :  { %v5613_v37 = vpop.permute.xlu1 %5612  ;;  %v5694_v39 = vpop.permute.xlu0 %5693 }
 0x594   :  { %v5615_v42 = vsel %vm33_vm1, 0.0, %v5613_v37  ;;  %v5696_v43 = vsel %vm1792_vm10, 0.0, %v5694_v39  ;;  %vm8836_vm1 = vmmov %vm8825_vm3 }
 0x595   :  { %v5616_v44 = vmul.f32 %v5615_v42, %v8361_v61  ;;  %v5697_v45 = vmul.f32 %v5696_v43, %v8366_v2  ;;  %vm8838_vm10 = vmmov %vm8827_vm7 }
 0x597   :  { %v5698_v51 = vadd.f32 %v5697_v45, %v5616_v44 }
 0x598   :  { %v5776_v46 = vpop.permute.xlu1 %5775  ;;  %v5858_v48 = vpop.permute.xlu0 %5857 }
 0x599   :  { %v5778_v47 = vsel %vm8835_vm2, 0.0, %v5776_v46  ;;  %v5860_v54 = vsel %vm1976_vm15, 0.0, %v5858_v48  ;;  %vm8839_vm15 = vmmov %vm8829_vm9 }
 0x59a   :  { %v5779_v50 = vmul.f32 %v5778_v47, %v8375_v10  ;;  %v5861_v27 = vmul.f32 %v5860_v54, %v8379_v15 }
 0x59c   :  { %v6016_v13 = vpop.permute.xlu1 %6015  ;;  %v5780_v55 = vadd.f32 %v5779_v50, %v5698_v51 }
 0x59d   :  { %v6018_v56 = vsel %vm8836_vm1, %v6016_v13, 0.0 }
 0x59e   :  { %v5862_v41 = vadd.f32 %v5861_v27, %v5780_v55  ;;  %v6019_v2 = vmul.f32 %v6018_v56, %v8388_v24 }
 0x5a0   :  { %v6098_v36 = vpop.permute.xlu1 %6097  ;;  %v5938_v61 = vadd.f32 %v5934_v20, %v5862_v41 }
 0x5a1   :  { %v6100_v58 = vsel %vm8837_vm0, %v6098_v36, 0.0 }
 0x5a2   :  { %v6020_v10 = vadd.f32 %v6019_v2, %v5938_v61  ;;  %v6101_v4 = vmul.f32 %v6100_v58, %v8396_v32 }
 0x5a4   :  { %v6180_v57 = vpop.permute.xlu1 %6179  ;;  %v6102_v19 = vadd.f32 %v6101_v4, %v6020_v10 }
 0x5a5   :  { %v6182_v62 = vsel %vm8838_vm10, %v6180_v57, 0.0 }
 0x5a6   :  { %v6183_v14 = vmul.f32 %v6182_v62, %v8402_v38 }
 0x5a8   :  { %v6344_v63 = vpop.permute.xlu1 %6343  ;;  %v6184_v49 = vadd.f32 %v6183_v14, %v6102_v19 }
 0x5a9   :  { %v147_v60 = vpop.permute.xlu0 %146  ;;  %v6346_v15 = vsel %vm8839_vm15, %v6344_v63, 0.0 }
 0x5aa   :  { %v149_v24 = vadd.f32 %v147_v60, %v8072_v40  ;;  %v6347_v3 = vmul.f32 %v6346_v15, %v8416_v52 }
 0x5ac   :  { %v150_v5 = vmax.f32 %v149_v24, 0.0 }
 0x5ad   :  { %v6262_v30 = vpop.permute.xlu0 %6261 }
 0x5ae   :  { %v6264_v1 = vsel %vm8840_vm13, %v6262_v30, 0.0 }
 0x5af   :  { %v6265_v53 = vmul.f32 %v6264_v1, %v8411_v35 }
 0x5b1   :  { %v6266_v21 = vadd.f32 %v6265_v53, %v6184_v49 }
 0x5b3   :  { %v6348_v32 = vadd.f32 %v6347_v3, %v6266_v21 }
 0x5b5   :  { %v6349_v6 = vadd.f32 %v6348_v32, %v150_v5 }
 0x5b7   :  { %6350 = vst [vmem:[%s8812_s7] sm:$0xff] %v6349_v6 }

</bundles_post_ra>
